<compile_context>
chip_gen: v7x
topology: tpu7x:2x2x1
jax: 0.10.0
libtpu: 0.0.40
codegen_flags: <defaults>
</compile_context>

<pallas_src>
import functools
import math

import jax
import jax.numpy as jnp
from jax import lax
from jax.experimental import pallas as pl
from jax.experimental.pallas import tpu as pltpu

LANE = 128


def _round_up(x, m):
    return (x + m - 1) // m * m


# ---------------------------------------------------------------------------
# In-kernel tap accumulation (shared by conv1 / conv2)
# ---------------------------------------------------------------------------
def _conv_taps(stride, ho, wob, x_ref, w_ref):
    """sum_k A_k @ W_k over the 9 conv taps. bf16 MXU operands, explicit f32 accumulator.

    x_ref: (1, s*s*(ho+2), wpad, cin_p) bf16 parity-split, spatially padded activation.
    w_ref: (9, cin_p, cout_p) bf16 (BN scale folded in).
    Returns (ho*wob, cout_p) f32.
    """
    pp = stride * stride
    hb = x_ref.shape[1] // pp                       # rows per parity plane (= ho + 2)
    cin = x_ref.shape[-1]
    acc = jnp.zeros((ho * wob, w_ref.shape[-1]), jnp.float32)
    for kh in range(3):
        for kw in range(3):
            p = (kh % stride) * stride + (kw % stride)   # parity plane
            r0, c0 = kh // stride, kw // stride          # offset inside plane
            a = x_ref[0, p * hb + r0:p * hb + r0 + ho, c0:c0 + wob, :]
            a = a.reshape(ho * wob, cin)   # free relabel: wob % 8 == 0, cin % 128 == 0
            acc += jnp.dot(a, w_ref[kh * 3 + kw], preferred_element_type=jnp.float32)
    return acc


def _conv1_epilogue(ho, wo, wob, acc, b_ref, o_ref):
    """BN shift + ReLU, then store spatially padded (+1 zero halo) bf16 for conv2."""
    y = jnp.maximum(acc + b_ref[...], 0.0).reshape(ho, wob, -1)
    if wo != wob:
        # columns >= wo were computed over width padding; they must stay exactly 0.
        col = lax.broadcasted_iota(jnp.int32, (ho, wob, 1), 1)
        y = jnp.where(col < wo, y, 0.0)
    o_ref[...] = jnp.zeros_like(o_ref)                        # halo + width padding
    o_ref[0, 1:ho + 1, 1:wob + 1, :] = y.astype(o_ref.dtype)  # interior


# ---------------------------------------------------------------------------
# Kernels
# ---------------------------------------------------------------------------
def _conv1_kernel(stride, ho, wo, wob, x_ref, w_ref, b_ref, o_ref):
    acc = _conv_taps(stride, ho, wob, x_ref, w_ref)
    _conv1_epilogue(ho, wo, wob, acc, b_ref, o_ref)


def _conv1_proj_kernel(stride, ho, wo, wob, x_ref, w_ref, b_ref, ws_ref, bs_ref,
                       o_ref, s_ref):
    acc = _conv_taps(stride, ho, wob, x_ref, w_ref)
    _conv1_epilogue(ho, wo, wob, acc, b_ref, o_ref)
    # Fused 1x1-conv + BN projection shortcut: its operand x[::s, ::s] is parity plane
    # (1 % s, 1 % s) of the tap planes -> already resident in VMEM, no extra HBM read.
    pp = stride * stride
    hb = x_ref.shape[1] // pp
    p = (1 % stride) * stride + (1 % stride)
    o = 1 // stride
    r = x_ref[0, p * hb + o:p * hb + o + ho, o:o + wob, :].reshape(ho * wob, -1)
    sc = jnp.dot(r, ws_ref[...], preferred_element_type=jnp.float32) + bs_ref[...]
    s_ref[...] = sc.reshape(1, ho, wob, -1).astype(s_ref.dtype)


def _conv2_kernel(ho, wo, wob, r_off, x_ref, w_ref, b_ref, r_ref, o_ref):
    acc = _conv_taps(1, ho, wob, x_ref, w_ref)
    rr, rc = r_off
    res = r_ref[0, rr:rr + ho, rc:rc + wob, :].astype(jnp.float32)
    y = acc.reshape(ho, wob, -1) + b_ref[...] + res
    o_ref[...] = jnp.maximum(y, 0.0).reshape(o_ref.shape).astype(o_ref.dtype)


# ---------------------------------------------------------------------------
# pallas_call wrappers
# ---------------------------------------------------------------------------
def _vmem_limit_bytes(blocks):
    """Derive the VMEM limit from the actual (double-buffered) block footprint."""
    nbytes = sum(math.prod(s) * jnp.dtype(d).itemsize for s, d in blocks)
    # 2x for double buffering + headroom; keep comfortably under v7x's 64 MiB VMEM.
    return int(min(60 * 1024 * 1024, max(4 * 1024 * 1024, 2 * nbytes + 2 * 1024 * 1024)))


def conv1_bn_relu(planes, w9, b1, stride, ho, wo, wob, wpad, proj=None):
    """conv3x3(stride) + BN + ReLU, output stored spatially padded in bf16.
    With `proj=(ws, bs)` the 1x1-conv+BN shortcut is fused and emitted as 2nd output."""
    n = planes.shape[0]
    cout_p = w9.shape[-1]
    pin = planes.shape[1:]

    in_specs = [
        pl.BlockSpec((1,) + pin, lambda i: (i, 0, 0, 0)),
        pl.BlockSpec(w9.shape, lambda i: (0, 0, 0)),
        pl.BlockSpec(b1.shape, lambda i: (0, 0)),
    ]
    args = [planes, w9, b1]
    out_shape = [jax.ShapeDtypeStruct((n, ho + 2, wpad, cout_p), jnp.bfloat16)]
    out_specs = [pl.BlockSpec((1, ho + 2, wpad, cout_p), lambda i: (i, 0, 0, 0))]
    blocks = [((1,) + pin, planes.dtype), (w9.shape, w9.dtype), (b1.shape, b1.dtype),
              ((1, ho + 2, wpad, cout_p), jnp.bfloat16)]

    if proj is not None:
        ws, bs = proj
        in_specs += [pl.BlockSpec(ws.shape, lambda i: (0, 0)),
                     pl.BlockSpec(bs.shape, lambda i: (0, 0))]
        args += [ws, bs]
        out_shape.append(jax.ShapeDtypeStruct((n, ho, wob, cout_p), jnp.bfloat16))
        out_specs.append(pl.BlockSpec((1, ho, wob, cout_p), lambda i: (i, 0, 0, 0)))
        blocks += [(ws.shape, ws.dtype), (bs.shape, bs.dtype),
                   ((1, ho, wob, cout_p), jnp.bfloat16)]
        kernel = functools.partial(_conv1_proj_kernel, stride, ho, wo, wob)
    else:
        kernel = functools.partial(_conv1_kernel, stride, ho, wo, wob)

    outs = pl.pallas_call(
        kernel,
        out_shape=tuple(out_shape),
        grid_spec=pltpu.PrefetchScalarGridSpec(
            num_scalar_prefetch=0,
            grid=(n,),
            in_specs=in_specs,
            out_specs=tuple(out_specs),
        ),
        compiler_params=pltpu.CompilerParams(
            dimension_semantics=("parallel",),
            vmem_limit_bytes=_vmem_limit_bytes(blocks),
        ),
    )(*args)
    return outs if isinstance(outs, (tuple, list)) else (outs,)


def conv2_bn_res_relu(out1p, w9, b2, res, r_off, ho, wo, wob):
    """conv3x3(stride 1) + BN + residual add + ReLU on the padded bf16 activation."""
    n = out1p.shape[0]
    cout_p = w9.shape[-1]
    xin, rin = out1p.shape[1:], res.shape[1:]
    out_block = (1, ho, wob, cout_p)
    blocks = [((1,) + xin, out1p.dtype), (w9.shape, w9.dtype), (b2.shape, b2.dtype),
              ((1,) + rin, res.dtype), (out_block, jnp.float32)]
    return pl.pallas_call(
        functools.partial(_conv2_kernel, ho, wo, wob, r_off),
        out_shape=jax.ShapeDtypeStruct((n, ho, wob, cout_p), jnp.float32),
        grid_spec=pltpu.PrefetchScalarGridSpec(
            num_scalar_prefetch=0,
            grid=(n,),
            in_specs=[
                pl.BlockSpec((1,) + xin, lambda i: (i, 0, 0, 0)),
                pl.BlockSpec(w9.shape, lambda i: (0, 0, 0)),
                pl.BlockSpec(b2.shape, lambda i: (0, 0)),
                pl.BlockSpec((1,) + rin, lambda i: (i, 0, 0, 0)),
            ],
            out_specs=pl.BlockSpec(out_block, lambda i: (i, 0, 0, 0)),
        ),
        compiler_params=pltpu.CompilerParams(
            dimension_semantics=("parallel",),
            vmem_limit_bytes=_vmem_limit_bytes(blocks),
        ),
    )(out1p, w9, b2, res)


# ---------------------------------------------------------------------------
# Host-side glue (layout only: channel/width padding, parity split, BN folding)
# ---------------------------------------------------------------------------
def _pad_channels(x, cp):
    c = x.shape[-1]
    return x if c == cp else jnp.pad(x, [(0, 0)] * (x.ndim - 1) + [(0, cp - c)])


def fold_bn(gamma, beta, mean, var, eps=1e-5):
    scale = gamma / jnp.sqrt(var + eps)
    return scale, beta - mean * scale


def prep_conv3_weight(w_oihw, scale, cin_p, cout_p):
    """(Cout,Cin,3,3) -> (9, Cin_p, Cout_p) bf16 with the BN scale folded in."""
    cout, cin, kh, kw = w_oihw.shape
    w = w_oihw * scale.reshape(-1, 1, 1, 1)
    w = jnp.transpose(w, (2, 3, 1, 0)).reshape(kh * kw, cin, cout)
    w = jnp.pad(w, ((0, 0), (0, cin_p - cin), (0, cout_p - cout)))
    return w.astype(jnp.bfloat16)


def prep_conv1x1_weight(w_oihw, scale, cin_p, cout_p):
    cout, cin = w_oihw.shape[:2]
    w = (w_oihw[:, :, 0, 0] * scale.reshape(-1, 1)).T
    w = jnp.pad(w, ((0, cin_p - cin), (0, cout_p - cout)))
    return w.astype(jnp.bfloat16)


def make_planes(x_nhwc, stride, ho, wo, wpad):
    """Spatial pad by 1, split into stride^2 parity planes (every 3x3 tap becomes a
    contiguous static in-kernel slice), pad width to wpad (mult of 8), cast to bf16.
    Returns (N, stride*stride*(ho+2), wpad, C) bf16."""
    n = x_nhwc.shape[0]
    c = x_nhwc.shape[-1]
    xp = jnp.pad(x_nhwc, ((0, 0), (1, 1), (1, 1), (0, 0)))
    planes = []
    for ph in range(stride):
        for pw in range(stride):
            q = xp[:, ph::stride, pw::stride, :][:, :ho + 2, :wo + 2, :]
            q = jnp.pad(q, ((0, 0), (0, ho + 2 - q.shape[1]),
                            (0, wpad - q.shape[2]), (0, 0)))
            planes.append(q)
    out = jnp.stack(planes, axis=1)
    return out.reshape(n, stride * stride * (ho + 2), wpad, c).astype(jnp.bfloat16)


# ---------------------------------------------------------------------------
# ResidualBlock forward (Pallas)
# ---------------------------------------------------------------------------
def residual_block(x_nchw, params, stride):
    # NOTE: in a full network keep activations NHWC bf16 end-to-end; the NCHW<->NHWC
    # transposes here only exist to match the PyTorch module interface.
    x = jnp.transpose(x_nchw, (0, 2, 3, 1)).astype(jnp.float32)    # NHWC
    n, h, w, cin = x.shape
    cout = params["w1"].shape[0]
    cin_p, cout_p = _round_up(cin, LANE), _round_up(cout, LANE)

    ho = (h + 2 - 3) // stride + 1
    wo = (w + 2 - 3) // stride + 1
    wob = _round_up(wo, 8)              # sublane-dense output width
    wpad = wob + 8                      # padded (+halo) activation width, mult of 8

    s1, b1 = fold_bn(*params["bn1"])
    s2, b2 = fold_bn(*params["bn2"])
    w1 = prep_conv3_weight(params["w1"], s1, cin_p, cout_p)
    w2 = prep_conv3_weight(params["w2"], s2, cout_p, cout_p)
    b1p = _pad_channels(b1.reshape(1, -1), cout_p)
    b2p = _pad_channels(b2.reshape(1, -1), cout_p)

    planes1 = make_planes(_pad_channels(x, cin_p), stride, ho, wo, wpad)   # bf16

    if stride != 1 or cin != cout:
        ss, bs = fold_bn(*params["bns"])
        ws = prep_conv1x1_weight(params["ws"], ss, cin_p, cout_p)
        bsp = _pad_channels(bs.reshape(1, -1), cout_p)
        # conv1 + bn1 + relu, with the 1x1-conv+bn shortcut fused (no rx gather).
        out1p, shortcut = conv1_bn_relu(planes1, w1, b1p, stride, ho, wo, wob, wpad,
                                        proj=(ws, bsp))
        res, r_off = shortcut, (0, 0)
    else:
        (out1p,) = conv1_bn_relu(planes1, w1, b1p, stride, ho, wo, wob, wpad)
        res, r_off = planes1, (1, 1)    # identity residual read straight from padded x

    # conv2 + bn2 + residual + relu, consuming conv1's padded bf16 output directly.
    out2 = conv2_bn_res_relu(out1p, w2, b2p, res, r_off, ho, wo, wob)
    out = out2[:, :, :wo, :cout]                                   # drop width/ch padding
    return jnp.transpose(out, (0, 3, 1, 2))                        # back to NCHW


# ---------------------------------------------------------------------------
# Pure-JAX reference (lax.conv, f32 HIGHEST precision) for correctness check
# ---------------------------------------------------------------------------
def _conv_bn_ref(x, w, bn, stride, pad):
    y = lax.conv_general_dilated(
        x, w, (stride, stride), [(pad, pad), (pad, pad)],
        dimension_numbers=("NCHW", "OIHW", "NCHW"),
        precision=lax.Precision.HIGHEST)
    scale, shift = fold_bn(*bn)
    return y * scale.reshape(1, -1, 1, 1) + shift.reshape(1, -1, 1, 1)


def residual_block_ref(x, params, stride):
    cin = x.shape[1]
    cout = params["w1"].shape[0]
    out = jax.nn.relu(_conv_bn_ref(x, params["w1"], params["bn1"], stride, 1))
    out = _conv_bn_ref(out, params["w2"], params["bn2"], 1, 1)
    if stride != 1 or cin != cout:
        sc = _conv_bn_ref(x, params["ws"], params["bns"], stride, 0)
    else:
        sc = x
    return jax.nn.relu(out + sc)


# ---------------------------------------------------------------------------
def make_params(key, in_channels, out_channels, stride):
    ks = jax.random.split(key, 16)

    def bn_params(k):
        k1, k2, k3, k4 = jax.random.split(k, 4)
        gamma = jax.random.uniform(k1, (out_channels,), jnp.float32, 0.5, 1.5)
        beta = 0.1 * jax.random.normal(k2, (out_channels,), jnp.float32)
        mean = 0.1 * jax.random.normal(k3, (out_channels,), jnp.float32)
        var = jax.random.uniform(k4, (out_channels,), jnp.float32, 0.5, 1.5)
        return (gamma, beta, mean, var)

    params = {
        "w1": 0.1 * jax.random.normal(ks[0], (out_channels, in_channels, 3, 3), jnp.float32),
        "bn1": bn_params(ks[1]),
        "w2": 0.1 * jax.random.normal(ks[2], (out_channels, out_channels, 3, 3), jnp.float32),
        "bn2": bn_params(ks[3]),
    }
    if stride != 1 or in_channels != out_channels:
        params["ws"] = 0.1 * jax.random.normal(
            ks[4], (out_channels, in_channels, 1, 1), jnp.float32)
        params["bns"] = bn_params(ks[5])
    return params


if __name__ == "__main__":
    key = jax.random.PRNGKey(0)
    kx, kp1, kp2 = jax.random.split(key, 3)

    rb = jax.jit(residual_block, static_argnums=2)
    ok = True
    # bf16 MXU operands / bf16 inter-conv activation bound the tolerance vs. the f32 ref.
    TOL = 3e-2

    # Case 1: projection shortcut (stride=2, channel change)
    x = jax.random.normal(kx, (2, 4, 16, 16), jnp.float32)
    params = make_params(kp1, 4, 8, stride=2)
    out = jax.block_until_ready(rb(x, params, 2))
    ref = residual_block_ref(x, params, 2)
    ok &= bool(jnp.allclose(out, ref, atol=TOL, rtol=TOL))
    ok &= out.shape == (2, 8, 8, 8)

    # Case 2: identity shortcut (stride=1, same channels)
    x2 = jax.random.normal(kx, (2, 8, 16, 16), jnp.float32)
    params2 = make_params(kp2, 8, 8, stride=1)
    out2 = jax.block_until_ready(rb(x2, params2, 1))
    ref2 = residual_block_ref(x2, params2, 1)
    ok &= bool(jnp.allclose(out2, ref2, atol=TOL, rtol=TOL))
    ok &= out2.shape == (2, 8, 16, 16)

    if ok:
        print("KERNEL_OK")
    else:
        print("MISMATCH")
</pallas_src>

<mosaic_0001>
module attributes {stable_mosaic.version = 11 : i64} {
  func.func @_conv1_proj_kernel(%arg0: i32, %arg1: memref<1x40x16x128xbf16, #tpu.memory_space<vmem>>, %arg2: memref<9x128x128xbf16, #tpu.memory_space<vmem>>, %arg3: memref<1x128xf32, #tpu.memory_space<vmem>>, %arg4: memref<128x128xbf16, #tpu.memory_space<vmem>>, %arg5: memref<1x128xf32, #tpu.memory_space<vmem>>, %arg6: memref<1x10x16x128xbf16, #tpu.memory_space<vmem>>, %arg7: memref<1x8x8x128xbf16, #tpu.memory_space<vmem>>) attributes {dimension_semantics = [#tpu.dimension_semantics<parallel>], iteration_bounds = array<i64: 2>, scalar_prefetch = 0 : i64, scratch_operands = 0 : i64, tpu.core_type = #tpu.core_type<tc>, window_params = [{transform_indices = @transform_0, window_bounds = array<i64: 1, 40, 16, 128>}, {pipeline_mode = #tpu.pipeline_mode<synchronous>, transform_indices = @transform_1, window_bounds = array<i64: 9, 128, 128>}, {pipeline_mode = #tpu.pipeline_mode<synchronous>, transform_indices = @transform_2, window_bounds = array<i64: 1, 128>}, {pipeline_mode = #tpu.pipeline_mode<synchronous>, transform_indices = @transform_3, window_bounds = array<i64: 128, 128>}, {pipeline_mode = #tpu.pipeline_mode<synchronous>, transform_indices = @transform_4, window_bounds = array<i64: 1, 128>}, {transform_indices = @transform_5, window_bounds = array<i64: 1, 10, 16, 128>}, {transform_indices = @transform_6, window_bounds = array<i64: 1, 8, 8, 128>}]} {
    %cst = arith.constant 0.000000e+00 : f32
    %0 = vector.broadcast %cst : f32 to vector<64x128xf32>
    %c0 = arith.constant 0 : index
    %c0_0 = arith.constant 0 : index
    %c0_1 = arith.constant 0 : index
    %c0_2 = arith.constant 0 : index
    %1 = vector.load %arg1[%c0, %c0_0, %c0_1, %c0_2] : memref<1x40x16x128xbf16, #tpu.memory_space<vmem>>, vector<1x8x8x128xbf16>
    %2 = vector.shape_cast %1 : vector<1x8x8x128xbf16> to vector<8x8x128xbf16>
    %3 = vector.shape_cast %2 : vector<8x8x128xbf16> to vector<64x128xbf16>
    %c0_3 = arith.constant 0 : index
    %c0_4 = arith.constant 0 : index
    %c0_5 = arith.constant 0 : index
    %4 = vector.load %arg2[%c0_3, %c0_4, %c0_5] : memref<9x128x128xbf16, #tpu.memory_space<vmem>>, vector<1x128x128xbf16>
    %5 = vector.shape_cast %4 : vector<1x128x128xbf16> to vector<128x128xbf16>
    %cst_6 = arith.constant dense<0.000000e+00> : vector<64x128xf32>
    %6 = tpu.matmul %3, %5, %cst_6 {dimension_numbers = #tpu.dot_dimension_numbers<[1], [0], [0], [1], [0, 0, 1, 1], [], []>} : vector<64x128xbf16>, vector<128x128xbf16>, vector<64x128xf32> -> vector<64x128xf32>
    %7 = arith.addf %0, %6 : vector<64x128xf32>
    %c0_7 = arith.constant 0 : index
    %c10 = arith.constant 10 : index
    %c0_8 = arith.constant 0 : index
    %c0_9 = arith.constant 0 : index
    %8 = vector.load %arg1[%c0_7, %c10, %c0_8, %c0_9] : memref<1x40x16x128xbf16, #tpu.memory_space<vmem>>, vector<1x8x8x128xbf16>
    %9 = vector.shape_cast %8 : vector<1x8x8x128xbf16> to vector<8x8x128xbf16>
    %10 = vector.shape_cast %9 : vector<8x8x128xbf16> to vector<64x128xbf16>
    %c1 = arith.constant 1 : index
    %c0_10 = arith.constant 0 : index
    %c0_11 = arith.constant 0 : index
    %11 = vector.load %arg2[%c1, %c0_10, %c0_11] : memref<9x128x128xbf16, #tpu.memory_space<vmem>>, vector<1x128x128xbf16>
    %12 = vector.shape_cast %11 : vector<1x128x128xbf16> to vector<128x128xbf16>
    %cst_12 = arith.constant dense<0.000000e+00> : vector<64x128xf32>
    %13 = tpu.matmul %10, %12, %cst_12 {dimension_numbers = #tpu.dot_dimension_numbers<[1], [0], [0], [1], [0, 0, 1, 1], [], []>} : vector<64x128xbf16>, vector<128x128xbf16>, vector<64x128xf32> -> vector<64x128xf32>
    %14 = arith.addf %7, %13 : vector<64x128xf32>
    %c0_13 = arith.constant 0 : index
    %c0_14 = arith.constant 0 : index
    %c1_15 = arith.constant 1 : index
    %c0_16 = arith.constant 0 : index
    %15 = vector.load %arg1[%c0_13, %c0_14, %c1_15, %c0_16] : memref<1x40x16x128xbf16, #tpu.memory_space<vmem>>, vector<1x8x8x128xbf16>
    %16 = vector.shape_cast %15 : vector<1x8x8x128xbf16> to vector<8x8x128xbf16>
    %17 = vector.shape_cast %16 : vector<8x8x128xbf16> to vector<64x128xbf16>
    %c2 = arith.constant 2 : index
    %c0_17 = arith.constant 0 : index
    %c0_18 = arith.constant 0 : index
    %18 = vector.load %arg2[%c2, %c0_17, %c0_18] : memref<9x128x128xbf16, #tpu.memory_space<vmem>>, vector<1x128x128xbf16>
    %19 = vector.shape_cast %18 : vector<1x128x128xbf16> to vector<128x128xbf16>
    %cst_19 = arith.constant dense<0.000000e+00> : vector<64x128xf32>
    %20 = tpu.matmul %17, %19, %cst_19 {dimension_numbers = #tpu.dot_dimension_numbers<[1], [0], [0], [1], [0, 0, 1, 1], [], []>} : vector<64x128xbf16>, vector<128x128xbf16>, vector<64x128xf32> -> vector<64x128xf32>
    %21 = arith.addf %14, %20 : vector<64x128xf32>
    %c0_20 = arith.constant 0 : index
    %c20 = arith.constant 20 : index
    %c0_21 = arith.constant 0 : index
    %c0_22 = arith.constant 0 : index
    %22 = vector.load %arg1[%c0_20, %c20, %c0_21, %c0_22] : memref<1x40x16x128xbf16, #tpu.memory_space<vmem>>, vector<1x8x8x128xbf16>
    %23 = vector.shape_cast %22 : vector<1x8x8x128xbf16> to vector<8x8x128xbf16>
    %24 = vector.shape_cast %23 : vector<8x8x128xbf16> to vector<64x128xbf16>
    %c3 = arith.constant 3 : index
    %c0_23 = arith.constant 0 : index
    %c0_24 = arith.constant 0 : index
    %25 = vector.load %arg2[%c3, %c0_23, %c0_24] : memref<9x128x128xbf16, #tpu.memory_space<vmem>>, vector<1x128x128xbf16>
    %26 = vector.shape_cast %25 : vector<1x128x128xbf16> to vector<128x128xbf16>
    %cst_25 = arith.constant dense<0.000000e+00> : vector<64x128xf32>
    %27 = tpu.matmul %24, %26, %cst_25 {dimension_numbers = #tpu.dot_dimension_numbers<[1], [0], [0], [1], [0, 0, 1, 1], [], []>} : vector<64x128xbf16>, vector<128x128xbf16>, vector<64x128xf32> -> vector<64x128xf32>
    %28 = arith.addf %21, %27 : vector<64x128xf32>
    %c0_26 = arith.constant 0 : index
    %c30 = arith.constant 30 : index
    %c0_27 = arith.constant 0 : index
    %c0_28 = arith.constant 0 : index
    %29 = vector.load %arg1[%c0_26, %c30, %c0_27, %c0_28] : memref<1x40x16x128xbf16, #tpu.memory_space<vmem>>, vector<1x8x8x128xbf16>
    %30 = vector.shape_cast %29 : vector<1x8x8x128xbf16> to vector<8x8x128xbf16>
    %31 = vector.shape_cast %30 : vector<8x8x128xbf16> to vector<64x128xbf16>
    %c4 = arith.constant 4 : index
    %c0_29 = arith.constant 0 : index
    %c0_30 = arith.constant 0 : index
    %32 = vector.load %arg2[%c4, %c0_29, %c0_30] : memref<9x128x128xbf16, #tpu.memory_space<vmem>>, vector<1x128x128xbf16>
    %33 = vector.shape_cast %32 : vector<1x128x128xbf16> to vector<128x128xbf16>
    %cst_31 = arith.constant dense<0.000000e+00> : vector<64x128xf32>
    %34 = tpu.matmul %31, %33, %cst_31 {dimension_numbers = #tpu.dot_dimension_numbers<[1], [0], [0], [1], [0, 0, 1, 1], [], []>} : vector<64x128xbf16>, vector<128x128xbf16>, vector<64x128xf32> -> vector<64x128xf32>
    %35 = arith.addf %28, %34 : vector<64x128xf32>
    %c0_32 = arith.constant 0 : index
    %c20_33 = arith.constant 20 : index
    %c1_34 = arith.constant 1 : index
    %c0_35 = arith.constant 0 : index
    %36 = vector.load %arg1[%c0_32, %c20_33, %c1_34, %c0_35] : memref<1x40x16x128xbf16, #tpu.memory_space<vmem>>, vector<1x8x8x128xbf16>
    %37 = vector.shape_cast %36 : vector<1x8x8x128xbf16> to vector<8x8x128xbf16>
    %38 = vector.shape_cast %37 : vector<8x8x128xbf16> to vector<64x128xbf16>
    %c5 = arith.constant 5 : index
    %c0_36 = arith.constant 0 : index
    %c0_37 = arith.constant 0 : index
    %39 = vector.load %arg2[%c5, %c0_36, %c0_37] : memref<9x128x128xbf16, #tpu.memory_space<vmem>>, vector<1x128x128xbf16>
    %40 = vector.shape_cast %39 : vector<1x128x128xbf16> to vector<128x128xbf16>
    %cst_38 = arith.constant dense<0.000000e+00> : vector<64x128xf32>
    %41 = tpu.matmul %38, %40, %cst_38 {dimension_numbers = #tpu.dot_dimension_numbers<[1], [0], [0], [1], [0, 0, 1, 1], [], []>} : vector<64x128xbf16>, vector<128x128xbf16>, vector<64x128xf32> -> vector<64x128xf32>
    %42 = arith.addf %35, %41 : vector<64x128xf32>
    %c0_39 = arith.constant 0 : index
    %c1_40 = arith.constant 1 : index
    %c0_41 = arith.constant 0 : index
    %c0_42 = arith.constant 0 : index
    %43 = vector.load %arg1[%c0_39, %c1_40, %c0_41, %c0_42] : memref<1x40x16x128xbf16, #tpu.memory_space<vmem>>, vector<1x8x8x128xbf16>
    %44 = vector.shape_cast %43 : vector<1x8x8x128xbf16> to vector<8x8x128xbf16>
    %45 = vector.shape_cast %44 : vector<8x8x128xbf16> to vector<64x128xbf16>
    %c6 = arith.constant 6 : index
    %c0_43 = arith.constant 0 : index
    %c0_44 = arith.constant 0 : index
    %46 = vector.load %arg2[%c6, %c0_43, %c0_44] : memref<9x128x128xbf16, #tpu.memory_space<vmem>>, vector<1x128x128xbf16>
    %47 = vector.shape_cast %46 : vector<1x128x128xbf16> to vector<128x128xbf16>
    %cst_45 = arith.constant dense<0.000000e+00> : vector<64x128xf32>
    %48 = tpu.matmul %45, %47, %cst_45 {dimension_numbers = #tpu.dot_dimension_numbers<[1], [0], [0], [1], [0, 0, 1, 1], [], []>} : vector<64x128xbf16>, vector<128x128xbf16>, vector<64x128xf32> -> vector<64x128xf32>
    %49 = arith.addf %42, %48 : vector<64x128xf32>
    %c0_46 = arith.constant 0 : index
    %c11 = arith.constant 11 : index
    %c0_47 = arith.constant 0 : index
    %c0_48 = arith.constant 0 : index
    %50 = vector.load %arg1[%c0_46, %c11, %c0_47, %c0_48] : memref<1x40x16x128xbf16, #tpu.memory_space<vmem>>, vector<1x8x8x128xbf16>
    %51 = vector.shape_cast %50 : vector<1x8x8x128xbf16> to vector<8x8x128xbf16>
    %52 = vector.shape_cast %51 : vector<8x8x128xbf16> to vector<64x128xbf16>
    %c7 = arith.constant 7 : index
    %c0_49 = arith.constant 0 : index
    %c0_50 = arith.constant 0 : index
    %53 = vector.load %arg2[%c7, %c0_49, %c0_50] : memref<9x128x128xbf16, #tpu.memory_space<vmem>>, vector<1x128x128xbf16>
    %54 = vector.shape_cast %53 : vector<1x128x128xbf16> to vector<128x128xbf16>
    %cst_51 = arith.constant dense<0.000000e+00> : vector<64x128xf32>
    %55 = tpu.matmul %52, %54, %cst_51 {dimension_numbers = #tpu.dot_dimension_numbers<[1], [0], [0], [1], [0, 0, 1, 1], [], []>} : vector<64x128xbf16>, vector<128x128xbf16>, vector<64x128xf32> -> vector<64x128xf32>
    %56 = arith.addf %49, %55 : vector<64x128xf32>
    %c0_52 = arith.constant 0 : index
    %c1_53 = arith.constant 1 : index
    %c1_54 = arith.constant 1 : index
    %c0_55 = arith.constant 0 : index
    %57 = vector.load %arg1[%c0_52, %c1_53, %c1_54, %c0_55] : memref<1x40x16x128xbf16, #tpu.memory_space<vmem>>, vector<1x8x8x128xbf16>
    %58 = vector.shape_cast %57 : vector<1x8x8x128xbf16> to vector<8x8x128xbf16>
    %59 = vector.shape_cast %58 : vector<8x8x128xbf16> to vector<64x128xbf16>
    %c8 = arith.constant 8 : index
    %c0_56 = arith.constant 0 : index
    %c0_57 = arith.constant 0 : index
    %60 = vector.load %arg2[%c8, %c0_56, %c0_57] : memref<9x128x128xbf16, #tpu.memory_space<vmem>>, vector<1x128x128xbf16>
    %61 = vector.shape_cast %60 : vector<1x128x128xbf16> to vector<128x128xbf16>
    %cst_58 = arith.constant dense<0.000000e+00> : vector<64x128xf32>
    %62 = tpu.matmul %59, %61, %cst_58 {dimension_numbers = #tpu.dot_dimension_numbers<[1], [0], [0], [1], [0, 0, 1, 1], [], []>} : vector<64x128xbf16>, vector<128x128xbf16>, vector<64x128xf32> -> vector<64x128xf32>
    %63 = arith.addf %56, %62 : vector<64x128xf32>
    %c0_59 = arith.constant 0 : index
    %c0_60 = arith.constant 0 : index
    %64 = vector.load %arg3[%c0_59, %c0_60] : memref<1x128xf32, #tpu.memory_space<vmem>>, vector<1x128xf32>
    %65 = vector.broadcast %64 : vector<1x128xf32> to vector<64x128xf32>
    %66 = arith.addf %63, %65 : vector<64x128xf32>
    %cst_61 = arith.constant 0.000000e+00 : f32
    %67 = vector.broadcast %cst_61 : f32 to vector<64x128xf32>
    %68 = arith.maximumf %66, %67 : vector<64x128xf32>
    %69 = vector.shape_cast %68 : vector<64x128xf32> to vector<8x8x128xf32>
    %cst_62 = arith.constant 0.000000e+00 : bf16
    %70 = vector.broadcast %cst_62 : bf16 to vector<1x10x16x128xbf16>
    %c0_63 = arith.constant 0 : index
    %c0_64 = arith.constant 0 : index
    %c0_65 = arith.constant 0 : index
    %c0_66 = arith.constant 0 : index
    %71 = vector.load %arg6[%c0_63, %c0_64, %c0_65, %c0_66] : memref<1x10x16x128xbf16, #tpu.memory_space<vmem>>, vector<1x10x16x128xbf16>
    tpu.vector_store %arg6[%c0_63, %c0_64, %c0_65, %c0_66], %70 {strides = array<i32>} : memref<1x10x16x128xbf16, #tpu.memory_space<vmem>>, vector<1x10x16x128xbf16>,
    %72 = arith.truncf %69 : vector<8x8x128xf32> to vector<8x8x128xbf16>
    %c0_67 = arith.constant 0 : index
    %c1_68 = arith.constant 1 : index
    %c1_69 = arith.constant 1 : index
    %c0_70 = arith.constant 0 : index
    %73 = vector.load %arg6[%c0_67, %c1_68, %c1_69, %c0_70] : memref<1x10x16x128xbf16, #tpu.memory_space<vmem>>, vector<1x8x8x128xbf16>
    %74 = vector.shape_cast %73 : vector<1x8x8x128xbf16> to vector<8x8x128xbf16>
    %75 = vector.shape_cast %72 : vector<8x8x128xbf16> to vector<1x8x8x128xbf16>
    tpu.vector_store %arg6[%c0_67, %c1_68, %c1_69, %c0_70], %75 {strides = array<i32>} : memref<1x10x16x128xbf16, #tpu.memory_space<vmem>>, vector<1x8x8x128xbf16>,
    %c0_71 = arith.constant 0 : index
    %c30_72 = arith.constant 30 : index
    %c0_73 = arith.constant 0 : index
    %c0_74 = arith.constant 0 : index
    %76 = vector.load %arg1[%c0_71, %c30_72, %c0_73, %c0_74] : memref<1x40x16x128xbf16, #tpu.memory_space<vmem>>, vector<1x8x8x128xbf16>
    %77 = vector.shape_cast %76 : vector<1x8x8x128xbf16> to vector<8x8x128xbf16>
    %78 = vector.shape_cast %77 : vector<8x8x128xbf16> to vector<64x128xbf16>
    %c0_75 = arith.constant 0 : index
    %c0_76 = arith.constant 0 : index
    %79 = vector.load %arg4[%c0_75, %c0_76] : memref<128x128xbf16, #tpu.memory_space<vmem>>, vector<128x128xbf16>
    %cst_77 = arith.constant dense<0.000000e+00> : vector<64x128xf32>
    %80 = tpu.matmul %78, %79, %cst_77 {dimension_numbers = #tpu.dot_dimension_numbers<[1], [0], [0], [1], [0, 0, 1, 1], [], []>} : vector<64x128xbf16>, vector<128x128xbf16>, vector<64x128xf32> -> vector<64x128xf32>
    %c0_78 = arith.constant 0 : index
    %c0_79 = arith.constant 0 : index
    %81 = vector.load %arg5[%c0_78, %c0_79] : memref<1x128xf32, #tpu.memory_space<vmem>>, vector<1x128xf32>
    %82 = vector.broadcast %81 : vector<1x128xf32> to vector<64x128xf32>
    %83 = arith.addf %80, %82 : vector<64x128xf32>
    %84 = vector.shape_cast %83 : vector<64x128xf32> to vector<1x8x8x128xf32>
    %85 = arith.truncf %84 : vector<1x8x8x128xf32> to vector<1x8x8x128xbf16>
    %c0_80 = arith.constant 0 : index
    %c0_81 = arith.constant 0 : index
    %c0_82 = arith.constant 0 : index
    %c0_83 = arith.constant 0 : index
    %86 = vector.load %arg7[%c0_80, %c0_81, %c0_82, %c0_83] : memref<1x8x8x128xbf16, #tpu.memory_space<vmem>>, vector<1x8x8x128xbf16>
    tpu.vector_store %arg7[%c0_80, %c0_81, %c0_82, %c0_83], %85 {strides = array<i32>} : memref<1x8x8x128xbf16, #tpu.memory_space<vmem>>, vector<1x8x8x128xbf16>,
    return
  }
  func.func @transform_0(%arg0: i32) -> (i32, i32, i32, i32) {
    %c0_i32 = arith.constant 0 : i32
    %c0_i32_0 = arith.constant 0 : i32
    %c0_i32_1 = arith.constant 0 : i32
    %c0_i32_2 = arith.constant 0 : i32
    return %arg0, %c0_i32, %c0_i32_0, %c0_i32_1 : i32, i32, i32, i32
  }
  func.func @transform_1(%arg0: i32) -> (i32, i32, i32) {
    %c0_i32 = arith.constant 0 : i32
    %c0_i32_0 = arith.constant 0 : i32
    %c0_i32_1 = arith.constant 0 : i32
    %c0_i32_2 = arith.constant 0 : i32
    return %c0_i32, %c0_i32_0, %c0_i32_1 : i32, i32, i32
  }
  func.func @transform_2(%arg0: i32) -> (i32, i32) {
    %c0_i32 = arith.constant 0 : i32
    %c0_i32_0 = arith.constant 0 : i32
    %c0_i32_1 = arith.constant 0 : i32
    return %c0_i32, %c0_i32_0 : i32, i32
  }
  func.func @transform_3(%arg0: i32) -> (i32, i32) {
    %c0_i32 = arith.constant 0 : i32
    %c0_i32_0 = arith.constant 0 : i32
    %c0_i32_1 = arith.constant 0 : i32
    return %c0_i32, %c0_i32_0 : i32, i32
  }
  func.func @transform_4(%arg0: i32) -> (i32, i32) {
    %c0_i32 = arith.constant 0 : i32
    %c0_i32_0 = arith.constant 0 : i32
    %c0_i32_1 = arith.constant 0 : i32
    return %c0_i32, %c0_i32_0 : i32, i32
  }
  func.func @transform_5(%arg0: i32) -> (i32, i32, i32, i32) {
    %c0_i32 = arith.constant 0 : i32
    %c0_i32_0 = arith.constant 0 : i32
    %c0_i32_1 = arith.constant 0 : i32
    %c0_i32_2 = arith.constant 0 : i32
    return %arg0, %c0_i32, %c0_i32_0, %c0_i32_1 : i32, i32, i32, i32
  }
  func.func @transform_6(%arg0: i32) -> (i32, i32, i32, i32) {
    %c0_i32 = arith.constant 0 : i32
    %c0_i32_0 = arith.constant 0 : i32
    %c0_i32_1 = arith.constant 0 : i32
    %c0_i32_2 = arith.constant 0 : i32
    return %arg0, %c0_i32, %c0_i32_0, %c0_i32_1 : i32, i32, i32, i32
  }
}

module attributes {stable_mosaic.version = 11 : i64} {
  func.func @_conv2_kernel(%arg0: i32, %arg1: memref<1x10x16x128xbf16, #tpu.memory_space<vmem>>, %arg2: memref<9x128x128xbf16, #tpu.memory_space<vmem>>, %arg3: memref<1x128xf32, #tpu.memory_space<vmem>>, %arg4: memref<1x8x8x128xbf16, #tpu.memory_space<vmem>>, %arg5: memref<1x8x8x128xf32, #tpu.memory_space<vmem>>) attributes {dimension_semantics = [#tpu.dimension_semantics<parallel>], iteration_bounds = array<i64: 2>, scalar_prefetch = 0 : i64, scratch_operands = 0 : i64, tpu.core_type = #tpu.core_type<tc>, window_params = [{transform_indices = @transform_0, window_bounds = array<i64: 1, 10, 16, 128>}, {pipeline_mode = #tpu.pipeline_mode<synchronous>, transform_indices = @transform_1, window_bounds = array<i64: 9, 128, 128>}, {pipeline_mode = #tpu.pipeline_mode<synchronous>, transform_indices = @transform_2, window_bounds = array<i64: 1, 128>}, {transform_indices = @transform_3, window_bounds = array<i64: 1, 8, 8, 128>}, {transform_indices = @transform_4, window_bounds = array<i64: 1, 8, 8, 128>}]} {
    %cst = arith.constant 0.000000e+00 : f32
    %0 = vector.broadcast %cst : f32 to vector<64x128xf32>
    %c0 = arith.constant 0 : index
    %c0_0 = arith.constant 0 : index
    %c0_1 = arith.constant 0 : index
    %c0_2 = arith.constant 0 : index
    %1 = vector.load %arg1[%c0, %c0_0, %c0_1, %c0_2] : memref<1x10x16x128xbf16, #tpu.memory_space<vmem>>, vector<1x8x8x128xbf16>
    %2 = vector.shape_cast %1 : vector<1x8x8x128xbf16> to vector<8x8x128xbf16>
    %3 = vector.shape_cast %2 : vector<8x8x128xbf16> to vector<64x128xbf16>
    %c0_3 = arith.constant 0 : index
    %c0_4 = arith.constant 0 : index
    %c0_5 = arith.constant 0 : index
    %4 = vector.load %arg2[%c0_3, %c0_4, %c0_5] : memref<9x128x128xbf16, #tpu.memory_space<vmem>>, vector<1x128x128xbf16>
    %5 = vector.shape_cast %4 : vector<1x128x128xbf16> to vector<128x128xbf16>
    %cst_6 = arith.constant dense<0.000000e+00> : vector<64x128xf32>
    %6 = tpu.matmul %3, %5, %cst_6 {dimension_numbers = #tpu.dot_dimension_numbers<[1], [0], [0], [1], [0, 0, 1, 1], [], []>} : vector<64x128xbf16>, vector<128x128xbf16>, vector<64x128xf32> -> vector<64x128xf32>
    %7 = arith.addf %0, %6 : vector<64x128xf32>
    %c0_7 = arith.constant 0 : index
    %c0_8 = arith.constant 0 : index
    %c1 = arith.constant 1 : index
    %c0_9 = arith.constant 0 : index
    %8 = vector.load %arg1[%c0_7, %c0_8, %c1, %c0_9] : memref<1x10x16x128xbf16, #tpu.memory_space<vmem>>, vector<1x8x8x128xbf16>
    %9 = vector.shape_cast %8 : vector<1x8x8x128xbf16> to vector<8x8x128xbf16>
    %10 = vector.shape_cast %9 : vector<8x8x128xbf16> to vector<64x128xbf16>
    %c1_10 = arith.constant 1 : index
    %c0_11 = arith.constant 0 : index
    %c0_12 = arith.constant 0 : index
    %11 = vector.load %arg2[%c1_10, %c0_11, %c0_12] : memref<9x128x128xbf16, #tpu.memory_space<vmem>>, vector<1x128x128xbf16>
    %12 = vector.shape_cast %11 : vector<1x128x128xbf16> to vector<128x128xbf16>
    %cst_13 = arith.constant dense<0.000000e+00> : vector<64x128xf32>
    %13 = tpu.matmul %10, %12, %cst_13 {dimension_numbers = #tpu.dot_dimension_numbers<[1], [0], [0], [1], [0, 0, 1, 1], [], []>} : vector<64x128xbf16>, vector<128x128xbf16>, vector<64x128xf32> -> vector<64x128xf32>
    %14 = arith.addf %7, %13 : vector<64x128xf32>
    %c0_14 = arith.constant 0 : index
    %c0_15 = arith.constant 0 : index
    %c2 = arith.constant 2 : index
    %c0_16 = arith.constant 0 : index
    %15 = vector.load %arg1[%c0_14, %c0_15, %c2, %c0_16] : memref<1x10x16x128xbf16, #tpu.memory_space<vmem>>, vector<1x8x8x128xbf16>
    %16 = vector.shape_cast %15 : vector<1x8x8x128xbf16> to vector<8x8x128xbf16>
    %17 = vector.shape_cast %16 : vector<8x8x128xbf16> to vector<64x128xbf16>
    %c2_17 = arith.constant 2 : index
    %c0_18 = arith.constant 0 : index
    %c0_19 = arith.constant 0 : index
    %18 = vector.load %arg2[%c2_17, %c0_18, %c0_19] : memref<9x128x128xbf16, #tpu.memory_space<vmem>>, vector<1x128x128xbf16>
    %19 = vector.shape_cast %18 : vector<1x128x128xbf16> to vector<128x128xbf16>
    %cst_20 = arith.constant dense<0.000000e+00> : vector<64x128xf32>
    %20 = tpu.matmul %17, %19, %cst_20 {dimension_numbers = #tpu.dot_dimension_numbers<[1], [0], [0], [1], [0, 0, 1, 1], [], []>} : vector<64x128xbf16>, vector<128x128xbf16>, vector<64x128xf32> -> vector<64x128xf32>
    %21 = arith.addf %14, %20 : vector<64x128xf32>
    %c0_21 = arith.constant 0 : index
    %c1_22 = arith.constant 1 : index
    %c0_23 = arith.constant 0 : index
    %c0_24 = arith.constant 0 : index
    %22 = vector.load %arg1[%c0_21, %c1_22, %c0_23, %c0_24] : memref<1x10x16x128xbf16, #tpu.memory_space<vmem>>, vector<1x8x8x128xbf16>
    %23 = vector.shape_cast %22 : vector<1x8x8x128xbf16> to vector<8x8x128xbf16>
    %24 = vector.shape_cast %23 : vector<8x8x128xbf16> to vector<64x128xbf16>
    %c3 = arith.constant 3 : index
    %c0_25 = arith.constant 0 : index
    %c0_26 = arith.constant 0 : index
    %25 = vector.load %arg2[%c3, %c0_25, %c0_26] : memref<9x128x128xbf16, #tpu.memory_space<vmem>>, vector<1x128x128xbf16>
    %26 = vector.shape_cast %25 : vector<1x128x128xbf16> to vector<128x128xbf16>
    %cst_27 = arith.constant dense<0.000000e+00> : vector<64x128xf32>
    %27 = tpu.matmul %24, %26, %cst_27 {dimension_numbers = #tpu.dot_dimension_numbers<[1], [0], [0], [1], [0, 0, 1, 1], [], []>} : vector<64x128xbf16>, vector<128x128xbf16>, vector<64x128xf32> -> vector<64x128xf32>
    %28 = arith.addf %21, %27 : vector<64x128xf32>
    %c0_28 = arith.constant 0 : index
    %c1_29 = arith.constant 1 : index
    %c1_30 = arith.constant 1 : index
    %c0_31 = arith.constant 0 : index
    %29 = vector.load %arg1[%c0_28, %c1_29, %c1_30, %c0_31] : memref<1x10x16x128xbf16, #tpu.memory_space<vmem>>, vector<1x8x8x128xbf16>
    %30 = vector.shape_cast %29 : vector<1x8x8x128xbf16> to vector<8x8x128xbf16>
    %31 = vector.shape_cast %30 : vector<8x8x128xbf16> to vector<64x128xbf16>
    %c4 = arith.constant 4 : index
    %c0_32 = arith.constant 0 : index
    %c0_33 = arith.constant 0 : index
    %32 = vector.load %arg2[%c4, %c0_32, %c0_33] : memref<9x128x128xbf16, #tpu.memory_space<vmem>>, vector<1x128x128xbf16>
    %33 = vector.shape_cast %32 : vector<1x128x128xbf16> to vector<128x128xbf16>
    %cst_34 = arith.constant dense<0.000000e+00> : vector<64x128xf32>
    %34 = tpu.matmul %31, %33, %cst_34 {dimension_numbers = #tpu.dot_dimension_numbers<[1], [0], [0], [1], [0, 0, 1, 1], [], []>} : vector<64x128xbf16>, vector<128x128xbf16>, vector<64x128xf32> -> vector<64x128xf32>
    %35 = arith.addf %28, %34 : vector<64x128xf32>
    %c0_35 = arith.constant 0 : index
    %c1_36 = arith.constant 1 : index
    %c2_37 = arith.constant 2 : index
    %c0_38 = arith.constant 0 : index
    %36 = vector.load %arg1[%c0_35, %c1_36, %c2_37, %c0_38] : memref<1x10x16x128xbf16, #tpu.memory_space<vmem>>, vector<1x8x8x128xbf16>
    %37 = vector.shape_cast %36 : vector<1x8x8x128xbf16> to vector<8x8x128xbf16>
    %38 = vector.shape_cast %37 : vector<8x8x128xbf16> to vector<64x128xbf16>
    %c5 = arith.constant 5 : index
    %c0_39 = arith.constant 0 : index
    %c0_40 = arith.constant 0 : index
    %39 = vector.load %arg2[%c5, %c0_39, %c0_40] : memref<9x128x128xbf16, #tpu.memory_space<vmem>>, vector<1x128x128xbf16>
    %40 = vector.shape_cast %39 : vector<1x128x128xbf16> to vector<128x128xbf16>
    %cst_41 = arith.constant dense<0.000000e+00> : vector<64x128xf32>
    %41 = tpu.matmul %38, %40, %cst_41 {dimension_numbers = #tpu.dot_dimension_numbers<[1], [0], [0], [1], [0, 0, 1, 1], [], []>} : vector<64x128xbf16>, vector<128x128xbf16>, vector<64x128xf32> -> vector<64x128xf32>
    %42 = arith.addf %35, %41 : vector<64x128xf32>
    %c0_42 = arith.constant 0 : index
    %c2_43 = arith.constant 2 : index
    %c0_44 = arith.constant 0 : index
    %c0_45 = arith.constant 0 : index
    %43 = vector.load %arg1[%c0_42, %c2_43, %c0_44, %c0_45] : memref<1x10x16x128xbf16, #tpu.memory_space<vmem>>, vector<1x8x8x128xbf16>
    %44 = vector.shape_cast %43 : vector<1x8x8x128xbf16> to vector<8x8x128xbf16>
    %45 = vector.shape_cast %44 : vector<8x8x128xbf16> to vector<64x128xbf16>
    %c6 = arith.constant 6 : index
    %c0_46 = arith.constant 0 : index
    %c0_47 = arith.constant 0 : index
    %46 = vector.load %arg2[%c6, %c0_46, %c0_47] : memref<9x128x128xbf16, #tpu.memory_space<vmem>>, vector<1x128x128xbf16>
    %47 = vector.shape_cast %46 : vector<1x128x128xbf16> to vector<128x128xbf16>
    %cst_48 = arith.constant dense<0.000000e+00> : vector<64x128xf32>
    %48 = tpu.matmul %45, %47, %cst_48 {dimension_numbers = #tpu.dot_dimension_numbers<[1], [0], [0], [1], [0, 0, 1, 1], [], []>} : vector<64x128xbf16>, vector<128x128xbf16>, vector<64x128xf32> -> vector<64x128xf32>
    %49 = arith.addf %42, %48 : vector<64x128xf32>
    %c0_49 = arith.constant 0 : index
    %c2_50 = arith.constant 2 : index
    %c1_51 = arith.constant 1 : index
    %c0_52 = arith.constant 0 : index
    %50 = vector.load %arg1[%c0_49, %c2_50, %c1_51, %c0_52] : memref<1x10x16x128xbf16, #tpu.memory_space<vmem>>, vector<1x8x8x128xbf16>
    %51 = vector.shape_cast %50 : vector<1x8x8x128xbf16> to vector<8x8x128xbf16>
    %52 = vector.shape_cast %51 : vector<8x8x128xbf16> to vector<64x128xbf16>
    %c7 = arith.constant 7 : index
    %c0_53 = arith.constant 0 : index
    %c0_54 = arith.constant 0 : index
    %53 = vector.load %arg2[%c7, %c0_53, %c0_54] : memref<9x128x128xbf16, #tpu.memory_space<vmem>>, vector<1x128x128xbf16>
    %54 = vector.shape_cast %53 : vector<1x128x128xbf16> to vector<128x128xbf16>
    %cst_55 = arith.constant dense<0.000000e+00> : vector<64x128xf32>
    %55 = tpu.matmul %52, %54, %cst_55 {dimension_numbers = #tpu.dot_dimension_numbers<[1], [0], [0], [1], [0, 0, 1, 1], [], []>} : vector<64x128xbf16>, vector<128x128xbf16>, vector<64x128xf32> -> vector<64x128xf32>
    %56 = arith.addf %49, %55 : vector<64x128xf32>
    %c0_56 = arith.constant 0 : index
    %c2_57 = arith.constant 2 : index
    %c2_58 = arith.constant 2 : index
    %c0_59 = arith.constant 0 : index
    %57 = vector.load %arg1[%c0_56, %c2_57, %c2_58, %c0_59] : memref<1x10x16x128xbf16, #tpu.memory_space<vmem>>, vector<1x8x8x128xbf16>
    %58 = vector.shape_cast %57 : vector<1x8x8x128xbf16> to vector<8x8x128xbf16>
    %59 = vector.shape_cast %58 : vector<8x8x128xbf16> to vector<64x128xbf16>
    %c8 = arith.constant 8 : index
    %c0_60 = arith.constant 0 : index
    %c0_61 = arith.constant 0 : index
    %60 = vector.load %arg2[%c8, %c0_60, %c0_61] : memref<9x128x128xbf16, #tpu.memory_space<vmem>>, vector<1x128x128xbf16>
    %61 = vector.shape_cast %60 : vector<1x128x128xbf16> to vector<128x128xbf16>
    %cst_62 = arith.constant dense<0.000000e+00> : vector<64x128xf32>
    %62 = tpu.matmul %59, %61, %cst_62 {dimension_numbers = #tpu.dot_dimension_numbers<[1], [0], [0], [1], [0, 0, 1, 1], [], []>} : vector<64x128xbf16>, vector<128x128xbf16>, vector<64x128xf32> -> vector<64x128xf32>
    %63 = arith.addf %56, %62 : vector<64x128xf32>
    %c0_63 = arith.constant 0 : index
    %c0_64 = arith.constant 0 : index
    %c0_65 = arith.constant 0 : index
    %c0_66 = arith.constant 0 : index
    %64 = vector.load %arg4[%c0_63, %c0_64, %c0_65, %c0_66] : memref<1x8x8x128xbf16, #tpu.memory_space<vmem>>, vector<1x8x8x128xbf16>
    %65 = vector.shape_cast %64 : vector<1x8x8x128xbf16> to vector<8x8x128xbf16>
    %66 = arith.extf %65 : vector<8x8x128xbf16> to vector<8x8x128xf32>
    %67 = vector.shape_cast %63 : vector<64x128xf32> to vector<8x8x128xf32>
    %c0_67 = arith.constant 0 : index
    %c0_68 = arith.constant 0 : index
    %68 = vector.load %arg3[%c0_67, %c0_68] : memref<1x128xf32, #tpu.memory_space<vmem>>, vector<1x128xf32>
    %69 = vector.shape_cast %68 : vector<1x128xf32> to vector<1x1x128xf32>
    %70 = vector.broadcast %69 : vector<1x1x128xf32> to vector<8x8x128xf32>
    %71 = arith.addf %67, %70 : vector<8x8x128xf32>
    %72 = arith.addf %71, %66 : vector<8x8x128xf32>
    %cst_69 = arith.constant 0.000000e+00 : f32
    %73 = vector.broadcast %cst_69 : f32 to vector<8x8x128xf32>
    %74 = arith.maximumf %72, %73 : vector<8x8x128xf32>
    %75 = vector.shape_cast %74 : vector<8x8x128xf32> to vector<1x8x8x128xf32>
    %c0_70 = arith.constant 0 : index
    %c0_71 = arith.constant 0 : index
    %c0_72 = arith.constant 0 : index
    %c0_73 = arith.constant 0 : index
    %76 = vector.load %arg5[%c0_70, %c0_71, %c0_72, %c0_73] : memref<1x8x8x128xf32, #tpu.memory_space<vmem>>, vector<1x8x8x128xf32>
    tpu.vector_store %arg5[%c0_70, %c0_71, %c0_72, %c0_73], %75 {strides = array<i32>} : memref<1x8x8x128xf32, #tpu.memory_space<vmem>>, vector<1x8x8x128xf32>,
    return
  }
  func.func @transform_0(%arg0: i32) -> (i32, i32, i32, i32) {
    %c0_i32 = arith.constant 0 : i32
    %c0_i32_0 = arith.constant 0 : i32
    %c0_i32_1 = arith.constant 0 : i32
    %c0_i32_2 = arith.constant 0 : i32
    return %arg0, %c0_i32, %c0_i32_0, %c0_i32_1 : i32, i32, i32, i32
  }
  func.func @transform_1(%arg0: i32) -> (i32, i32, i32) {
    %c0_i32 = arith.constant 0 : i32
    %c0_i32_0 = arith.constant 0 : i32
    %c0_i32_1 = arith.constant 0 : i32
    %c0_i32_2 = arith.constant 0 : i32
    return %c0_i32, %c0_i32_0, %c0_i32_1 : i32, i32, i32
  }
  func.func @transform_2(%arg0: i32) -> (i32, i32) {
    %c0_i32 = arith.constant 0 : i32
    %c0_i32_0 = arith.constant 0 : i32
    %c0_i32_1 = arith.constant 0 : i32
    return %c0_i32, %c0_i32_0 : i32, i32
  }
  func.func @transform_3(%arg0: i32) -> (i32, i32, i32, i32) {
    %c0_i32 = arith.constant 0 : i32
    %c0_i32_0 = arith.constant 0 : i32
    %c0_i32_1 = arith.constant 0 : i32
    %c0_i32_2 = arith.constant 0 : i32
    return %arg0, %c0_i32, %c0_i32_0, %c0_i32_1 : i32, i32, i32, i32
  }
  func.func @transform_4(%arg0: i32) -> (i32, i32, i32, i32) {
    %c0_i32 = arith.constant 0 : i32
    %c0_i32_0 = arith.constant 0 : i32
    %c0_i32_1 = arith.constant 0 : i32
    %c0_i32_2 = arith.constant 0 : i32
    return %arg0, %c0_i32, %c0_i32_0, %c0_i32_1 : i32, i32, i32, i32
  }
}

</mosaic_0001>

<bundles_post_ra>
// kernel: residual_block.3
= control target key start
LH: loop header
LB: loop body
LE: loop exit
PB: predicated region body
PF: predicated region fallthrough
CT: control target
= control target key end

     0   :  { %s3198_s15 = smov 0   ;;  %s3784_s0 = inlined_call_operand.vmem [shape: bf16[2,10,16,128], index: 0, kind: input, shape index: {}]   ;;  %s3785_s1 = inlined_call_operand.vmem [shape: bf16[9,128,128], index: 1, kind: input, shape index: {}]   ;;  %s3786_s2 = inlined_call_operand.vmem [shape: f32[1,128], index: 2, kind: input, shape index: {}]   ;;  %s3787_s3 = inlined_call_operand.vmem [shape: bf16[2,8,8,128], index: 3, kind: input, shape index: {}]   ;;  %s3788_s4 = inlined_call_operand.vmem [shape: f32[2,8,8,128], index: 4, kind: output, shape index: {}]  }
   0x1 LB: > { %s2310_s16 = sadd.s32 4294967295, %s3171_s15   ;;  %p2314_p0 = scmp.ge.s32.totalorder %s3171_s15, 1  ;;  %s3171_s15 = sphi %s3198_s15, %s14_s15  }
   0x2   : > { %p172_p1 = scmp.lt.s32.totalorder %s3171_s15, 3 }
   0x4   : > { %p173_p2 = pnand %p2314_p0, %p172_p1 }
   0x5   : > { %v3081_v0 = vld [vmem:[%s3785_s1 + $0x40] sm:$0xff] (!%p173_p2)   ;;  %p203_p3 = scmp.lt.s32.totalorder (!%p173_p2), %s2310_s16, 1  ;;  %v3083_v2 = vld [vmem:[%s3785_s1 + $0x48] sm:$0xff] (!%p173_p2)   ;;  %v3085_v4 = vld [vmem:[%s3785_s1 + $0x50] sm:$0xff] (!%p173_p2)   ;;  %vm251_vm0 = vsmask.f32 (!%p173_p2), 3328 }
   0x6   : > { %176 = sbr.rel (%p173_p2) target bundleno = 396 (0x18c), region = 36  ;;  %v3082_v1 = vld [vmem:[%s3785_s1 + $0x100] sm:$0xff] (!%p173_p2)   ;;  %2776 = vmatprep.subr.bf16.mxu1 (!%p173_p2), %v3081_v0  ;;  %v3084_v3 = vld [vmem:[%s3785_s1 + $0x108] sm:$0xff] (!%p173_p2)   ;;  %v3086_v5 = vld [vmem:[%s3785_s1 + $0x110] sm:$0xff] (!%p173_p2)   ;;  %vm252_vm1 = vsmask.f32 (!%p173_p2), 7440 }
   0x7   : > { %2872 = vmatprep.subr.bf16.mxu0 (!%p173_p2), %v3082_v1  ;;  %2777 = vmatpush3.bf16.msra.mxu1 (!%p173_p2), %v3081_v0  ;;  %v3087_v6 = vld [vmem:[%s3785_s1 + $0x58] sm:$0xff] (!%p173_p2)   ;;  %v3089_v8 = vld [vmem:[%s3785_s1 + $0x60] sm:$0xff] (!%p173_p2)   ;;  %v3091_v10 = vld [vmem:[%s3785_s1 + $0x68] sm:$0xff] (!%p173_p2)   ;;  %vm673_vm3 = vcmask (!%p173_p2), 1042432   ;;  %vm674_vm4 = vcmask (!%p173_p2), 1046532  }
   0x8   : > { %2873 = vmatpush3.bf16.msra.mxu0 (!%p173_p2), %v3082_v1  ;;  %2778 = vmatprep.subr.bf16.mxu1 (!%p173_p2), %v3083_v2  ;;  %v3088_v7 = vld [vmem:[%s3785_s1 + $0x118] sm:$0xff] (!%p173_p2)   ;;  %v3090_v9 = vld [vmem:[%s3785_s1 + $0x120] sm:$0xff] (!%p173_p2)   ;;  %v3092_v14 = vld [vmem:[%s3785_s1 + $0x128] sm:$0xff] (!%p173_p2)  }
   0x9   : > { %2874 = vmatprep.subr.bf16.mxu0 (!%p173_p2), %v3084_v3  ;;  %v3093_v22 = vld [vmem:[%s3785_s1 + $0x70] sm:$0xff] (!%p173_p2)   ;;  %v3095_v37 = vld [vmem:[%s3785_s1 + $0x78] sm:$0xff] (!%p173_p2)   ;;  %vm3287_vm2 = vmor (!%p173_p2), %vm251_vm0, %vm252_vm1 }
   0xa   : > { %v3094_v23 = vld [vmem:[%s3785_s1 + $0x130] sm:$0xff] (!%p173_p2)   ;;  %v3096_v47 = vld [vmem:[%s3785_s1 + $0x138] sm:$0xff] (!%p173_p2)   ;;  %v3097_v63 = vld [vmem:[%s3785_s1] sm:$0xff] (!%p173_p2)  }
   0xb   : > { %2779 = vmatpush3.bf16.msra.mxu1 (!%p173_p2), %v3083_v2  ;;  %v3319_v1 = vld [vmem:[%s3785_s1 + $0x140] sm:$0xff] (!%p173_p2)   ;;  %vm3461_vm5 = vmor (!%p173_p2), %vm673_vm3, %vm674_vm4 }
   0xc   : > { %2875 = vmatpush3.bf16.msra.mxu0 (!%p173_p2), %v3084_v3  ;;  %2780 = vmatprep.subr.bf16.mxu1 (!%p173_p2), %v3085_v4  ;;  %v3161_v38 = vld [vmem:[%s3785_s1 + $0x220] sm:$0xff] (!%p173_p2)  }
   0xd   : > { %s3794_s16 = smov (!%p203_p3, %s2310_s16), 1  ;;  %2876 = vmatprep.subr.bf16.mxu0 %v3086_v5 }
   0xe   : > { %s3072_s7 = smul.u32 80, %s3794_s16  ;;  %s2648_s5 = sshll.u32 %s3794_s16, 6 }
   0xf   : > { %2781 = vmatpush3.bf16.msra.mxu1 %v3085_v4  ;;  %s3771_s8 = scalar_lea.vmem %s3788_s4, %s2648_s5 }
  0x10   : > { %2877 = vmatpush3.bf16.msra.mxu0 %v3086_v5  ;;  %2782 = vmatprep.subr.bf16.mxu1 %v3087_v6  ;;  %s3242_s14 = scalar_lea.vmem %s3784_s0, %s3072_s7 }
  0x11   : > { %2878 = vmatprep.subr.bf16.mxu0 %v3088_v7  ;;  %v3248_v11 = vld [vmem:[%s3242_s14] sm:$0xf]  ;;  %v3251_v12 = vld [vmem:[%s3242_s14 + $0x8] sm:$0xf]  ;;  %v3254_v13 = vld [vmem:[%s3242_s14 + $0x4] sm:$0x1] }
  0x12   : > { %v3260_v15 = vld [vmem:[%s3242_s14 + $0xc] sm:$0x1]  ;;  %v255_v16 = vshrl.u32 %v3248_v11, 16  ;;  %v258_v17 = vshll.u32 %v3248_v11, 16  ;;  %v264_v18 = vshll.u32 %v3254_v13, 16  ;;  %v269_v19 = vshrl.u32 %v3251_v12, 16 }
  0x13   : > { %2783 = vmatpush3.bf16.msra.mxu1 %v3087_v6  ;;  %v272_v20 = vshll.u32 %v3251_v12, 16  ;;  %v278_v21 = vshll.u32 %v3260_v15, 16  ;;  %v2432_v30 = vld [vmem:[%s3242_s14 + $0x8] sm:$0xf]  ;;  %v3276_v31 = vld [vmem:[%s3242_s14 + $0xc] sm:$0x1] }
  0x14   : > { %2879 = vmatpush3.bf16.msra.mxu0 %v3088_v7  ;;  %2784 = vmatprep.subr.bf16.mxu1 %v3089_v8  ;;  %v257_v24 = vrot.slane %v255_v16, 4  ;;  %v260_v25 = vrot.slane %v258_v17, 5  ;;  %v266_v26 = vrot.slane %v264_v18, 5  ;;  %v271_v27 = vrot.slane %v269_v19, 4  ;;  %v2434_v33 = vld [vmem:[%s3242_s14 + $0x10] sm:$0xf] }
  0x15   : > { %2880 = vmatprep.subr.bf16.mxu0 %v3090_v9  ;;  %v274_v28 = vrot.slane %v272_v20, 5  ;;  %v280_v29 = vrot.slane %v278_v21, 5  ;;  %v3280_v34 = vld [vmem:[%s3242_s14 + $0x14] sm:$0x1]  ;;  %v1050_v35 = vshrl.u32 %v2432_v30, 16  ;;  %v1053_v36 = vshll.u32 %v2432_v30, 16 }
  0x16   : > { %v261_v32 = vor.u32 %v260_v25, %v257_v24  ;;  %v1059_v40 = vshll.u32 %v3276_v31, 16  ;;  %v1064_v41 = vshrl.u32 %v2434_v33, 16  ;;  %v1067_v42 = vshll.u32 %v2434_v33, 16  ;;  %v3297_v51 = vld [vmem:[%s3242_s14 + $0x10] sm:$0xf] }
  0x17   : > { %2785 = vmatpush3.bf16.msra.mxu1 %v3089_v8  ;;  %v275_v39 = vor.u32 %v274_v28, %v271_v27  ;;  %v1052_v44 = vrot.slane %v1050_v35, 4  ;;  %v1055_v45 = vrot.slane %v1053_v36, 5  ;;  %v1073_v46 = vshll.u32 %v3280_v34, 16  ;;  %v3302_v55 = vld [vmem:[%s3242_s14 + $0x18] sm:$0xf] }
  0x18   : > { %2881 = vmatpush3.bf16.msra.mxu0 %v3090_v9  ;;  %2786 = vmatprep.subr.bf16.mxu1 %v3091_v10  ;;  %v262_v43 = vrot.slane %v261_v32, 4  ;;  %v1066_v49 = vrot.slane %v1064_v41, 4  ;;  %v1069_v50 = vrot.slane %v1067_v42, 5  ;;  %v1061_v54 = vrot.slane %v1059_v40, 5  ;;  %v3305_v56 = vld [vmem:[%s3242_s14 + $0x14] sm:$0x1] }
  0x19   : > { %2882 = vmatprep.subr.bf16.mxu0 %v3092_v14  ;;  %v276_v48 = vrot.slane %v275_v39, 4  ;;  %v1056_v53 = vor.u32 %v1055_v45, %v1052_v44  ;;  %v1075_v59 = vrot.slane %v1073_v46, 5  ;;  %v3310_v60 = vld [vmem:[%s3242_s14 + $0x1c] sm:$0x1]  ;;  %v283_v61 = vshrl.u32 %v3297_v51, 16 }
  0x1a   : > { %v267_v52 = vsel %vm3287_vm2, %v262_v43, %v266_v26  ;;  %v1070_v58 = vor.u32 %v1069_v50, %v1066_v49  ;;  %v286_v2 = vshll.u32 %v3297_v51, 16  ;;  %v292_v3 = vshll.u32 %v3305_v56, 16  ;;  %v2436_v8 = vld [vmem:[%s3242_s14 + $0x18] sm:$0xf]  ;;  %v3330_v16 = vld [vmem:[%s3242_s14 + $0x1c] sm:$0x1] }
  0x1b   : > { %2787 = vmatpush3.bf16.msra.mxu1 %v3091_v10  ;;  %v281_v57 = vsel %vm3287_vm2, %v276_v48, %v280_v29  ;;  %v1057_v0 = vrot.slane %v1056_v53, 4  ;;  %v285_v5 = vrot.slane %v283_v61, 4  ;;  %v297_v6 = vshrl.u32 %v3302_v55, 16  ;;  %v2438_v17 = vld [vmem:[%s3242_s14 + $0x20] sm:$0xf]  ;;  %v3099_v43 = vld [vmem:[%s3785_s1 + $0x8] sm:$0xff]  }
  0x1c   : > { %2883 = vmatpush3.bf16.msra.mxu0 %v3092_v14  ;;  %2788 = vmatprep.subr.bf16.mxu1 %v3093_v22  ;;  %v2336_v62 = vcombine.low %v267_v52, %v281_v57  ;;  %v1071_v4 = vrot.slane %v1070_v58, 4  ;;  %v300_v7 = vshll.u32 %v3302_v55, 16  ;;  %v288_v10 = vrot.slane %v286_v2, 5  ;;  %v3336_v21 = vld [vmem:[%s3242_s14 + $0x24] sm:$0x1] }
  0x1d   : > { %2884 = vmatprep.subr.bf16.mxu0 %v3094_v23  ;;  %v1062_v9 = vsel %vm3287_vm2, %v1057_v0, %v1061_v54  ;;  %v306_v14 = vshll.u32 %v3310_v60, 16  ;;  %v299_v19 = vrot.slane %v297_v6, 4  ;;  %v294_v24 = vrot.slane %v292_v3, 5  ;;  %v3100_v54 = vld [vmem:[%s3785_s1 + $0x148] sm:$0xff]   ;;  %v3366_v0 = vld [vmem:[%s3242_s14 + $0x24] sm:$0x1] }
  0x1e   : > { %2792 = vmatprep.mubr.bf16.mxu1 %v2336_v62  ;;  %v1076_v18 = vsel %vm3287_vm2, %v1071_v4, %v1075_v59  ;;  %v302_v20 = vrot.slane %v300_v7, 5  ;;  %v1078_v27 = vshrl.u32 %v2436_v8, 16  ;;  %v1081_v28 = vshll.u32 %v2436_v8, 16  ;;  %v3101_v59 = vld [vmem:[%s3785_s1 + $0x10] sm:$0xff]   ;;  %v3360_v62 = vld [vmem:[%s3242_s14 + $0x20] sm:$0xf] }
  0x1f   : > { %2789 = vmatpush3.bf16.msra.mxu1 %v3093_v22  ;;  %v2464_v22 = vcombine.low %v1062_v9, %v1076_v18  ;;  %v308_v25 = vrot.slane %v306_v14, 5  ;;  %v1087_v29 = vshll.u32 %v3330_v16, 16  ;;  %v1092_v32 = vshrl.u32 %v2438_v17, 16  ;;  %v3369_v2 = vld [vmem:[%s3242_s14 + $0x2c] sm:$0x1]  ;;  %v3102_v9 = vld [vmem:[%s3785_s1 + $0x150] sm:$0xff]  }
  0x20   : > { %2885 = vmatpush3.bf16.msra.mxu0 %v3094_v23  ;;  %2790 = vmatprep.subr.bf16.mxu1 %v3095_v37  ;;  %v289_v23 = vor.u32 %v288_v10, %v285_v5  ;;  %v303_v26 = vor.u32 %v302_v20, %v299_v19  ;;  %v1095_v33 = vshll.u32 %v2438_v17, 16  ;;  %v1101_v35 = vshll.u32 %v3336_v21, 16  ;;  %v3103_v10 = vld [vmem:[%s3785_s1 + $0x18] sm:$0xff]  }
  0x21   : > { %2886 = vmatprep.subr.bf16.mxu0 %v3096_v47  ;;  %2888 = vmatprep.mubr.bf16.mxu0 %v2464_v22  ;;  %v1083_v39 = vrot.slane %v1081_v28, 5  ;;  %v1094_v41 = vrot.slane %v1092_v32, 4  ;;  %v1089_v46 = vrot.slane %v1087_v29, 5  ;;  %v1341_v57 = vrot.slane %v3276_v31, 5  ;;  %v3104_v29 = vld [vmem:[%s3785_s1 + $0x158] sm:$0xff]  }
  0x22   : > { %v290_v30 = vrot.slane %v289_v23, 4  ;;  %v304_v36 = vrot.slane %v303_v26, 4  ;;  %v1097_v42 = vrot.slane %v1095_v33, 5  ;;  %v311_v3 = vshrl.u32 %v3360_v62, 16  ;;  %v2440_v23 = vld [vmem:[%s3242_s14 + $0x28] sm:$0xf] }
  0x23   : > { %2791 = vmatpush3.bf16.msra.mxu1 %v3095_v37  ;;  %v1080_v37 = vrot.slane %v1078_v27, 4  ;;  %v314_v4 = vshll.u32 %v3360_v62, 16  ;;  %v320_v5 = vshll.u32 %v3366_v0, 16  ;;  %v334_v8 = vshll.u32 %v3369_v2, 16  ;;  %v3390_v26 = vld [vmem:[%s3242_s14 + $0x34] sm:$0x1] }
  0x24   : > { %2887 = vmatpush3.bf16.msra.mxu0 %v3096_v47  ;;  %2800 = vmatprep.subr.bf16.mxu1 %v3097_v63  ;;  %v295_v40 = vsel %vm3287_vm2, %v290_v30, %v294_v24  ;;  %v309_v44 = vsel %vm3287_vm2, %v304_v36, %v308_v25  ;;  %v1103_v47 = vrot.slane %v1101_v35, 5  ;;  %v1098_v49 = vor.u32 %v1097_v42, %v1094_v41  ;;  %v3386_v24 = vld [vmem:[%s3242_s14 + $0x2c] sm:$0x1]  ;;  %v2442_v25 = vld [vmem:[%s3242_s14 + $0x30] sm:$0xf]  ;;  %v3105_v30 = vld [vmem:[%s3785_s1 + $0x20] sm:$0xff]  }
  0x25   : > { %2896 = vmatprep.subr.bf16.mxu0 %v3319_v1  ;;  %v1084_v45 = vor.u32 %v1083_v39, %v1080_v37  ;;  %v2337_v48 = vcombine.low %v295_v40, %v309_v44  ;;  %v313_v14 = vrot.slane %v311_v3, 4  ;;  %v316_v17 = vrot.slane %v314_v4, 5 }
  0x26   : > { %v1099_v52 = vrot.slane %v1098_v49, 4  ;;  %v322_v18 = vrot.slane %v320_v5, 5  ;;  %v336_v22 = vrot.slane %v334_v8, 5  ;;  %v1106_v27 = vshrl.u32 %v2440_v23, 16  ;;  %v2444_v5 = vld [vmem:[%s3242_s14 + $0x38] sm:$0xf] }
  0x27   : > { %v1085_v50 = vrot.slane %v1084_v45, 4  ;;  %2793 = vmatmul.mubr.bf16.vlgmr.msra.gmra.mrb[0].mxu1 %v2337_v48  ;;  %v1109_v28 = vshll.u32 %v2440_v23, 16  ;;  %v1115_v33 = vshll.u32 %v3386_v24, 16  ;;  %v1120_v35 = vshrl.u32 %v2442_v25, 16 }
  0x28   : > { %2801 = vmatpush3.bf16.msra.mxu1 %v3097_v63  ;;  %v1104_v58 = vsel %vm3287_vm2, %v1099_v52, %v1103_v47  ;;  %v3363_v63 = vld [vmem:[%s3242_s14 + $0x28] sm:$0xf]  ;;  %v1123_v36 = vshll.u32 %v2442_v25, 16  ;;  %v1108_v39 = vrot.slane %v1106_v27, 4  ;;  %v1129_v41 = vshll.u32 %v3390_v26, 16 }
  0x29   : > { %v1090_v53 = vsel %vm3287_vm2, %v1085_v50, %v1089_v46  ;;  %2802 = vmatprep.subr.bf16.mxu1 %v3099_v43  ;;  %v325_v6 = vshrl.u32 %v3363_v63, 16  ;;  %v328_v7 = vshll.u32 %v3363_v63, 16  ;;  %v1111_v40 = vrot.slane %v1109_v28, 5  ;;  %v3401_v46 = vld [vmem:[%s3242_s14 + $0x30] sm:$0xf] }
  0x2a   : > { %v2465_v61 = vcombine.low %v1090_v53, %v1104_v58  ;;  %v1122_v44 = vrot.slane %v1120_v35, 4  ;;  %v1125_v45 = vrot.slane %v1123_v36, 5  ;;  %v1131_v49 = vrot.slane %v1129_v41, 5  ;;  %v3406_v50 = vld [vmem:[%s3242_s14 + $0x38] sm:$0xf] }
  0x2b   : > { %v327_v19 = vrot.slane %v325_v6, 4  ;;  %v330_v20 = vrot.slane %v328_v7, 5  ;;  %v1112_v48 = vor.u32 %v1111_v40, %v1108_v39  ;;  %v3409_v52 = vld [vmem:[%s3242_s14 + $0x34] sm:$0x1]  ;;  %v339_v53 = vshrl.u32 %v3401_v46, 16  ;;  %v3107_v6 = vld [vmem:[%s3785_s1 + $0x28] sm:$0xff]  }
  0x2c   : > { %2889 = vmatmul.mubr.bf16.vlgmr.msra.gmra.mrb[0].mxu0 %v2465_v61  ;;  %2803 = vmatpush3.bf16.msra.mxu1 %v3099_v43  ;;  %v1117_v43 = vrot.slane %v1115_v33, 5  ;;  %v3418_v61 = vld [vmem:[%s3242_s14 + $0x3c] sm:$0x1]  ;;  %v342_v3 = vshll.u32 %v3401_v46, 16  ;;  %v348_v4 = vshll.u32 %v3409_v52, 16  ;;  %v1134_v28 = vshrl.u32 %v2444_v5, 16 }
  0x2d   : > { %2897 = vmatpush3.bf16.msra.mxu0 %v3319_v1  ;;  %2804 = vmatprep.subr.bf16.mxu1 %v3101_v59  ;;  %v317_v1 = vor.u32 %v316_v17, %v313_v14  ;;  %v331_v32 = vor.u32 %v330_v20, %v327_v19  ;;  %v1113_v8 = vrot.slane %v1112_v48, 4  ;;  %v353_v14 = vshrl.u32 %v3406_v50, 16  ;;  %v3428_v17 = vld [vmem:[%s3242_s14 + $0x3c] sm:$0x1]  ;;  %v3436_v27 = vld [vmem:[%s3242_s14 + $0x44] sm:$0x1] }
  0x2e   : > { %2898 = vmatprep.subr.bf16.mxu0 %v3100_v54  ;;  %v344_v19 = vrot.slane %v342_v3, 5  ;;  %v350_v20 = vrot.slane %v348_v4, 5  ;;  %v362_v25 = vshll.u32 %v3418_v61, 16  ;;  %v1137_v36 = vshll.u32 %v2444_v5, 16 }
  0x2f   : > { %v318_v37 = vrot.slane %v317_v1, 4  ;;  %v332_v42 = vrot.slane %v331_v32, 4  ;;  %v1118_v23 = vsel %vm3287_vm2, %v1113_v8, %v1117_v43  ;;  %v355_v1 = vrot.slane %v353_v14, 4 }
  0x30   : > { %2805 = vmatpush3.bf16.msra.mxu1 %v3101_v59  ;;  %v1126_v59 = vor.u32 %v1125_v45, %v1122_v44  ;;  %v364_v40 = vrot.slane %v362_v25, 5  ;;  %v1136_v41 = vrot.slane %v1134_v28, 4  ;;  %v1139_v45 = vrot.slane %v1137_v36, 5  ;;  %v2478_v25 = vld [vmem:[%s3242_s14 + $0x18] sm:$0xe] }
  0x31   : > { %2899 = vmatpush3.bf16.msra.mxu0 %v3100_v54  ;;  %2806 = vmatprep.subr.bf16.mxu1 %v3103_v10  ;;  %v323_v47 = vsel %vm3287_vm2, %v318_v37, %v322_v18  ;;  %v3106_v54 = vld [vmem:[%s3785_s1 + $0x160] sm:$0xff]   ;;  %v337_v58 = vsel %vm3287_vm2, %v332_v42, %v336_v22  ;;  %v356_v22 = vshll.u32 %v3406_v50, 16  ;;  %v3109_v37 = vld [vmem:[%s3785_s1 + $0x30] sm:$0xff]   ;;  %v1143_v42 = vshll.u32 %v3428_v17, 16  ;;  %v3112_v28 = vld [vmem:[%s3785_s1 + $0x178] sm:$0xff]  }
  0x32   : > { %2900 = vmatprep.subr.bf16.mxu0 %v3102_v9  ;;  %v2338_v7 = vcombine.low %v323_v47, %v337_v58  ;;  %v1127_v18 = vrot.slane %v1126_v59, 4  ;;  %v1345_v47 = vrot.slane %v3280_v34, 5  ;;  %v1349_v48 = vrot.slane %v3330_v16, 5  ;;  %v3110_v58 = vld [vmem:[%s3785_s1 + $0x170] sm:$0xff]  }
  0x33   : > { %v358_v35 = vrot.slane %v356_v22, 5  ;;  %v1140_v4 = vor.u32 %v1139_v45, %v1136_v41  ;;  %v1145_v34 = vrot.slane %v1143_v42, 5  ;;  %v1353_v22 = vrot.slane %v3336_v21, 5  ;;  %v3115_v41 = vld [vmem:[%s3785_s1 + $0x180] sm:$0xff]  }
  0x34   : > { %2807 = vmatpush3.bf16.msra.mxu1 %v3103_v10  ;;  %v341_v10 = vrot.slane %v339_v53, 4  ;;  %2796 = vmatprep.mubr.bf16.mxu1 %v2338_v7  ;;  %v1132_v32 = vsel %vm3287_vm2, %v1127_v18, %v1131_v49  ;;  %v1157_v53 = vshll.u32 %v3436_v27, 16  ;;  %v2476_v7 = vld [vmem:[%s3242_s14 + $0x8] sm:$0xe]  ;;  %v2486_v36 = vrot.slane %v2478_v25, 9 }
  0x35   : > { %2901 = vmatpush3.bf16.msra.mxu0 %v3102_v9  ;;  %2808 = vmatprep.subr.bf16.mxu1 %v3105_v30  ;;  %v2446_v9 = vld [vmem:[%s3242_s14 + $0x40] sm:$0xf]  ;;  %v2466_v39 = vcombine.low %v1118_v23, %v1132_v32  ;;  %v359_v44 = vor.u32 %v358_v35, %v355_v1  ;;  %v2484_v14 = vrot.slane %v2476_v7, 9  ;;  %v1141_v18 = vrot.slane %v1140_v4, 4 }
  0x36   : > { %2902 = vmatprep.subr.bf16.mxu0 %v3104_v29  ;;  %v345_v33 = vor.u32 %v344_v19, %v341_v10  ;;  %v1151_v49 = vshll.u32 %v2446_v9, 16  ;;  %v2477_v10 = vld [vmem:[%s3242_s14 + $0x10] sm:$0xe]  ;;  %v2348_v19 = vcombine.low %v3248_v11, %v3251_v12  ;;  %v1159_v1 = vrot.slane %v1157_v53, 5  ;;  %v2479_v12 = vld [vmem:[%s3242_s14 + $0x20] sm:$0xe] }
  0x37   : > { %2892 = vmatprep.mubr.bf16.mxu0 %v2466_v39  ;;  %v360_v3 = vrot.slane %v359_v44, 4  ;;  %v1342_v32 = vsel %vm3461_vm5, %v2484_v14, %v1341_v57  ;;  %v1146_v21 = vsel %vm3287_vm2, %v1141_v18, %v1145_v34  ;;  %v3114_v35 = vld [vmem:[%s3785_s1 + $0x80] sm:$0xff]   ;;  %v1350_v42 = vsel %vm3461_vm5, %v2486_v36, %v1349_v48  ;;  %v3119_v44 = vld [vmem:[%s3785_s1 + $0x90] sm:$0xff]  }
  0x38   : > { %2809 = vmatpush3.bf16.msra.mxu1 %v3105_v30  ;;  %v3108_v30 = vld [vmem:[%s3785_s1 + $0x168] sm:$0xff]   ;;  %v346_v43 = vrot.slane %v345_v33, 4  ;;  %v1153_v16 = vrot.slane %v1151_v49, 5  ;;  %v1357_v45 = vrot.slane %v3386_v24, 5  ;;  %v1365_v53 = vrot.slane %v3428_v17, 5  ;;  %v3123_v18 = vld [vmem:[%s3785_s1 + $0xa0] sm:$0xff]  }
  0x39   : > { %2903 = vmatpush3.bf16.msra.mxu0 %v3104_v29  ;;  %2810 = vmatprep.subr.bf16.mxu1 %v3107_v6  ;;  %v1148_v29 = vshrl.u32 %v2446_v9, 16  ;;  %v1369_v24 = vrot.slane %v3436_v27, 5  ;;  %v682_v34 = vrot.slane %v3260_v15, 5  ;;  %v686_v17 = vrot.slane %v3305_v56, 5  ;;  %v650_v15 = vld [vmem:[%s3242_s14 + $0x8] sm:$0xe] }
  0x3a   : > { %2904 = vmatprep.subr.bf16.mxu0 %v3106_v54  ;;  %v351_v59 = vsel %vm3287_vm2, %v346_v43, %v350_v20  ;;  %v2485_v20 = vrot.slane %v2477_v10, 9  ;;  %v3117_v43 = vld [vmem:[%s3785_s1 + $0x88] sm:$0xff]   ;;  %v3120_v10 = vld [vmem:[%s3785_s1 + $0x190] sm:$0xff]   ;;  %v2361_v14 = vrot.slane %v650_v15, 9  ;;  %v694_v36 = vrot.slane %v3366_v0, 5  ;;  %v3133_v0 = vld [vmem:[%s3785_s1 + $0xc0] sm:$0xff]  }
  0x3b   : > { %v1150_v5 = vrot.slane %v1148_v29, 4  ;;  %v1361_v29 = vrot.slane %v3390_v26, 5  ;;  %v2351_v26 = vcombine.low %v3401_v46, %v3406_v50  ;;  %v3121_v46 = vld [vmem:[%s3785_s1 + $0x98] sm:$0xff]   ;;  %v3138_v15 = vld [vmem:[%s3785_s1 + $0x1c8] sm:$0xff]  }
  0x3c   : > { %2811 = vmatpush3.bf16.msra.mxu1 %v3107_v6  ;;  %v3111_v6 = vld [vmem:[%s3785_s1 + $0x38] sm:$0xff]   ;;  %v1346_v11 = vsel %vm3461_vm5, %v2485_v20, %v1345_v47 }
  0x3d   : > { %2905 = vmatpush3.bf16.msra.mxu0 %v3106_v54  ;;  %2812 = vmatprep.subr.bf16.mxu1 %v3109_v37  ;;  %v365_v54 = vsel %vm3287_vm2, %v360_v3, %v364_v40  ;;  %v1154_v23 = vor.u32 %v1153_v16, %v1150_v5  ;;  %v2508_v57 = vcombine.low %v1342_v32, %v1346_v11  ;;  %v649_v16 = vld [vmem:[%s3242_s14] sm:$0xe]  ;;  %v3122_v20 = vld [vmem:[%s3785_s1 + $0x198] sm:$0xff]  }
  0x3e   : > { %2906 = vmatprep.subr.bf16.mxu0 %v3108_v30  ;;  %v2339_v9 = vcombine.low %v351_v59, %v365_v54  ;;  %v2349_v40 = vcombine.low %v3297_v51, %v3302_v55  ;;  %v2350_v51 = vcombine.low %v3360_v62, %v3363_v63  ;;  %v678_v55 = vrot.slane %v3254_v13, 5  ;;  %v3118_v62 = vld [vmem:[%s3785_s1 + $0x188] sm:$0xff]   ;;  %v2481_v63 = vld [vmem:[%s3242_s14 + $0x30] sm:$0xe]  ;;  %v2483_v59 = vld [vmem:[%s3242_s14 + $0x40] sm:$0xe] }
  0x3f   : > { %v1155_v33 = vrot.slane %v1154_v23, 4  ;;  %v2480_v13 = vld [vmem:[%s3242_s14 + $0x28] sm:$0xe]  ;;  %v2489_v49 = vrot.slane %v2481_v63, 9  ;;  %v2491_v7 = vrot.slane %v2483_v59, 9  ;;  %v2360_v56 = vrot.slane %v649_v16, 9 }
  0x40   : > { %2813 = vmatpush3.bf16.msra.mxu1 %v3109_v37  ;;  %v2487_v37 = vrot.slane %v2479_v12, 9  ;;  %v2488_v48 = vrot.slane %v2480_v13, 9  ;;  %v690_v54 = vrot.slane %v3310_v60, 5  ;;  %v651_v23 = vld [vmem:[%s3242_s14 + $0x10] sm:$0xe] }
  0x41   : > { %2907 = vmatpush3.bf16.msra.mxu0 %v3108_v30  ;;  %2797 = vmatmul.mubr.bf16.gmra.mrb[4].mxu1 %v2339_v9  ;;  %v1160_v31 = vsel %vm3287_vm2, %v1155_v33, %v1159_v1  ;;  %v1362_v4 = vsel %vm3461_vm5, %v2489_v49, %v1361_v29  ;;  %v683_v9 = vsel %vm3461_vm5, %v2361_v14, %v682_v34  ;;  %v652_v60 = vld [vmem:[%s3242_s14 + $0x18] sm:$0xe]  ;;  %v2362_v25 = vrot.slane %v651_v23, 9  ;;  %v3125_v33 = vld [vmem:[%s3785_s1 + $0xa8] sm:$0xff]  }
  0x42   : > { %2908 = vmatprep.subr.bf16.mxu0 %v3110_v58  ;;  %2814 = vmatprep.subr.bf16.mxu1 %v3111_v6  ;;  %v2467_v39 = vcombine.low %v1146_v21, %v1160_v31  ;;  %v1354_v30 = vsel %vm3461_vm5, %v2487_v37, %v1353_v22  ;;  %v1358_v3 = vsel %vm3461_vm5, %v2488_v48, %v1357_v45  ;;  %v3134_v32 = vld [vmem:[%s3242_s14 + $0x10] ss:$8 sps:$4 sm:$0xff]   ;;  %v702_v29 = vrot.slane %v3409_v52, 5  ;;  %v3137_v49 = vld [vmem:[%s3785_s1 + $0xc8] sm:$0xff]  }
  0x43   : > { %2816 = vmatprep.mubr.bf16.mxu1 %v2348_v19  ;;  %v2509_v47 = vcombine.low %v1350_v42, %v1354_v30  ;;  %v2510_v27 = vcombine.low %v1358_v3, %v1362_v4  ;;  %v679_v19 = vsel %vm3461_vm5, %v2360_v56, %v678_v55  ;;  %v687_v11 = vsel %vm3461_vm5, %v2362_v25, %v686_v17  ;;  %v3128_v31 = vld [vmem:[%s3785_s1 + $0xb0] sm:$0xff]   ;;  %v3131_v37 = vld [vmem:[%s3785_s1 + $0xb8] sm:$0xff]   ;;  %v2562_v25 = vld [vmem:[%s3242_s14 + $0x28] sm:$0xf] }
  0x44   : > { %2815 = vmatpush3.bf16.msra.mxu1 %v3111_v6  ;;  %2893 = vmatmul.mubr.bf16.gmra.mrb[4].mxu0 %v2467_v39  ;;  %v1370_v6 = vsel %vm3461_vm5, %v2491_v7, %v1369_v24  ;;  %v2384_v1 = vcombine.low %v679_v19, %v683_v9  ;;  %v653_v39 = vld [vmem:[%s3242_s14 + $0x20] sm:$0xe]  ;;  %v3132_v45 = vld [vmem:[%s3785_s1 + $0x1b8] sm:$0xff]   ;;  %v3600_v24 = vld [vmem:[%s3242_s14 + $0x14] sm:$0x1] }
  0x45   : > { %2909 = vmatpush3.bf16.msra.mxu0 %v3110_v58  ;;  %2824 = vmatprep.subr.bf16.mxu1 %v3114_v35  ;;  %v2482_v58 = vld [vmem:[%s3242_s14 + $0x38] sm:$0xe]  ;;  %v2364_v42 = vrot.slane %v653_v39, 9  ;;  %v1722_v59 = vshll.u32 %v3600_v24, 16  ;;  %v3136_v7 = vld [vmem:[%s3242_s14 + $0x20] ss:$8 sps:$4 sm:$0xff]  }
  0x46   : > { %2910 = vmatprep.subr.bf16.mxu0 %v3112_v28  ;;  %2912 = vmatprep.mubr.bf16.mxu0 %v2508_v57  ;;  %v2490_v5 = vrot.slane %v2482_v58, 9  ;;  %v3126_v57 = vld [vmem:[%s3785_s1 + $0x1a8] sm:$0xff]   ;;  %v2558_v52 = vld [vmem:[%s3242_s14 + $0x18] sm:$0xf]  ;;  %v3140_v9 = vld [vmem:[%s3785_s1 + $0x1d0] sm:$0xff]  }
  0x47   : > { %v1727_v3 = vshrl.u32 %v2558_v52, 16  ;;  %v1730_v4 = vshll.u32 %v2558_v52, 16  ;;  %v3147_v56 = vld [vmem:[%s3242_s14 + $0x30] ss:$8 sps:$4 sm:$0xff]   ;;  %v3146_v52 = vld [vmem:[%s3785_s1 + $0x1e8] sm:$0xff]  }
  0x48   : > { %v1366_v50 = vsel %vm3461_vm5, %v2490_v5, %v1365_v53  ;;  %v2556_v53 = vld [vmem:[%s3242_s14 + $0x10] sm:$0xf]  ;;  %v3141_v23 = vld [vmem:[%s3785_s1 + $0xd8] sm:$0xff]  }
  0x49   : > { %2911 = vmatpush3.bf16.msra.mxu0 %v3112_v28  ;;  %2817 = vmatmul.mubr.bf16.vlgmr.msra.gmra.mrb[0].mxu1 %v2349_v40  ;;  %v2511_v22 = vcombine.low %v1366_v50, %v1370_v6  ;;  %v2363_v28 = vrot.slane %v652_v60, 9  ;;  %v654_v40 = vld [vmem:[%s3242_s14 + $0x28] sm:$0xe]  ;;  %v1716_v58 = vshll.u32 %v2556_v53, 16  ;;  %v1729_v50 = vrot.slane %v1727_v3, 4 }
  0x4a   : > { %2920 = vmatprep.subr.bf16.mxu0 %v3115_v41  ;;  %2825 = vmatpush3.bf16.msra.mxu1 %v3114_v35  ;;  %v3124_v35 = vld [vmem:[%s3785_s1 + $0x1a0] sm:$0xff]   ;;  %v2365_v30 = vrot.slane %v654_v40, 9  ;;  %v1732_v6 = vrot.slane %v1730_v4, 5 }
  0x4b   : > { %2826 = vmatprep.subr.bf16.mxu1 %v3117_v43  ;;  %2820 = vmatprep.mubr.bf16.mxu1 %v2350_v51  ;;  %v691_v12 = vsel %vm3461_vm5, %v2363_v28, %v690_v54  ;;  %v655_v51 = vld [vmem:[%s3242_s14 + $0x30] sm:$0xe]  ;;  %v1718_v16 = vrot.slane %v1716_v58, 5  ;;  %v1724_v54 = vrot.slane %v1722_v59, 5 }
  0x4c   : > { %2913 = vmatmul.mubr.bf16.vlgmr.msra.gmra.mrb[0].mxu0 %v2509_v47  ;;  %v2385_v21 = vcombine.low %v687_v11, %v691_v12  ;;  %v706_v47 = vrot.slane %v3418_v61, 5  ;;  %v2366_v63 = vrot.slane %v655_v51, 9  ;;  %v3604_v61 = vld [vmem:[%s3242_s14 + $0x1c] sm:$0x1]  ;;  %v3149_v11 = vld [vmem:[%s3242_s14 + $0x40] ss:$8 sps:$4 sm:$0xff]  }
  0x4d   : > { %2921 = vmatpush3.bf16.msra.mxu0 %v3115_v41  ;;  %2916 = vmatprep.mubr.bf16.mxu0 %v2510_v27  ;;  %v698_v41 = vrot.slane %v3369_v2, 5  ;;  %v695_v2 = vsel %vm3461_vm5, %v2364_v42, %v694_v36  ;;  %v1736_v5 = vshll.u32 %v3604_v61, 16  ;;  %v2564_v12 = vld [vmem:[%s3242_s14 + $0x30] sm:$0xf]  ;;  %v1758_v36 = vshll.u32 %v2562_v25, 16 }
  0x4e   : > { %2827 = vmatpush3.bf16.msra.mxu1 %v3117_v43  ;;  %2922 = vmatprep.subr.bf16.mxu0 %v3118_v62  ;;  %v3129_v43 = vld [vmem:[%s3785_s1 + $0x1b0] sm:$0xff]   ;;  %v703_v34 = vsel %vm3461_vm5, %v2366_v63, %v702_v29  ;;  %v1769_v40 = vshrl.u32 %v2564_v12, 16  ;;  %v3649_v51 = vld [vmem:[%s3242_s14 + $0x24] sm:$0x1] }
  0x4f   : > { %2828 = vmatprep.subr.bf16.mxu1 %v3119_v44  ;;  %v699_v55 = vsel %vm3461_vm5, %v2365_v30, %v698_v41  ;;  %v1738_v19 = vrot.slane %v1736_v5, 5  ;;  %v1772_v41 = vshll.u32 %v2564_v12, 16  ;;  %v1760_v29 = vrot.slane %v1758_v36, 5  ;;  %v2570_v5 = vld [vmem:[%s3242_s14 + $0x48] sm:$0xf]  ;;  %v3152_v12 = vld [vmem:[%s3785_s1 + $0x1f8] sm:$0xff]  }
  0x50   : > { %v2386_v13 = vcombine.low %v695_v2, %v699_v55  ;;  %v3652_v2 = vld [vmem:[%s3242_s14 + $0x2c] sm:$0x1]  ;;  %v1750_v58 = vshll.u32 %v3649_v51, 16 }
  0x51   : > { %2821 = vmatmul.mubr.bf16.gmra.mrb[4].mxu1 %v2351_v26  ;;  %2923 = vmatpush3.bf16.msra.mxu0 %v3118_v62  ;;  %v3135_v62 = vld [vmem:[%s3785_s1 + $0x1c0] sm:$0xff]   ;;  %v1713_v26 = vshrl.u32 %v2556_v53, 16  ;;  %v1774_v63 = vrot.slane %v1772_v41, 5  ;;  %v1764_v59 = vshll.u32 %v3652_v2, 16 }
  0x52   : > { %2829 = vmatpush3.bf16.msra.mxu1 %v3119_v44  ;;  %2924 = vmatprep.subr.bf16.mxu0 %v3120_v10  ;;  %v656_v44 = vld [vmem:[%s3242_s14 + $0x38] sm:$0xe]  ;;  %v2568_v53 = vld [vmem:[%s3242_s14 + $0x40] sm:$0xf] }
  0x53   : > { %2830 = vmatprep.subr.bf16.mxu1 %v3121_v46  ;;  %2840 = vmatprep.mubr.bf16.mxu1 %v2384_v1  ;;  %v2367_v48 = vrot.slane %v656_v44, 9  ;;  %v1715_v27 = vrot.slane %v1713_v26, 4  ;;  %v2560_v1 = vld [vmem:[%s3242_s14 + $0x20] sm:$0xf]  ;;  %v3148_v26 = vld [vmem:[%s3785_s1 + $0xf0] sm:$0xff]  }
  0x54   : > { %2917 = vmatmul.mubr.bf16.gmra.mrb[4].mxu0 %v2511_v22 }
  0x55   : > { %2925 = vmatpush3.bf16.msra.mxu0 %v3120_v10  ;;  %2936 = vmatprep.mubr.bf16.mxu0 %v3134_v32  ;;  %v707_v17 = vsel %vm3461_vm5, %v2367_v48, %v706_v47  ;;  %v1719_v10 = vor.u32 %v1718_v16, %v1715_v27  ;;  %v3655_v47 = vld [vmem:[%s3242_s14 + $0x34] sm:$0x1]  ;;  %v1800_v27 = vshll.u32 %v2568_v53, 16 }
  0x56   : > { %2831 = vmatpush3.bf16.msra.mxu1 %v3121_v46  ;;  %2926 = vmatprep.subr.bf16.mxu0 %v3122_v20  ;;  %v3139_v46 = vld [vmem:[%s3785_s1 + $0xd0] sm:$0xff]   ;;  %v2387_v14 = vcombine.low %v703_v34, %v707_v17  ;;  %v1778_v3 = vshll.u32 %v3655_v47, 16  ;;  %v1797_v17 = vshrl.u32 %v2568_v53, 16  ;;  %v2601_v53 = vld [vmem:[%s3242_s14 + $0x18] sm:$0xe] }
  0x57   : > { %2832 = vmatprep.subr.bf16.mxu1 %v3123_v18  ;;  %v1720_v22 = vrot.slane %v1719_v10, 4 }
  0x59   : > { %2927 = vmatpush3.bf16.msra.mxu0 %v3122_v20  ;;  %v3153_v20 = vld [vmem:[%s3242_s14 + $0x8] ss:$8 sps:$4 sm:$0xff]   ;;  %v1725_v28 = vsel %vm3287_vm2, %v1720_v22, %v1724_v54 }
  0x5a   : > { %2833 = vmatpush3.bf16.msra.mxu1 %v3123_v18  ;;  %2928 = vmatprep.subr.bf16.mxu0 %v3124_v35  ;;  %v1733_v18 = vor.u32 %v1732_v6, %v1729_v50  ;;  %v1811_v50 = vshrl.u32 %v2570_v5, 16  ;;  %v1814_v6 = vshll.u32 %v2570_v5, 16  ;;  %v2609_v5 = vrot.slane %v2601_v53, 9 }
  0x5b   : > { %2834 = vmatprep.subr.bf16.mxu1 %v3125_v33 }
  0x5c   : > { %v1734_v60 = vrot.slane %v1733_v18, 4  ;;  %v1766_v18 = vrot.slane %v1764_v59, 5  ;;  %v3158_v59 = vld [vmem:[%s3242_s14 + $0x38] ss:$8 sps:$4 sm:$0xff]  }
  0x5d   : > { %2929 = vmatpush3.bf16.msra.mxu0 %v3124_v35  ;;  %v1741_v35 = vshrl.u32 %v2560_v1, 16 }
  0x5e   : > { %2835 = vmatpush3.bf16.msra.mxu1 %v3125_v33  ;;  %2930 = vmatprep.subr.bf16.mxu0 %v3126_v57  ;;  %v1739_v32 = vsel %vm3287_vm2, %v1734_v60, %v1738_v19  ;;  %v3143_v33 = vld [vmem:[%s3785_s1 + $0xe0] sm:$0xff]   ;;  %v3682_v60 = vld [vmem:[%s3242_s14 + $0x4c] sm:$0x1] }
  0x5f   : > { %2836 = vmatprep.subr.bf16.mxu1 %v3128_v31  ;;  %v2588_v39 = vcombine.low %v1725_v28, %v1739_v32  ;;  %v1743_v55 = vrot.slane %v1741_v35, 4  ;;  %v1813_v28 = vrot.slane %v1811_v50, 4  ;;  %v1816_v32 = vrot.slane %v1814_v6, 5  ;;  %v3154_v35 = vld [vmem:[%s3242_s14 + $0x18] ss:$8 sps:$4 sm:$0xff]   ;;  %v3162_v6 = vld [vmem:[%s3785_s1 + $0x228] sm:$0xff]  }
  0x61   : > { %2931 = vmatpush3.bf16.msra.mxu0 %v3126_v57  ;;  %v1755_v57 = vshrl.u32 %v2562_v25, 16  ;;  %v1802_v25 = vrot.slane %v1800_v27, 5 }
  0x62   : > { %2837 = vmatpush3.bf16.msra.mxu1 %v3128_v31  ;;  %2932 = vmatprep.subr.bf16.mxu0 %v3129_v43  ;;  %v1744_v31 = vshll.u32 %v2560_v1, 16  ;;  %v1799_v1 = vrot.slane %v1797_v17, 4 }
  0x63   : > { %2838 = vmatprep.subr.bf16.mxu1 %v3131_v37 }
  0x64   : > { %v1746_v44 = vrot.slane %v1744_v31, 5 }
  0x65   : > { %2933 = vmatpush3.bf16.msra.mxu0 %v3129_v43  ;;  %v3144_v43 = vld [vmem:[%s3785_s1 + $0x1e0] sm:$0xff]  }
  0x66   : > { %2839 = vmatpush3.bf16.msra.mxu1 %v3131_v37  ;;  %2934 = vmatprep.subr.bf16.mxu0 %v3132_v45  ;;  %v3142_v37 = vld [vmem:[%s3785_s1 + $0x1d8] sm:$0xff]  }
  0x67   : > { %2848 = vmatprep.subr.bf16.mxu1 %v3133_v0 }
  0x69   : > { %2841 = vmatmul.mubr.bf16.vlgmr.msra.gmra.mrb[0].mxu1 %v2385_v21  ;;  %2935 = vmatpush3.bf16.msra.mxu0 %v3132_v45  ;;  %v2566_v21 = vld [vmem:[%s3242_s14 + $0x38] sm:$0xf]  ;;  %v1757_v45 = vrot.slane %v1755_v57, 4 }
  0x6a   : > { %2849 = vmatpush3.bf16.msra.mxu1 %v3133_v0  ;;  %2844 = vmatprep.mubr.bf16.mxu1 %v2386_v13  ;;  %v1783_v42 = vshrl.u32 %v2566_v21, 16  ;;  %v1786_v30 = vshll.u32 %v2566_v21, 16  ;;  %v3145_v0 = vld [vmem:[%s3785_s1 + $0xe8] sm:$0xff]   ;;  %v1771_v13 = vrot.slane %v1769_v40, 4  ;;  %v2604_v21 = vld [vmem:[%s3242_s14 + $0x30] sm:$0xe] }
  0x6b   : > { %2850 = vmatprep.subr.bf16.mxu1 %v3137_v49  ;;  %2944 = vmatprep.subr.bf16.mxu0 %v3135_v62  ;;  %v1761_v34 = vor.u32 %v1760_v29, %v1757_v45 }
  0x6c   : > { %2937 = vmatmul.mubr.bf16.vlgmr.msra.gmra.mrb[0].mxu0 %v3136_v7  ;;  %v1785_v48 = vrot.slane %v1783_v42, 4  ;;  %v1747_v7 = vor.u32 %v1746_v44, %v1743_v55  ;;  %v1775_v16 = vor.u32 %v1774_v63, %v1771_v13  ;;  %v1803_v42 = vor.u32 %v1802_v25, %v1799_v1 }
  0x6d   : > { %2945 = vmatpush3.bf16.msra.mxu0 %v3135_v62  ;;  %2940 = vmatprep.mubr.bf16.mxu0 %v3147_v56  ;;  %v3658_v62 = vld [vmem:[%s3242_s14 + $0x3c] sm:$0x1]  ;;  %v3150_v56 = vld [vmem:[%s3785_s1 + $0x1f0] sm:$0xff]   ;;  %v1762_v54 = vrot.slane %v1761_v34, 4  ;;  %v2020_v55 = vrot.slane %v3655_v47, 5  ;;  %v2012_v25 = vrot.slane %v3649_v51, 5 }
  0x6e   : > { %2851 = vmatpush3.bf16.msra.mxu1 %v3137_v49  ;;  %2946 = vmatprep.subr.bf16.mxu0 %v3138_v15  ;;  %v1788_v49 = vrot.slane %v1786_v30, 5  ;;  %v1792_v4 = vshll.u32 %v3658_v62, 16  ;;  %v1748_v10 = vrot.slane %v1747_v7, 4  ;;  %v1776_v19 = vrot.slane %v1775_v16, 4  ;;  %v3160_v16 = vld [vmem:[%s3785_s1 + $0x218] sm:$0xff]  }
  0x6f   : > { %2852 = vmatprep.subr.bf16.mxu1 %v3139_v46  ;;  %v1767_v57 = vsel %vm3287_vm2, %v1762_v54, %v1766_v18  ;;  %v1817_v30 = vor.u32 %v1816_v32, %v1813_v28  ;;  %v2024_v45 = vrot.slane %v3658_v62, 5  ;;  %v2008_v7 = vrot.slane %v3604_v61, 5 }
  0x70   : > { %v2032_v54 = vrot.slane %v3682_v60, 5  ;;  %v2016_v32 = vrot.slane %v3652_v2, 5 }
  0x71   : > { %2845 = vmatmul.mubr.bf16.gmra.mrb[4].mxu1 %v2387_v14  ;;  %2947 = vmatpush3.bf16.msra.mxu0 %v3138_v15  ;;  %v3151_v15 = vld [vmem:[%s3785_s1 + $0xf8] sm:$0xff]   ;;  %v1752_v14 = vrot.slane %v1750_v58, 5  ;;  %v3159_v58 = vld [vmem:[%s3785_s1 + $0x210] sm:$0xff]   ;;  %v2009_v61 = vsel %vm3461_vm5, %v2609_v5, %v2008_v7 }
  0x72   : > { %2853 = vmatpush3.bf16.msra.mxu1 %v3139_v46  ;;  %2864 = vmatprep.mubr.bf16.mxu1 %v3153_v20  ;;  %v1789_v46 = vor.u32 %v1788_v49, %v1785_v48  ;;  %v1780_v20 = vrot.slane %v1778_v3, 5  ;;  %v2600_v49 = vld [vmem:[%s3242_s14 + $0x10] sm:$0xe] }
  0x73   : > { %2854 = vmatprep.subr.bf16.mxu1 %v3141_v23  ;;  %2948 = vmatprep.subr.bf16.mxu0 %v3140_v9  ;;  %v1753_v31 = vsel %vm3287_vm2, %v1748_v10, %v1752_v14  ;;  %v2608_v3 = vrot.slane %v2600_v49, 9  ;;  %v2607_v10 = vld [vmem:[%s3242_s14 + $0x48] sm:$0xe] }
  0x74   : > { %2941 = vmatmul.mubr.bf16.gmra.mrb[4].mxu0 %v3149_v11  ;;  %v1790_v22 = vrot.slane %v1789_v46, 4  ;;  %v3155_v11 = vld [vmem:[%s3785_s1 + $0x200] sm:$0xff]   ;;  %v1781_v40 = vsel %vm3287_vm2, %v1776_v19, %v1780_v20  ;;  %v2589_v29 = vcombine.low %v1753_v31, %v1767_v57  ;;  %v2615_v19 = vrot.slane %v2607_v10, 9  ;;  %v3164_v20 = vld [vmem:[%s3785_s1 + $0x238] sm:$0xff]  }
  0x75   : > { %2949 = vmatpush3.bf16.msra.mxu0 %v3140_v9  ;;  %2960 = vmatprep.mubr.bf16.mxu0 %v2588_v39  ;;  %v1794_v9 = vrot.slane %v1792_v4, 5  ;;  %v3157_v39 = vld [vmem:[%s3242_s14 + $0x28] ss:$8 sps:$4 sm:$0xff]   ;;  %v2004_v4 = vrot.slane %v3600_v24, 5 }
  0x76   : > { %2855 = vmatpush3.bf16.msra.mxu1 %v3141_v23  ;;  %2950 = vmatprep.subr.bf16.mxu0 %v3142_v37  ;;  %v3679_v23 = vld [vmem:[%s3242_s14 + $0x44] sm:$0x1] }
  0x77   : > { %2856 = vmatprep.subr.bf16.mxu1 %v3143_v33  ;;  %v1806_v36 = vshll.u32 %v3679_v23, 16  ;;  %v1795_v41 = vsel %vm3287_vm2, %v1790_v22, %v1794_v9  ;;  %v2005_v24 = vsel %vm3461_vm5, %v2608_v3, %v2004_v4  ;;  %v2028_v14 = vrot.slane %v3679_v23, 5  ;;  %v2602_v22 = vld [vmem:[%s3242_s14 + $0x20] sm:$0xe]  ;;  %v2603_v9 = vld [vmem:[%s3242_s14 + $0x28] sm:$0xe] }
  0x78   : > { %v2590_v13 = vcombine.low %v1781_v40, %v1795_v41  ;;  %v2632_v50 = vcombine.low %v2005_v24, %v2009_v61  ;;  %v2033_v23 = vsel %vm3461_vm5, %v2615_v19, %v2032_v54  ;;  %v2611_v28 = vrot.slane %v2603_v9, 9 }
  0x79   : > { %2951 = vmatpush3.bf16.msra.mxu0 %v3142_v37  ;;  %v1820_v37 = vshll.u32 %v3682_v60, 16  ;;  %v1808_v63 = vrot.slane %v1806_v36, 5  ;;  %v2610_v60 = vrot.slane %v2602_v22, 9 }
  0x7a   : > { %2857 = vmatpush3.bf16.msra.mxu1 %v3143_v33  ;;  %2952 = vmatprep.subr.bf16.mxu0 %v3144_v43  ;;  %v2605_v33 = vld [vmem:[%s3242_s14 + $0x38] sm:$0xe] }
  0x7b   : > { %2858 = vmatprep.subr.bf16.mxu1 %v3145_v0  ;;  %v2613_v44 = vrot.slane %v2605_v33, 9  ;;  %v1822_v48 = vrot.slane %v1820_v37, 5 }
  0x7d   : > { %2953 = vmatpush3.bf16.msra.mxu0 %v3144_v43  ;;  %v3156_v43 = vld [vmem:[%s3785_s1 + $0x208] sm:$0xff]   ;;  %v2025_v62 = vsel %vm3461_vm5, %v2613_v44, %v2024_v45 }
  0x7e   : > { %2859 = vmatpush3.bf16.msra.mxu1 %v3145_v0  ;;  %2954 = vmatprep.subr.bf16.mxu0 %v3146_v52  ;;  %v2612_v0 = vrot.slane %v2604_v21, 9  ;;  %v2017_v21 = vsel %vm3461_vm5, %v2611_v28, %v2016_v32 }
  0x7f   : > { %2860 = vmatprep.subr.bf16.mxu1 %v3148_v26 }
  0x80   : > { %v2021_v47 = vsel %vm3461_vm5, %v2612_v0, %v2020_v55 }
  0x81   : > { %2955 = vmatpush3.bf16.msra.mxu0 %v3146_v52  ;;  %v1804_v52 = vrot.slane %v1803_v42, 4  ;;  %v2634_v34 = vcombine.low %v2021_v47, %v2025_v62 }
  0x82   : > { %2861 = vmatpush3.bf16.msra.mxu1 %v3148_v26  ;;  %2956 = vmatprep.subr.bf16.mxu0 %v3150_v56  ;;  %v1818_v26 = vrot.slane %v1817_v30, 4 }
  0x83   : > { %2862 = vmatprep.subr.bf16.mxu1 %v3151_v15  ;;  %v1809_v17 = vsel %vm3287_vm2, %v1804_v52, %v1808_v63 }
  0x84   : > { %v1823_v27 = vsel %vm3287_vm2, %v1818_v26, %v1822_v48 }
  0x85   : > { %2957 = vmatpush3.bf16.msra.mxu0 %v3150_v56  ;;  %v2591_v46 = vcombine.low %v1809_v17, %v1823_v27  ;;  %v2606_v56 = vld [vmem:[%s3242_s14 + $0x40] sm:$0xe]  ;;  %s2647_s14 = sshll.u32 %s3794_s16, 5 }
  0x86   : > { %2863 = vmatpush3.bf16.msra.mxu1 %v3151_v15  ;;  %2958 = vmatprep.subr.bf16.mxu0 %v3152_v12  ;;  %v3163_v15 = vld [vmem:[%s3785_s1 + $0x230] sm:$0xff]   ;;  %v2614_v18 = vrot.slane %v2606_v56, 9  ;;  %s212_s28 = scalar_lea.vmem %s3787_s3, %s2647_s14 }
  0x87   : > { %2992 = vmatprep.subr.bf16.mxu1 %v3155_v11  ;;  %v2667_v44 = vld [vmem:[%s212_s28 + $0x18] sm:$0xff]   ;;  %v2666_v45 = vld [vmem:[%s212_s28 + $0x10] sm:$0xff]   ;;  %v2665_v53 = vld [vmem:[%s212_s28 + $0x8] sm:$0xff]  }
  0x88   : > { %v2029_v1 = vsel %vm3461_vm5, %v2614_v18, %v2028_v14  ;;  %v2663_v48 = vunpack.c.l.bf16 %v2667_v44  ;;  %v2659_v26 = vunpack.c.l.bf16 %v2666_v45  ;;  %v2664_v3 = vunpack.c.h.bf16 %v2667_v44 }
  0x89   : > { %2865 = vmatmul.mubr.bf16.vlgmr.msra.gmra.mrb[0].mxu1 %v3154_v35  ;;  %2959 = vmatpush3.bf16.msra.mxu0 %v3152_v12  ;;  %v2013_v12 = vsel %vm3461_vm5, %v2610_v60, %v2012_v25  ;;  %v2655_v27 = vunpack.c.l.bf16 %v2665_v53  ;;  %v2656_v14 = vunpack.c.h.bf16 %v2665_v53 }
  0x8a   : > { %3000 = vmatpush3.bf16.msra.mxu1 %v3155_v11  ;;  %2868 = vmatprep.mubr.bf16.mxu1 %v3157_v39  ;;  %v2633_v33 = vcombine.low %v2013_v12, %v2017_v21 }
  0x8b   : > { %2993 = vmatprep.subr.bf16.mxu1 %v3156_v43  ;;  %2968 = vmatprep.subr.bf16.mxu0 %v3155_v11 }
  0x8c   : > { %2961 = vmatmul.mubr.bf16.vlgmr.msra.gmra.mrb[0].mxu0 %v2589_v29  ;;  %v2644_v29 = vld [vmem:[%s3786_s2] ss:$0 sm:$0xff] }
  0x8d   : > { %2969 = vmatpush3.bf16.msra.mxu0 %v3155_v11  ;;  %2964 = vmatprep.mubr.bf16.mxu0 %v2590_v13  ;;  %v2635_v11 = vcombine.low %v2029_v1, %v2033_v23 }
  0x8e   : > { %3001 = vmatpush3.bf16.msra.mxu1 %v3156_v43  ;;  %2970 = vmatprep.subr.bf16.mxu0 %v3156_v43 }
  0x8f   : > { %2994 = vmatprep.subr.bf16.mxu1 %v3159_v58 }
  0x91   : > { %2869 = vmatmul.mubr.bf16.gmra.mrb[4].mxu1 %v3158_v59  ;;  %2971 = vmatpush3.bf16.msra.mxu0 %v3156_v43 }
  0x92   : > { %3002 = vmatpush3.bf16.msra.mxu1 %v3159_v58  ;;  %2988 = vmatprep.mubr.bf16.mxu1 %v2634_v34  ;;  %v2660_v34 = vunpack.c.h.bf16 %v2666_v45 }
  0x93   : > { %2995 = vmatprep.subr.bf16.mxu1 %v3160_v16  ;;  %2972 = vmatprep.subr.bf16.mxu0 %v3159_v58 }
  0x94   : > { %2965 = vmatmul.mubr.bf16.gmra.mrb[4].mxu0 %v2591_v46 }
  0x95   : > { %2973 = vmatpush3.bf16.msra.mxu0 %v3159_v58  ;;  %2984 = vmatprep.mubr.bf16.mxu0 %v2632_v50  ;;  %v2650_v58 = vld [vmem:[%s212_s28] sm:$0xff]  }
  0x96   : > { %3003 = vmatpush3.bf16.msra.mxu1 %v3160_v16  ;;  %2974 = vmatprep.subr.bf16.mxu0 %v3160_v16  ;;  %v2652_v25 = vunpack.c.h.bf16 %v2650_v58 }
  0x97   : > { %2996 = vmatprep.subr.bf16.mxu1 %v3161_v38 }
  0x99   : > { %2975 = vmatpush3.bf16.msra.mxu0 %v3160_v16 }
  0x9a   : > { %3004 = vmatpush3.bf16.msra.mxu1 %v3161_v38  ;;  %2976 = vmatprep.subr.bf16.mxu0 %v3161_v38 }
  0x9b   : > { %2997 = vmatprep.subr.bf16.mxu1 %v3162_v6 }
  0x9d   : > { %2977 = vmatpush3.bf16.msra.mxu0 %v3161_v38  ;;  %v2651_v38 = vunpack.c.l.bf16 %v2650_v58 }
  0x9e   : > { %3005 = vmatpush3.bf16.msra.mxu1 %v3162_v6  ;;  %2978 = vmatprep.subr.bf16.mxu0 %v3162_v6 }
  0x9f   : > { %2998 = vmatprep.subr.bf16.mxu1 %v3163_v15 }
  0xa1   : > { %2979 = vmatpush3.bf16.msra.mxu0 %v3162_v6 }
  0xa2   : > { %3006 = vmatpush3.bf16.msra.mxu1 %v3163_v15  ;;  %2980 = vmatprep.subr.bf16.mxu0 %v3163_v15 }
  0xa3   : > { %2999 = vmatprep.subr.bf16.mxu1 %v3164_v20 }
  0xa5   : > { %2981 = vmatpush3.bf16.msra.mxu0 %v3163_v15 }
  0xa6   : > { %3007 = vmatpush3.bf16.msra.mxu1 %v3164_v20  ;;  %2982 = vmatprep.subr.bf16.mxu0 %v3164_v20 }
  0xa9   : > { %2989 = vmatmul.mubr.bf16.vlgmr.msra.gmra.mrb[8].mxu1 %v2635_v11  ;;  %2983 = vmatpush3.bf16.msra.mxu0 %v3164_v20 }
  0xac   : > { %2985 = vmatmul.mubr.bf16.vlgmr.msra.gmra.mrb[0].mxu0 %v2633_v33 }
 0x15c   : > { %v2866_v35 = vpop.f32.mrb[0].mxu1 }
 0x15d   : > { %v994_v51 = vpop.f32.mrb[1].mxu1 }
 0x15e   : > { %v2867_v31 = vpop.f32.mrb[2].mxu1 }
 0x15f   : > { %v997_v2 = vpop.f32.mrb[3].mxu1 }
 0x164   : > { %v2870_v57 = vpop.f32.mrb[4].mxu1 }
 0x165   : > { %v1010_v36 = vpop.f32.mrb[5].mxu1 }
 0x166   : > { %v2871_v37 = vpop.f32.mrb[6].mxu1 }
 0x167   : > { %v1013_v39 = vpop.f32.mrb[7].mxu1  ;;  %v2966_v40 = vpop.f32.mrb[4].mxu0 }
 0x168   : > { %v3012_v41 = vadd.f32 %v2966_v40, %v2870_v57  ;;  %v1955_v42 = vpop.f32.mrb[5].mxu0 }
 0x169   : > { %v3014_v30 = vadd.f32 %v1955_v42, %v1010_v36  ;;  %v2967_v8 = vpop.f32.mrb[6].mxu0 }
 0x16a   : > { %v3016_v43 = vadd.f32 %v2967_v8, %v2871_v37  ;;  %v1958_v0 = vpop.f32.mrb[7].mxu0 }
 0x16b   : > { %v3018_v55 = vadd.f32 %v1958_v0, %v1013_v39 }
 0x17c   : > { %v2990_v13 = vpop.f32.mrb[8].mxu1 }
 0x17d   : > { %v3013_v63 = vadd.f32 %v3012_v41, %v2990_v13  ;;  %v2165_v49 = vpop.f32.mrb[9].mxu1 }
 0x17e   : > { %v3015_v52 = vadd.f32 %v3014_v30, %v2165_v49  ;;  %v2991_v47 = vpop.f32.mrb[10].mxu1 }
 0x17f   : > { %v2217_v62 = vadd.f32 %v3013_v63, %v2644_v29  ;;  %v3017_v59 = vadd.f32 %v3016_v43, %v2991_v47  ;;  %v2168_v4 = vpop.f32.mrb[11].mxu1  ;;  %v2986_v17 = vpop.f32.mrb[0].mxu0 }
 0x180   : > { %v2215_v5 = vadd.f32 %v3015_v52, %v2644_v29  ;;  %v3019_v7 = vadd.f32 %v3018_v55, %v2168_v4  ;;  %v3008_v61 = vadd.f32 %v2986_v17, %v2866_v35  ;;  %v2149_v46 = vpop.f32.mrb[1].mxu0 }
 0x181   : > { %v2225_v16 = vadd.f32 %v2663_v48, %v2217_v62  ;;  %v2218_v24 = vadd.f32 %v3017_v59, %v2644_v29  ;;  %v3009_v56 = vadd.f32 %v2149_v46, %v994_v51  ;;  %v2987_v10 = vpop.f32.mrb[2].mxu0 }
 0x182   : > { %v2223_v50 = vadd.f32 %v2659_v26, %v2215_v5  ;;  %v2216_v6 = vadd.f32 %v3019_v7, %v2644_v29  ;;  %v2213_v18 = vadd.f32 %v3008_v61, %v2644_v29  ;;  %v3010_v20 = vadd.f32 %v2987_v10, %v2867_v31  ;;  %v2152_v22 = vpop.f32.mrb[3].mxu0 }
 0x183   : > { %v2233_v15 = vmax.f32 %v2225_v16, 0.0  ;;  %v2226_v54 = vadd.f32 %v2664_v3, %v2218_v24  ;;  %v2211_v1 = vadd.f32 %v3009_v56, %v2644_v29  ;;  %v3011_v60 = vadd.f32 %v2152_v22, %v997_v2 }
 0x184   : > { %v2231_v19 = vmax.f32 %v2223_v50, 0.0  ;;  %v2224_v9 = vadd.f32 %v2660_v34, %v2216_v6  ;;  %v2221_v28 = vadd.f32 %v2655_v27, %v2213_v18  ;;  %v2214_v32 = vadd.f32 %v3010_v20, %v2644_v29 }
 0x185   : > { %2241 = vst [vmem:[%s3771_s8 + $0x30] sm:$0xff] %v2233_v15  ;;  %v2234_v23 = vmax.f32 %v2226_v54, 0.0  ;;  %v2219_v12 = vadd.f32 %v2651_v38, %v2211_v1  ;;  %v2212_v21 = vadd.f32 %v3011_v60, %v2644_v29 }
 0x186   : > { %2239 = vst [vmem:[%s3771_s8 + $0x20] sm:$0xff] %v2231_v19  ;;  %v2232_v11 = vmax.f32 %v2224_v9, 0.0  ;;  %v2229_v33 = vmax.f32 %v2221_v28, 0.0  ;;  %v2222_v35 = vadd.f32 %v2656_v14, %v2214_v32 }
 0x187   : > { %2242 = vst [vmem:[%s3771_s8 + $0x38] sm:$0xff] %v2234_v23  ;;  %v2227_v51 = vmax.f32 %v2219_v12, 0.0  ;;  %v2220_v31 = vadd.f32 %v2652_v25, %v2212_v21 }
 0x188   : > { %2240 = vst [vmem:[%s3771_s8 + $0x28] sm:$0xff] %v2232_v11  ;;  %2237 = vst [vmem:[%s3771_s8 + $0x10] sm:$0xff] %v2229_v33  ;;  %v2230_v57 = vmax.f32 %v2222_v35, 0.0 }
 0x189   : > { %2235 = vst [vmem:[%s3771_s8] sm:$0xff] %v2227_v51  ;;  %v2228_v2 = vmax.f32 %v2220_v31, 0.0 }
 0x18a   : > { %2238 = vst [vmem:[%s3771_s8 + $0x18] sm:$0xff] %v2230_v57 }
 0x18b   : > { %2236 = vst [vmem:[%s3771_s8 + $0x8] sm:$0xff] %v2228_v2 }
 0x18c PF: > { %s14_s15 = sadd.s32 1, %s3171_s15  }
 0x18d   : > { %p11_p4 = scmp.ge.s32.totalorder %s14_s15, 4  }
 0x18f   :  { %13 = sbr.rel (!%p11_p4) target bundleno = 1 (0x1), region = 79 }

// kernel: residual_block.2
= control target key start
LH: loop header
LB: loop body
LE: loop exit
PB: predicated region body
PF: predicated region fallthrough
CT: control target
= control target key end

     0   :  { %s3605_s21 = smov 0   ;;  %s4153_s0 = inlined_call_operand.vmem [shape: bf16[2,40,16,128], index: 0, kind: input, shape index: {}]   ;;  %s4154_s1 = inlined_call_operand.vmem [shape: bf16[9,128,128], index: 1, kind: input, shape index: {}]   ;;  %s4155_s2 = inlined_call_operand.vmem [shape: f32[1,128], index: 2, kind: input, shape index: {}]   ;;  %s4156_s3 = inlined_call_operand.vmem [shape: bf16[128,128], index: 3, kind: input, shape index: {}]   ;;  %s4157_s4 = inlined_call_operand.vmem [shape: f32[1,128], index: 4, kind: input, shape index: {}]   ;;  %s4158_s5 = inlined_call_operand.vmem [shape: bf16[2,10,16,128], index: 5, kind: output, shape index: {0}]   ;;  %s4159_s6 = inlined_call_operand.vmem [shape: bf16[2,8,8,128], index: 6, kind: output, shape index: {1}]  }
   0x1 LB: > { %s2605_s22 = sadd.s32 4294967295, %s3567_s21   ;;  %p2609_p0 = scmp.ge.s32.totalorder %s3567_s21, 1  ;;  %s3567_s21 = sphi %s3605_s21, %s17_s21  }
   0x2   : > { %p215_p1 = scmp.lt.s32.totalorder %s3567_s21, 3 }
   0x4   : > { %p216_p2 = pnand %p2609_p0, %p215_p1 }
   0x5   : > { %v3453_v0 = vld [vmem:[%s4154_s1 + $0x40] sm:$0xff] (!%p216_p2)   ;;  %p250_p3 = scmp.lt.s32.totalorder (!%p216_p2), %s2605_s22, 1  ;;  %v3455_v2 = vld [vmem:[%s4154_s1 + $0x48] sm:$0xff] (!%p216_p2)   ;;  %v3457_v4 = vld [vmem:[%s4154_s1 + $0x50] sm:$0xff] (!%p216_p2)   ;;  %vm606_vm0 = vsmask.f32 (!%p216_p2), 3328 }
   0x6   : > { %219 = sbr.rel (%p216_p2) target bundleno = 414 (0x19e), region = 40  ;;  %v3454_v1 = vld [vmem:[%s4154_s1 + $0x100] sm:$0xff] (!%p216_p2)   ;;  %3138 = vmatprep.subr.bf16.mxu1 (!%p216_p2), %v3453_v0  ;;  %v3456_v3 = vld [vmem:[%s4154_s1 + $0x108] sm:$0xff] (!%p216_p2)   ;;  %v3458_v5 = vld [vmem:[%s4154_s1 + $0x110] sm:$0xff] (!%p216_p2)   ;;  %vm607_vm1 = vsmask.f32 (!%p216_p2), 7440 }
   0x7   : > { %3234 = vmatprep.subr.bf16.mxu0 (!%p216_p2), %v3454_v1  ;;  %3139 = vmatpush3.bf16.msra.mxu1 (!%p216_p2), %v3453_v0  ;;  %v3459_v6 = vld [vmem:[%s4154_s1 + $0x58] sm:$0xff] (!%p216_p2)   ;;  %v3461_v8 = vld [vmem:[%s4154_s1 + $0x60] sm:$0xff] (!%p216_p2)   ;;  %v3463_v10 = vld [vmem:[%s4154_s1 + $0x68] sm:$0xff] (!%p216_p2)   ;;  %v3569_v53 = vmov (!%p216_p2), 0   ;;  %vm2279_vm3 = vcmask (!%p216_p2), 1043456   ;;  %vm2285_vm5 = vcmask (!%p216_p2), 1040384  }
   0x8   : > { %3235 = vmatpush3.bf16.msra.mxu0 (!%p216_p2), %v3454_v1  ;;  %3140 = vmatprep.subr.bf16.mxu1 (!%p216_p2), %v3455_v2  ;;  %v3460_v7 = vld [vmem:[%s4154_s1 + $0x118] sm:$0xff] (!%p216_p2)   ;;  %v3462_v9 = vld [vmem:[%s4154_s1 + $0x120] sm:$0xff] (!%p216_p2)   ;;  %v3464_v12 = vld [vmem:[%s4154_s1 + $0x128] sm:$0xff] (!%p216_p2)   ;;  %vm2280_vm4 = vsmask.f32 (!%p216_p2), 7938 }
   0x9   : > { %3236 = vmatprep.subr.bf16.mxu0 (!%p216_p2), %v3456_v3  ;;  %v3465_v14 = vld [vmem:[%s4154_s1 + $0x70] sm:$0xff] (!%p216_p2)   ;;  %v3467_v16 = vld [vmem:[%s4154_s1 + $0x78] sm:$0xff] (!%p216_p2)   ;;  %v3470_v18 = vld [vmem:[%s4154_s1] sm:$0xff] (!%p216_p2)   ;;  %vm2286_vm6 = vsmask.f32 (!%p216_p2), 256 }
   0xa   : > { %v3466_v15 = vld [vmem:[%s4154_s1 + $0x130] sm:$0xff] (!%p216_p2)   ;;  %v3468_v17 = vld [vmem:[%s4154_s1 + $0x138] sm:$0xff] (!%p216_p2)   ;;  %v3472_v19 = vld [vmem:[%s4154_s1 + $0x140] sm:$0xff] (!%p216_p2)  }
   0xb   : > { %3141 = vmatpush3.bf16.msra.mxu1 (!%p216_p2), %v3455_v2  ;;  %v3475_v22 = vld [vmem:[%s4154_s1 + $0x8] sm:$0xff] (!%p216_p2)   ;;  %v3477_v26 = vld [vmem:[%s4154_s1 + $0x10] sm:$0xff] (!%p216_p2)   ;;  %v3479_v28 = vld [vmem:[%s4154_s1 + $0x18] sm:$0xff] (!%p216_p2)  }
   0xc   : > { %3237 = vmatpush3.bf16.msra.mxu0 (!%p216_p2), %v3456_v3  ;;  %3142 = vmatprep.subr.bf16.mxu1 (!%p216_p2), %v3457_v4  ;;  %v3476_v23 = vld [vmem:[%s4154_s1 + $0x148] sm:$0xff] (!%p216_p2)   ;;  %v3478_v27 = vld [vmem:[%s4154_s1 + $0x150] sm:$0xff] (!%p216_p2)   ;;  %v3480_v31 = vld [vmem:[%s4154_s1 + $0x158] sm:$0xff] (!%p216_p2)  }
   0xd   : > { %s4167_s22 = smov (!%p250_p3, %s2605_s22), 1  ;;  %3238 = vmatprep.subr.bf16.mxu0 %v3458_v5  ;;  %v3481_v38 = vld [vmem:[%s4154_s1 + $0x20] sm:$0xff]   ;;  %v3483_v47 = vld [vmem:[%s4154_s1 + $0x28] sm:$0xff]   ;;  %vm3720_vm2 = vmor %vm606_vm0, %vm607_vm1 }
   0xe   : > { %s3442_s15 = smul.u32 320, %s4167_s22  ;;  %v3482_v43 = vld [vmem:[%s4154_s1 + $0x160] sm:$0xff]   ;;  %v3484_v50 = vld [vmem:[%s4154_s1 + $0x168] sm:$0xff]   ;;  %v3486_v2 = vld [vmem:[%s4154_s1 + $0x30] sm:$0xff]   ;;  %s2986_s25 = sshll.u32 %s4167_s22, 5 }
   0xf   : > { %3143 = vmatpush3.bf16.msra.mxu1 %v3457_v4  ;;  %s4046_s28 = scalar_lea.vmem %s4159_s6, %s2986_s25  ;;  %vm4063_vm7 = vmand %vm2279_vm3, %vm2280_vm4 }
  0x10   : > { %3239 = vmatpush3.bf16.msra.mxu0 %v3458_v5  ;;  %3144 = vmatprep.subr.bf16.mxu1 %v3459_v6  ;;  %s3649_s24 = scalar_lea.vmem %s4153_s0, %s3442_s15  ;;  %s3443_s15 = smul.u32 80, %s4167_s22  ;;  %vm4071_vm8 = vmand %vm2285_vm5, %vm2286_vm6 }
  0x11   : > { %3240 = vmatprep.subr.bf16.mxu0 %v3460_v7  ;;  %v3469_v11 = vld [vmem:[%s3649_s24 + $0x50] ss:$8 sps:$4 sm:$0xff]   ;;  %v3473_v20 = vld [vmem:[%s3649_s24 + $0x60] ss:$8 sps:$4 sm:$0xff]   ;;  %v2763_v34 = vld [vmem:[%s3649_s24 + $0xa4] sm:$0x1] }
  0x12   : > { %3154 = vmatprep.mubr.bf16.mxu1 %v3469_v11  ;;  %v3471_v13 = vld [vmem:[%s3649_s24 + $0xf0] ss:$8 sps:$4 sm:$0xff]   ;;  %v3474_v21 = vld [vmem:[%s3649_s24 + $0x100] ss:$8 sps:$4 sm:$0xff]   ;;  %v2765_v39 = vld [vmem:[%s3649_s24 + $0xac] sm:$0x1]  ;;  %s4001_s18 = scalar_lea.vmem %s4158_s5, %s3443_s15 }
  0x13   : > { %3145 = vmatpush3.bf16.msra.mxu1 %v3459_v6  ;;  %3250 = vmatprep.mubr.bf16.mxu0 %v3471_v13  ;;  %v3485_v24 = vld [vmem:[%s3649_s24 + $0x70] ss:$8 sps:$4 sm:$0xff]   ;;  %v3489_v29 = vld [vmem:[%s3649_s24 + $0x80] ss:$8 sps:$4 sm:$0xff]   ;;  %v1243_v40 = vshll.u32 %v2763_v34, 16  ;;  %v1257_v46 = vshll.u32 %v2765_v39, 16 }
  0x14   : > { %3241 = vmatpush3.bf16.msra.mxu0 %v3460_v7  ;;  %3146 = vmatprep.subr.bf16.mxu1 %v3461_v8  ;;  %v3487_v25 = vld [vmem:[%s3649_s24 + $0x110] ss:$8 sps:$4 sm:$0xff]   ;;  %v3490_v30 = vld [vmem:[%s3649_s24 + $0x120] ss:$8 sps:$4 sm:$0xff]   ;;  %v2767_v57 = vld [vmem:[%s3649_s24 + $0xb4] sm:$0x1] }
  0x15   : > { %3242 = vmatprep.subr.bf16.mxu0 %v3462_v9  ;;  %v3493_v32 = vld [vmem:[%s3649_s24] ss:$8 sps:$4 sm:$0xff]   ;;  %v1245_v52 = vrot.slane %v1243_v40, 5  ;;  %v1259_v55 = vrot.slane %v1257_v46, 5  ;;  %v2766_v56 = vld [vmem:[%s3649_s24 + $0xb0] sm:$0xf] }
  0x16   : > { %v2762_v33 = vld [vmem:[%s3649_s24 + $0xa0] sm:$0xf]  ;;  %v2764_v35 = vld [vmem:[%s3649_s24 + $0xa8] sm:$0xf]  ;;  %v2768_v59 = vld [vmem:[%s3649_s24 + $0xb8] sm:$0xf] }
  0x17   : > { %3147 = vmatpush3.bf16.msra.mxu1 %v3461_v8  ;;  %v1234_v36 = vshrl.u32 %v2762_v33, 16  ;;  %v1237_v37 = vshll.u32 %v2762_v33, 16  ;;  %v1248_v41 = vshrl.u32 %v2764_v35, 16  ;;  %v1251_v42 = vshll.u32 %v2764_v35, 16  ;;  %v2769_v60 = vld [vmem:[%s3649_s24 + $0xbc] sm:$0x1] }
  0x18   : > { %3243 = vmatpush3.bf16.msra.mxu0 %v3462_v9  ;;  %3148 = vmatprep.subr.bf16.mxu1 %v3463_v10  ;;  %v1262_v61 = vshrl.u32 %v2766_v56, 16  ;;  %v1265_v63 = vshll.u32 %v2766_v56, 16  ;;  %v1271_v0 = vshll.u32 %v2767_v57, 16  ;;  %v1276_v1 = vshrl.u32 %v2768_v59, 16  ;;  %v3488_v6 = vld [vmem:[%s4154_s1 + $0x170] sm:$0xff]   ;;  %2146 = vst [vmem:[%s4001_s18] sm:$0xf] %v3569_v53 }
  0x19   : > { %3244 = vmatprep.subr.bf16.mxu0 %v3464_v12  ;;  %v1236_v44 = vrot.slane %v1234_v36, 4  ;;  %v1239_v45 = vrot.slane %v1237_v37, 5  ;;  %v1250_v48 = vrot.slane %v1248_v41, 4  ;;  %v1253_v49 = vrot.slane %v1251_v42, 5  ;;  %v3507_v37 = vld [vmem:[%s3649_s24 + $0x20] ss:$8 sps:$4 sm:$0xff]  }
  0x1a   : > { %v1264_v4 = vrot.slane %v1262_v61, 4  ;;  %v1279_v5 = vshll.u32 %v2768_v59, 16  ;;  %v1267_v8 = vrot.slane %v1265_v63, 5  ;;  %v1278_v9 = vrot.slane %v1276_v1, 4  ;;  %v3501_v59 = vld [vmem:[%s4154_s1 + $0x98] sm:$0xff]  }
  0x1b   : > { %3149 = vmatpush3.bf16.msra.mxu1 %v3463_v10  ;;  %v1240_v51 = vor.u32 %v1239_v45, %v1236_v44  ;;  %v1254_v54 = vor.u32 %v1253_v49, %v1250_v48  ;;  %v1285_v10 = vshll.u32 %v2769_v60, 16  ;;  %v3510_v48 = vld [vmem:[%s3649_s24 + $0x30] ss:$8 sps:$4 sm:$0xff]   ;;  %2152 = vst [vmem:[%s4001_s18 + $0x18] sm:$0xf] %v3569_v53 }
  0x1c   : > { %3245 = vmatpush3.bf16.msra.mxu0 %v3464_v12  ;;  %3150 = vmatprep.subr.bf16.mxu1 %v3465_v14  ;;  %v1273_v12 = vrot.slane %v1271_v0, 5  ;;  %v1281_v13 = vrot.slane %v1279_v5, 5  ;;  %v2774_v49 = vld [vmem:[%s3649_s24 + $0xd0] sm:$0xf]  ;;  %2153 = vst [vmem:[%s4001_s18 + $0x1c] sm:$0xf] %v3569_v53 }
  0x1d   : > { %3246 = vmatprep.subr.bf16.mxu0 %v3466_v15  ;;  %v1241_v58 = vrot.slane %v1240_v51, 4  ;;  %v1255_v62 = vrot.slane %v1254_v54, 4  ;;  %v2776_v51 = vld [vmem:[%s3649_s24 + $0xd8] sm:$0xf]  ;;  %v1318_v56 = vshrl.u32 %v2774_v49, 16  ;;  %v1321_v57 = vshll.u32 %v2774_v49, 16 }
  0x1e   : > { %v1332_v61 = vshrl.u32 %v2776_v51, 16  ;;  %2147 = vst [vmem:[%s4001_s18 + $0x4] sm:$0xf] %v3569_v53  ;;  %2148 = vst [vmem:[%s4001_s18 + $0x8] sm:$0xf] %v3569_v53 }
  0x1f   : > { %3151 = vmatpush3.bf16.msra.mxu1 %v3465_v14  ;;  %v1246_v3 = vsel %vm3720_vm2, %v1241_v58, %v1245_v52  ;;  %v1260_v7 = vsel %vm3720_vm2, %v1255_v62, %v1259_v55  ;;  %v3491_v14 = vld [vmem:[%s4154_s1 + $0x38] sm:$0xff]   ;;  %v3500_v52 = vld [vmem:[%s4154_s1 + $0x190] sm:$0xff]   ;;  %v1335_v62 = vshll.u32 %v2776_v51, 16  ;;  %v1320_v1 = vrot.slane %v1318_v56, 4  ;;  %2149 = vst [vmem:[%s4001_s18 + $0xc] sm:$0xf] %v3569_v53 }
  0x20   : > { %3247 = vmatpush3.bf16.msra.mxu0 %v3466_v15  ;;  %3152 = vmatprep.subr.bf16.mxu1 %v3467_v16  ;;  %v2794_v11 = vcombine.low %v1246_v3, %v1260_v7  ;;  %v1268_v15 = vor.u32 %v1267_v8, %v1264_v4  ;;  %v2777_v55 = vld [vmem:[%s3649_s24 + $0xdc] sm:$0x1]  ;;  %2150 = vst [vmem:[%s4001_s18 + $0x10] sm:$0xf] %v3569_v53  ;;  %2151 = vst [vmem:[%s4001_s18 + $0x14] sm:$0xf] %v3569_v53 }
  0x21   : > { %3248 = vmatprep.subr.bf16.mxu0 %v3468_v17  ;;  %v1341_v63 = vshll.u32 %v2777_v55, 16  ;;  %v3502_v4 = vld [vmem:[%s4154_s1 + $0x198] sm:$0xff]   ;;  %v1337_v7 = vrot.slane %v1335_v62, 5  ;;  %2154 = vst [vmem:[%s4001_s18 + $0x20] sm:$0xf] %v3569_v53 }
  0x22   : > { %2155 = vst [vmem:[%s4001_s18 + $0x24] sm:$0xf] %v3569_v53  ;;  %2156 = vst [vmem:[%s4001_s18 + $0x28] sm:$0xf] %v3569_v53 }
  0x23   : > { %3153 = vmatpush3.bf16.msra.mxu1 %v3467_v16  ;;  %v1282_v16 = vor.u32 %v1281_v13, %v1278_v9  ;;  %v1343_v8 = vrot.slane %v1341_v63, 5  ;;  %v3503_v13 = vld [vmem:[%s4154_s1 + $0xa0] sm:$0xff]   ;;  %2157 = vst [vmem:[%s4001_s18 + $0x2c] sm:$0xf] %v3569_v53  ;;  %2158 = vst [vmem:[%s4001_s18 + $0x30] sm:$0xf] %v3569_v53 }
  0x24   : > { %3249 = vmatpush3.bf16.msra.mxu0 %v3468_v17  ;;  %3162 = vmatprep.subr.bf16.mxu1 %v3470_v18  ;;  %v1269_v17 = vrot.slane %v1268_v15, 4  ;;  %2159 = vst [vmem:[%s4001_s18 + $0x34] sm:$0xf] %v3569_v53  ;;  %2160 = vst [vmem:[%s4001_s18 + $0x38] sm:$0xf] %v3569_v53 }
  0x25   : > { %3258 = vmatprep.subr.bf16.mxu0 %v3472_v19  ;;  %2161 = vst [vmem:[%s4001_s18 + $0x3c] sm:$0xf] %v3569_v53  ;;  %2162 = vst [vmem:[%s4001_s18 + $0x40] sm:$0xf] %v3569_v53 }
  0x26   : > { %3155 = vmatmul.mubr.bf16.vlgmr.msra.gmra.mrb[0].mxu1 %v3473_v20  ;;  %v1283_v20 = vrot.slane %v1282_v16, 4  ;;  %v592_v16 = vld [vmem:[%s3649_s24 + $0x8] sm:$0xf]  ;;  %2163 = vst [vmem:[%s4001_s18 + $0x44] sm:$0xf] %v3569_v53 }
  0x27   : > { %3163 = vmatpush3.bf16.msra.mxu1 %v3470_v18  ;;  %3251 = vmatmul.mubr.bf16.vlgmr.msra.gmra.mrb[0].mxu0 %v3474_v21  ;;  %v1287_v18 = vrot.slane %v1285_v10, 5  ;;  %v3494_v21 = vld [vmem:[%s4154_s1 + $0x80] sm:$0xff]   ;;  %2164 = vst [vmem:[%s4001_s18 + $0x48] sm:$0xf] %v3569_v53  ;;  %2165 = vst [vmem:[%s4001_s18 + $0x4c] sm:$0xf] %v3569_v53 }
  0x28   : > { %3259 = vmatpush3.bf16.msra.mxu0 %v3472_v19  ;;  %3164 = vmatprep.subr.bf16.mxu1 %v3475_v22  ;;  %v3492_v19 = vld [vmem:[%s4154_s1 + $0x178] sm:$0xff]  }
  0x29   : > { %3260 = vmatprep.subr.bf16.mxu0 %v3476_v23  ;;  %3158 = vmatprep.mubr.bf16.mxu1 %v3485_v24  ;;  %v3495_v24 = vld [vmem:[%s4154_s1 + $0x180] sm:$0xff]  }
  0x2a   : > { %3254 = vmatprep.mubr.bf16.mxu0 %v3487_v25  ;;  %v3496_v25 = vld [vmem:[%s3649_s24 + $0x10] ss:$8 sps:$4 sm:$0xff]  }
  0x2b   : > { %3165 = vmatpush3.bf16.msra.mxu1 %v3475_v22  ;;  %v1274_v22 = vsel %vm3720_vm2, %v1269_v17, %v1273_v12  ;;  %v591_v12 = vld [vmem:[%s3649_s24 + $0x4] sm:$0x1]  ;;  %v593_v17 = vld [vmem:[%s3649_s24 + $0xc] sm:$0x1] }
  0x2c   : > { %3261 = vmatpush3.bf16.msra.mxu0 %v3476_v23  ;;  %3166 = vmatprep.subr.bf16.mxu1 %v3477_v26  ;;  %v1288_v23 = vsel %vm3720_vm2, %v1283_v20, %v1287_v18 }
  0x2d   : > { %3262 = vmatprep.subr.bf16.mxu0 %v3478_v27 }
  0x2e   : > { %3159 = vmatmul.mubr.bf16.gmra.mrb[4].mxu1 %v3489_v29  ;;  %v3498_v29 = vld [vmem:[%s4154_s1 + $0x188] sm:$0xff]  }
  0x2f   : > { %3167 = vmatpush3.bf16.msra.mxu1 %v3477_v26  ;;  %3255 = vmatmul.mubr.bf16.gmra.mrb[4].mxu0 %v3490_v30  ;;  %v3497_v26 = vld [vmem:[%s4154_s1 + $0x88] sm:$0xff]   ;;  %v2771_v30 = vld [vmem:[%s3649_s24 + $0xc4] sm:$0x1] }
  0x30   : > { %3263 = vmatpush3.bf16.msra.mxu0 %v3478_v27  ;;  %3168 = vmatprep.subr.bf16.mxu1 %v3479_v28  ;;  %v2770_v27 = vld [vmem:[%s3649_s24 + $0xc0] sm:$0xf]  ;;  %v1299_v35 = vshll.u32 %v2771_v30, 16 }
  0x31   : > { %3264 = vmatprep.subr.bf16.mxu0 %v3480_v31  ;;  %3178 = vmatprep.mubr.bf16.mxu1 %v3493_v32  ;;  %v2773_v32 = vld [vmem:[%s3649_s24 + $0xcc] sm:$0x1]  ;;  %v1290_v33 = vshrl.u32 %v2770_v27, 16  ;;  %v1293_v34 = vshll.u32 %v2770_v27, 16  ;;  %v633_v27 = vshll.u32 %v593_v17, 16 }
  0x32   : > { %3274 = vmatprep.mubr.bf16.mxu0 %v2794_v11  ;;  %v1313_v39 = vshll.u32 %v2773_v32, 16  ;;  %v1301_v44 = vrot.slane %v1299_v35, 5  ;;  %v590_v11 = vld [vmem:[%s3649_s24] sm:$0xf]  ;;  %v3505_v32 = vld [vmem:[%s4154_s1 + $0xa8] sm:$0xff]  }
  0x33   : > { %3169 = vmatpush3.bf16.msra.mxu1 %v3479_v28  ;;  %v2795_v28 = vcombine.low %v1274_v22, %v1288_v23  ;;  %v1292_v40 = vrot.slane %v1290_v33, 4  ;;  %v1295_v41 = vrot.slane %v1293_v34, 5  ;;  %v610_v18 = vshrl.u32 %v590_v11, 16  ;;  %v601_v17 = vld [vmem:[%s3649_s24 + $0x2c] sm:$0x1] }
  0x34   : > { %3265 = vmatpush3.bf16.msra.mxu0 %v3480_v31  ;;  %3170 = vmatprep.subr.bf16.mxu1 %v3481_v38  ;;  %v2772_v31 = vld [vmem:[%s3649_s24 + $0xc8] sm:$0xf]  ;;  %v1315_v46 = vrot.slane %v1313_v39, 5  ;;  %v624_v22 = vshrl.u32 %v592_v16, 16  ;;  %v627_v23 = vshll.u32 %v592_v16, 16 }
  0x35   : > { %3266 = vmatprep.subr.bf16.mxu0 %v3482_v43  ;;  %v1304_v36 = vshrl.u32 %v2772_v31, 16  ;;  %v600_v16 = vld [vmem:[%s3649_s24 + $0x28] sm:$0xf] }
  0x36   : > { %v626_v30 = vrot.slane %v624_v22, 4  ;;  %v680_v22 = vshrl.u32 %v600_v16, 16 }
  0x37   : > { %3171 = vmatpush3.bf16.msra.mxu1 %v3481_v38  ;;  %v1307_v38 = vshll.u32 %v2772_v31, 16  ;;  %v1306_v42 = vrot.slane %v1304_v36, 4  ;;  %v629_v31 = vrot.slane %v627_v23, 5  ;;  %v635_v36 = vrot.slane %v633_v27, 5  ;;  %v602_v23 = vld [vmem:[%s3649_s24 + $0x30] sm:$0xf] }
  0x38   : > { %3267 = vmatpush3.bf16.msra.mxu0 %v3482_v43  ;;  %3172 = vmatprep.subr.bf16.mxu1 %v3483_v47  ;;  %v3499_v43 = vld [vmem:[%s4154_s1 + $0x90] sm:$0xff]   ;;  %v604_v27 = vld [vmem:[%s3649_s24 + $0x38] sm:$0xf] }
  0x39   : > { %3268 = vmatprep.subr.bf16.mxu0 %v3484_v50  ;;  %v1309_v45 = vrot.slane %v1307_v38, 5  ;;  %v3506_v38 = vld [vmem:[%s4154_s1 + $0x1a8] sm:$0xff]  }
  0x3b   : > { %3173 = vmatpush3.bf16.msra.mxu1 %v3483_v47  ;;  %v1296_v47 = vor.u32 %v1295_v41, %v1292_v40  ;;  %v1310_v54 = vor.u32 %v1309_v45, %v1306_v42  ;;  %v630_v40 = vor.u32 %v629_v31, %v626_v30  ;;  %v594_v41 = vld [vmem:[%s3649_s24 + $0x10] sm:$0xf]  ;;  %v682_v31 = vrot.slane %v680_v22, 4  ;;  %v2879_v22 = vld [vmem:[%s3649_s24 + $0xc] sm:$0x1] }
  0x3c   : > { %3269 = vmatpush3.bf16.msra.mxu0 %v3484_v50  ;;  %3174 = vmatprep.subr.bf16.mxu1 %v3486_v2  ;;  %v2775_v50 = vld [vmem:[%s3649_s24 + $0xd4] sm:$0x1]  ;;  %v638_v45 = vshrl.u32 %v594_v41, 16 }
  0x3d   : > { %3270 = vmatprep.subr.bf16.mxu0 %v3488_v6  ;;  %v1327_v58 = vshll.u32 %v2775_v50, 16  ;;  %v1297_v60 = vrot.slane %v1296_v47, 4  ;;  %v1311_v0 = vrot.slane %v1310_v54, 4  ;;  %v597_v47 = vld [vmem:[%s3649_s24 + $0x1c] sm:$0x1] }
  0x3f   : > { %3175 = vmatpush3.bf16.msra.mxu1 %v3486_v2  ;;  %v1323_v2 = vrot.slane %v1321_v57, 5  ;;  %v1329_v3 = vrot.slane %v1327_v58, 5  ;;  %v1302_v5 = vsel %vm3720_vm2, %v1297_v60, %v1301_v44  ;;  %v1316_v9 = vsel %vm3720_vm2, %v1311_v0, %v1315_v46  ;;  %v596_v44 = vld [vmem:[%s3649_s24 + $0x18] sm:$0xf]  ;;  %v3509_v60 = vld [vmem:[%s4154_s1 + $0x1b0] sm:$0xff]  }
  0x40   : > { %3271 = vmatpush3.bf16.msra.mxu0 %v3488_v6  ;;  %3176 = vmatprep.subr.bf16.mxu1 %v3491_v14  ;;  %v1334_v6 = vrot.slane %v1332_v61, 4  ;;  %v631_v46 = vrot.slane %v630_v40, 4  ;;  %v652_v50 = vshrl.u32 %v596_v44, 16  ;;  %v655_v54 = vshll.u32 %v596_v44, 16 }
  0x41   : > { %3272 = vmatprep.subr.bf16.mxu0 %v3492_v19  ;;  %v1324_v10 = vor.u32 %v1323_v2, %v1320_v1  ;;  %v661_v58 = vshll.u32 %v597_v47, 16  ;;  %v708_v40 = vshrl.u32 %v604_v27, 16 }
  0x42   : > { %v1338_v15 = vor.u32 %v1337_v7, %v1334_v6  ;;  %v636_v55 = vsel %vm3720_vm2, %v631_v46, %v635_v36  ;;  %v654_v57 = vrot.slane %v652_v50, 4  ;;  %v657_v63 = vrot.slane %v655_v54, 5  ;;  %v3512_v6 = vld [vmem:[%s4154_s1 + $0x1b8] sm:$0xff]   ;;  %v3513_v7 = vld [vmem:[%s4154_s1 + $0xc0] sm:$0xff]  }
  0x43   : > { %3177 = vmatpush3.bf16.msra.mxu1 %v3491_v14  ;;  %v2796_v14 = vcombine.low %v1302_v5, %v1316_v9  ;;  %v1325_v20 = vrot.slane %v1324_v10, 4  ;;  %v3515_v10 = vld [vmem:[%s4154_s1 + $0x1c0] sm:$0xff]   ;;  %v697_v36 = vshll.u32 %v602_v23, 16 }
  0x44   : > { %3273 = vmatpush3.bf16.msra.mxu0 %v3492_v19  ;;  %3186 = vmatprep.subr.bf16.mxu1 %v3494_v21  ;;  %v613_v19 = vshll.u32 %v590_v11, 16  ;;  %v658_v1 = vor.u32 %v657_v63, %v654_v57  ;;  %v3516_v11 = vld [vmem:[%s3649_s24 + $0x18] ss:$8 sps:$4 sm:$0xff]  }
  0x45   : > { %3282 = vmatprep.subr.bf16.mxu0 %v3495_v24 }
  0x46   : > { %3179 = vmatmul.mubr.bf16.vlgmr.msra.gmra.mrb[0].mxu1 %v3496_v25  ;;  %v612_v25 = vrot.slane %v610_v18, 4  ;;  %v659_v5 = vrot.slane %v658_v1, 4  ;;  %v3518_v18 = vld [vmem:[%s4154_s1 + $0x1c8] sm:$0xff]   ;;  %v3523_v1 = vld [vmem:[%s4154_s1 + $0xe0] sm:$0xff]  }
  0x47   : > { %3187 = vmatpush3.bf16.msra.mxu1 %v3494_v21  ;;  %3275 = vmatmul.mubr.bf16.vlgmr.msra.gmra.mrb[0].mxu0 %v2795_v28  ;;  %v619_v21 = vshll.u32 %v591_v12, 16  ;;  %v3504_v28 = vld [vmem:[%s4154_s1 + $0x1a0] sm:$0xff]  }
  0x48   : > { %3283 = vmatpush3.bf16.msra.mxu0 %v3495_v24  ;;  %3188 = vmatprep.subr.bf16.mxu1 %v3497_v26  ;;  %v1339_v24 = vrot.slane %v1338_v15, 4  ;;  %v598_v12 = vld [vmem:[%s3649_s24 + $0x20] sm:$0xf]  ;;  %v599_v15 = vld [vmem:[%s3649_s24 + $0x24] sm:$0x1] }
  0x49   : > { %3284 = vmatprep.subr.bf16.mxu0 %v3498_v29  ;;  %3182 = vmatprep.mubr.bf16.mxu1 %v3507_v37  ;;  %v621_v35 = vrot.slane %v619_v21, 5  ;;  %v3514_v37 = vld [vmem:[%s3649_s24 + $0x8] ss:$8 sps:$4 sm:$0xff]   ;;  %v675_v21 = vshll.u32 %v599_v15, 16  ;;  %v3542_v15 = vld [vmem:[%s4156_s3] sm:$0xff]  }
  0x4a   : > { %3278 = vmatprep.mubr.bf16.mxu0 %v2796_v14  ;;  %v1344_v33 = vsel %vm3720_vm2, %v1339_v24, %v1343_v8  ;;  %v3517_v14 = vld [vmem:[%s4154_s1 + $0xc8] sm:$0xff]   ;;  %v683_v24 = vshll.u32 %v600_v16, 16  ;;  %v3536_v16 = vld [vmem:[%s4154_s1 + $0x200] sm:$0xff]  }
  0x4b   : > { %3189 = vmatpush3.bf16.msra.mxu1 %v3497_v26  ;;  %v615_v26 = vrot.slane %v613_v19, 5  ;;  %v666_v19 = vshrl.u32 %v598_v12, 16  ;;  %v677_v30 = vrot.slane %v675_v21, 5  ;;  %v2878_v21 = vld [vmem:[%s3649_s24 + $0x8] sm:$0xf] }
  0x4c   : > { %3285 = vmatpush3.bf16.msra.mxu0 %v3498_v29  ;;  %3190 = vmatprep.subr.bf16.mxu1 %v3499_v43  ;;  %v1330_v29 = vsel %vm3720_vm2, %v1325_v20, %v1329_v3  ;;  %v663_v3 = vrot.slane %v661_v58, 5  ;;  %v669_v20 = vshll.u32 %v598_v12, 16  ;;  %v3521_v58 = vld [vmem:[%s4154_s1 + $0xd8] sm:$0xff]  }
  0x4d   : > { %3286 = vmatprep.subr.bf16.mxu0 %v3500_v52  ;;  %v616_v34 = vor.u32 %v615_v26, %v612_v25  ;;  %v2797_v39 = vcombine.low %v1330_v29, %v1344_v33  ;;  %v689_v25 = vshll.u32 %v601_v17, 16  ;;  %v603_v26 = vld [vmem:[%s3649_s24 + $0x34] sm:$0x1]  ;;  %v685_v33 = vrot.slane %v683_v24, 5  ;;  %v3531_v12 = vld [vmem:[%s4154_s1 + $0xf8] sm:$0xff]  }
  0x4e   : > { %3183 = vmatmul.mubr.bf16.gmra.mrb[4].mxu1 %v3510_v48  ;;  %v641_v48 = vshll.u32 %v594_v41, 16  ;;  %v664_v9 = vsel %vm3720_vm2, %v659_v5, %v663_v3  ;;  %v671_v29 = vrot.slane %v669_v20, 5  ;;  %v711_v41 = vshll.u32 %v604_v27, 16  ;;  %v3524_v5 = vld [vmem:[%s4154_s1 + $0x1e0] sm:$0xff]   ;;  %v3537_v17 = vld [vmem:[%s3649_s24 + $0x68] ss:$8 sps:$4 sm:$0xff]  }
  0x4f   : > { %3191 = vmatpush3.bf16.msra.mxu1 %v3499_v43  ;;  %v617_v42 = vrot.slane %v616_v34, 4  ;;  %v595_v43 = vld [vmem:[%s3649_s24 + $0x14] sm:$0x1]  ;;  %3279 = vmatmul.mubr.bf16.gmra.mrb[4].mxu0 %v2797_v39  ;;  %v691_v34 = vrot.slane %v689_v25, 5  ;;  %v703_v39 = vshll.u32 %v603_v26, 16  ;;  %v3544_v20 = vld [vmem:[%s4156_s3 + $0x8] sm:$0xff]  }
  0x50   : > { %3287 = vmatpush3.bf16.msra.mxu0 %v3500_v52  ;;  %3192 = vmatprep.subr.bf16.mxu1 %v3501_v59  ;;  %v647_v49 = vshll.u32 %v595_v43, 16  ;;  %v640_v52 = vrot.slane %v638_v45, 4  ;;  %v643_v56 = vrot.slane %v641_v48, 5  ;;  %v686_v43 = vor.u32 %v685_v33, %v682_v31  ;;  %v2881_v24 = vld [vmem:[%s3649_s24 + $0x14] sm:$0x1] }
  0x51   : > { %3288 = vmatprep.subr.bf16.mxu0 %v3502_v4  ;;  %v622_v51 = vsel %vm3720_vm2, %v617_v42, %v621_v35  ;;  %3298 = vmatprep.mubr.bf16.mxu0 %v3514_v37  ;;  %v694_v35 = vshrl.u32 %v602_v23, 16  ;;  %v3519_v37 = vld [vmem:[%s4154_s1 + $0xd0] sm:$0xff]   ;;  %v699_v45 = vrot.slane %v697_v36, 5  ;;  %v705_v48 = vrot.slane %v703_v39, 5  ;;  %v3549_v27 = vld [vmem:[%s3649_s24 + $0x78] ss:$8 sps:$4 sm:$0xff]  }
  0x52   : > { %v2678_v61 = vcombine.low %v622_v51, %v636_v55  ;;  %v649_v62 = vrot.slane %v647_v49, 5  ;;  %v644_v0 = vor.u32 %v643_v56, %v640_v52  ;;  %v3520_v42 = vld [vmem:[%s4154_s1 + $0x1d0] sm:$0xff]   ;;  %v710_v49 = vrot.slane %v708_v40, 4 }
  0x53   : > { %3193 = vmatpush3.bf16.msra.mxu1 %v3501_v59  ;;  %v3508_v59 = vld [vmem:[%s4154_s1 + $0xb0] sm:$0xff]   ;;  %v696_v44 = vrot.slane %v694_v35, 4  ;;  %v713_v50 = vrot.slane %v711_v41, 5  ;;  %v687_v51 = vrot.slane %v686_v43, 4  ;;  %v1858_v25 = vshrl.u32 %v2878_v21, 16 }
  0x54   : > { %3289 = vmatpush3.bf16.msra.mxu0 %v3502_v4  ;;  %3194 = vmatprep.subr.bf16.mxu1 %v3503_v13  ;;  %v645_v2 = vrot.slane %v644_v0, 4  ;;  %v3511_v4 = vld [vmem:[%s4154_s1 + $0xb8] sm:$0xff]   ;;  %v3528_v55 = vld [vmem:[%s3649_s24 + $0x28] ss:$8 sps:$4 sm:$0xff]   ;;  %v1861_v26 = vshll.u32 %v2878_v21, 16  ;;  %v1881_v31 = vshll.u32 %v2881_v24, 16 }
  0x55   : > { %3290 = vmatprep.subr.bf16.mxu0 %v3504_v28  ;;  %3202 = vmatprep.mubr.bf16.mxu1 %v2678_v61  ;;  %v700_v52 = vor.u32 %v699_v45, %v696_v44  ;;  %v714_v57 = vor.u32 %v713_v50, %v710_v49  ;;  %v3530_v61 = vld [vmem:[%s3649_s24 + $0x38] ss:$8 sps:$4 sm:$0xff]   ;;  %v2880_v23 = vld [vmem:[%s3649_s24 + $0x10] sm:$0xf] }
  0x56   : > { %v650_v8 = vsel %vm3720_vm2, %v645_v2, %v649_v62  ;;  %v3522_v62 = vld [vmem:[%s4154_s1 + $0x1d8] sm:$0xff]   ;;  %v1863_v33 = vrot.slane %v1861_v26, 5  ;;  %v3550_v41 = vld [vmem:[%s3649_s24 + $0x88] ss:$8 sps:$4 sm:$0xff]   ;;  %v1883_v43 = vrot.slane %v1881_v31, 5 }
  0x57   : > { %3195 = vmatpush3.bf16.msra.mxu1 %v3503_v13  ;;  %v2679_v13 = vcombine.low %v650_v8, %v664_v9  ;;  %v715_v0 = vrot.slane %v714_v57, 4  ;;  %v3525_v8 = vld [vmem:[%s4154_s1 + $0xe8] sm:$0xff]   ;;  %v3543_v44 = vld [vmem:[%s4154_s1 + $0x218] sm:$0xff]   ;;  %v2884_v49 = vld [vmem:[%s3649_s24 + $0x20] sm:$0xf] }
  0x58   : > { %3291 = vmatpush3.bf16.msra.mxu0 %v3504_v28  ;;  %3196 = vmatprep.subr.bf16.mxu1 %v3505_v32  ;;  %v668_v28 = vrot.slane %v666_v19, 4  ;;  %v3526_v9 = vld [vmem:[%s4154_s1 + $0x1e8] sm:$0xff]   ;;  %v2888_v57 = vld [vmem:[%s3649_s24 + $0x30] sm:$0xf] }
  0x59   : > { %3292 = vmatprep.subr.bf16.mxu0 %v3506_v38  ;;  %v3539_v19 = vld [vmem:[%s3649_s24 + $0xc0] ss:$8 sps:$4 sm:$0xff]  }
  0x5b   : > { %3197 = vmatpush3.bf16.msra.mxu1 %v3505_v32  ;;  %v605_v32 = vld [vmem:[%s3649_s24 + $0x3c] sm:$0x1] }
  0x5c   : > { %3293 = vmatpush3.bf16.msra.mxu0 %v3506_v38  ;;  %3198 = vmatprep.subr.bf16.mxu1 %v3508_v59  ;;  %v672_v38 = vor.u32 %v671_v29, %v668_v28  ;;  %v717_v46 = vshll.u32 %v605_v32, 16  ;;  %v1867_v28 = vshll.u32 %v2879_v22, 16  ;;  %v1872_v29 = vshrl.u32 %v2880_v23, 16 }
  0x5d   : > { %3294 = vmatprep.subr.bf16.mxu0 %v3509_v60  ;;  %v1860_v32 = vrot.slane %v1858_v25, 4 }
  0x5e   : > { %v673_v47 = vrot.slane %v672_v38, 4  ;;  %v719_v54 = vrot.slane %v717_v46, 5  ;;  %v1874_v35 = vrot.slane %v1872_v29, 4  ;;  %v3546_v38 = vld [vmem:[%s4156_s3 + $0x10] sm:$0xff]   ;;  %v1869_v40 = vrot.slane %v1867_v28, 5 }
  0x5f   : > { %3199 = vmatpush3.bf16.msra.mxu1 %v3508_v59  ;;  %v692_v59 = vsel %vm3720_vm2, %v687_v51, %v691_v34  ;;  %v3540_v34 = vld [vmem:[%s3649_s24 + $0xd0] ss:$8 sps:$4 sm:$0xff]   ;;  %v1864_v39 = vor.u32 %v1863_v33, %v1860_v32  ;;  %v3940_v51 = vld [vmem:[%s3649_s24 + $0x1c] sm:$0x1] }
  0x60   : > { %3295 = vmatpush3.bf16.msra.mxu0 %v3509_v60  ;;  %3200 = vmatprep.subr.bf16.mxu1 %v3511_v4  ;;  %v678_v56 = vsel %vm3720_vm2, %v673_v47, %v677_v30  ;;  %v701_v60 = vrot.slane %v700_v52, 4  ;;  %v720_v3 = vsel %vm3720_vm2, %v715_v0, %v719_v54  ;;  %v1875_v30 = vshll.u32 %v2880_v23, 16  ;;  %v2882_v46 = vld [vmem:[%s3649_s24 + $0x18] sm:$0xf]  ;;  %v3943_v52 = vld [vmem:[%s3649_s24 + $0x24] sm:$0x1] }
  0x61   : > { %3296 = vmatprep.subr.bf16.mxu0 %v3512_v6  ;;  %v2680_v63 = vcombine.low %v678_v56, %v692_v59  ;;  %v1865_v45 = vrot.slane %v1864_v39, 4  ;;  %v3548_v47 = vld [vmem:[%s4156_s3 + $0x18] sm:$0xff]   ;;  %v2886_v54 = vld [vmem:[%s3649_s24 + $0x28] sm:$0xf]  ;;  %v1886_v56 = vshrl.u32 %v2882_v46, 16  ;;  %v1889_v59 = vshll.u32 %v2882_v46, 16 }
  0x62   : > { %v706_v2 = vsel %vm3720_vm2, %v701_v60, %v705_v48  ;;  %v1877_v36 = vrot.slane %v1875_v30, 5  ;;  %v1900_v60 = vshrl.u32 %v2884_v49, 16  ;;  %v3557_v0 = vld [vmem:[%s3649_s24 + $0xf0] ss:$8 sps:$4 sm:$0xff]   ;;  %v2891_v39 = vld [vmem:[%s3649_s24 + $0x3c] sm:$0x1] }
  0x63   : > { %3201 = vmatpush3.bf16.msra.mxu1 %v3511_v4  ;;  %v3533_v4 = vld [vmem:[%s3649_s24 + $0xa0] ss:$8 sps:$4 sm:$0xff]   ;;  %v1870_v50 = vsel %vm3720_vm2, %v1865_v45, %v1869_v40  ;;  %v3555_v28 = vld [vmem:[%s4156_s3 + $0x30] sm:$0xff]   ;;  %v3553_v33 = vld [vmem:[%s4154_s1 + $0x238] sm:$0xff]  }
  0x64   : > { %3297 = vmatpush3.bf16.msra.mxu0 %v3512_v6  ;;  %3210 = vmatprep.subr.bf16.mxu1 %v3513_v7  ;;  %v2681_v6 = vcombine.low %v706_v2, %v720_v3  ;;  %v3552_v2 = vld [vmem:[%s4156_s3 + $0x20] sm:$0xff]   ;;  %v1928_v3 = vshrl.u32 %v2888_v57, 16 }
  0x65   : > { %3306 = vmatprep.subr.bf16.mxu0 %v3515_v10 }
  0x66   : > { %3203 = vmatmul.mubr.bf16.vlgmr.msra.gmra.mrb[0].mxu1 %v2679_v13  ;;  %v3532_v13 = vld [vmem:[%s4154_s1 + $0x1f8] sm:$0xff]  }
  0x67   : > { %3211 = vmatpush3.bf16.msra.mxu1 %v3513_v7  ;;  %3299 = vmatmul.mubr.bf16.vlgmr.msra.gmra.mrb[0].mxu0 %v3516_v11  ;;  %v3535_v7 = vld [vmem:[%s3649_s24 + $0x58] ss:$8 sps:$4 sm:$0xff]   ;;  %v3529_v11 = vld [vmem:[%s4154_s1 + $0x1f0] sm:$0xff]  }
  0x68   : > { %3307 = vmatpush3.bf16.msra.mxu0 %v3515_v10  ;;  %3212 = vmatprep.subr.bf16.mxu1 %v3517_v14  ;;  %v3527_v10 = vld [vmem:[%s4154_s1 + $0xf0] sm:$0xff]  }
  0x69   : > { %3308 = vmatprep.subr.bf16.mxu0 %v3518_v18  ;;  %3302 = vmatprep.mubr.bf16.mxu0 %v3528_v55 }
  0x6a   : > { %3206 = vmatprep.mubr.bf16.mxu1 %v2680_v63  ;;  %v1917_v63 = vshll.u32 %v2886_v54, 16 }
  0x6b   : > { %3213 = vmatpush3.bf16.msra.mxu1 %v3517_v14  ;;  %v3534_v14 = vld [vmem:[%s3649_s24 + $0xb0] ss:$8 sps:$4 sm:$0xff]  }
  0x6c   : > { %3309 = vmatpush3.bf16.msra.mxu0 %v3518_v18  ;;  %3214 = vmatprep.subr.bf16.mxu1 %v3519_v37  ;;  %v3538_v18 = vld [vmem:[%s4154_s1 + $0x208] sm:$0xff]  }
  0x6d   : > { %3310 = vmatprep.subr.bf16.mxu0 %v3520_v42 }
  0x6e   : > { %3207 = vmatmul.mubr.bf16.gmra.mrb[4].mxu1 %v2681_v6  ;;  %v1909_v6 = vshll.u32 %v3943_v52, 16 }
  0x6f   : > { %3215 = vmatpush3.bf16.msra.mxu1 %v3519_v37  ;;  %3303 = vmatmul.mubr.bf16.gmra.mrb[4].mxu0 %v3530_v61  ;;  %v3541_v37 = vld [vmem:[%s4154_s1 + $0x210] sm:$0xff]   ;;  %v1903_v61 = vshll.u32 %v2884_v49, 16 }
  0x70   : > { %3311 = vmatpush3.bf16.msra.mxu0 %v3520_v42  ;;  %3216 = vmatprep.subr.bf16.mxu1 %v3521_v58  ;;  %v1878_v42 = vor.u32 %v1877_v36, %v1874_v35 }
  0x71   : > { %3312 = vmatprep.subr.bf16.mxu0 %v3522_v62  ;;  %3226 = vmatprep.mubr.bf16.mxu1 %v3533_v4  ;;  %v1931_v4 = vshll.u32 %v2888_v57, 16 }
  0x72   : > { %3322 = vmatprep.mubr.bf16.mxu0 %v3535_v7  ;;  %v1879_v48 = vrot.slane %v1878_v42, 4  ;;  %v3547_v7 = vld [vmem:[%s4154_s1 + $0x228] sm:$0xff]  }
  0x73   : > { %3217 = vmatpush3.bf16.msra.mxu1 %v3521_v58 }
  0x74   : > { %3313 = vmatpush3.bf16.msra.mxu0 %v3522_v62  ;;  %3218 = vmatprep.subr.bf16.mxu1 %v3523_v1  ;;  %v1884_v55 = vsel %vm3720_vm2, %v1879_v48, %v1883_v43  ;;  %v1914_v62 = vshrl.u32 %v2886_v54, 16  ;;  %v2893_v48 = vld [vmem:[%s3649_s24 + $0x44] sm:$0x1] }
  0x75   : > { %3314 = vmatprep.subr.bf16.mxu0 %v3524_v5  ;;  %v2910_v58 = vcombine.low %v1870_v50, %v1884_v55  ;;  %v1951_v50 = vshll.u32 %v2891_v39, 16  ;;  %v1965_v55 = vshll.u32 %v2893_v48, 16 }
  0x77   : > { %3219 = vmatpush3.bf16.msra.mxu1 %v3523_v1  ;;  %v3545_v1 = vld [vmem:[%s4154_s1 + $0x220] sm:$0xff]  }
  0x78   : > { %3315 = vmatpush3.bf16.msra.mxu0 %v3524_v5  ;;  %3220 = vmatprep.subr.bf16.mxu1 %v3525_v8  ;;  %v1895_v5 = vshll.u32 %v3940_v51, 16 }
  0x79   : > { %3316 = vmatprep.subr.bf16.mxu0 %v3526_v9 }
  0x7a   : > { %v1897_v35 = vrot.slane %v1895_v5, 5  ;;  %v3560_v5 = vld [vmem:[%s3649_s24 + $0x120] ss:$8 sps:$4 sm:$0xff]  }
  0x7b   : > { %3221 = vmatpush3.bf16.msra.mxu1 %v3525_v8  ;;  %v3554_v8 = vld [vmem:[%s4156_s3 + $0x28] sm:$0xff]  }
  0x7c   : > { %3317 = vmatpush3.bf16.msra.mxu0 %v3526_v9  ;;  %3222 = vmatprep.subr.bf16.mxu1 %v3527_v10  ;;  %v1888_v9 = vrot.slane %v1886_v56, 4 }
  0x7d   : > { %3318 = vmatprep.subr.bf16.mxu0 %v3529_v11 }
  0x7f   : > { %3223 = vmatpush3.bf16.msra.mxu1 %v3527_v10  ;;  %v1891_v10 = vrot.slane %v1889_v59, 5  ;;  %v1953_v59 = vrot.slane %v1951_v50, 5 }
  0x80   : > { %3319 = vmatpush3.bf16.msra.mxu0 %v3529_v11  ;;  %3224 = vmatprep.subr.bf16.mxu1 %v3531_v12  ;;  %v1902_v11 = vrot.slane %v1900_v60, 4  ;;  %v3558_v60 = vld [vmem:[%s3649_s24 + $0x100] ss:$8 sps:$4 sm:$0xff]  }
  0x81   : > { %3320 = vmatprep.subr.bf16.mxu0 %v3532_v13  ;;  %v1892_v21 = vor.u32 %v1891_v10, %v1888_v9 }
  0x83   : > { %3225 = vmatpush3.bf16.msra.mxu1 %v3531_v12  ;;  %v1905_v12 = vrot.slane %v1903_v61, 5 }
  0x84   : > { %3321 = vmatpush3.bf16.msra.mxu0 %v3532_v13  ;;  %3354 = vmatprep.subr.bf16.mxu1 %v3542_v15  ;;  %v1916_v13 = vrot.slane %v1914_v62, 4 }
  0x85   : > { %3330 = vmatprep.subr.bf16.mxu0 %v3536_v16  ;;  %v1906_v22 = vor.u32 %v1905_v12, %v1902_v11 }
  0x86   : > { %3227 = vmatmul.mubr.bf16.vlgmr.msra.gmra.mrb[0].mxu1 %v3534_v14  ;;  %v1919_v14 = vrot.slane %v1917_v63, 5 }
  0x87   : > { %3323 = vmatmul.mubr.bf16.vlgmr.msra.gmra.mrb[0].mxu0 %v3537_v17  ;;  %3230 = vmatprep.mubr.bf16.mxu1 %v3539_v19  ;;  %v1933_v17 = vrot.slane %v1931_v4, 5  ;;  %v2887_v19 = vld [vmem:[%s3649_s24 + $0x2c] sm:$0x1]  ;;  %v1907_v36 = vrot.slane %v1906_v22, 4 }
  0x88   : > { %3331 = vmatpush3.bf16.msra.mxu0 %v3536_v16  ;;  %3355 = vmatpush3.bf16.msra.mxu1 %v3542_v15  ;;  %v2890_v15 = vld [vmem:[%s3649_s24 + $0x38] sm:$0xf]  ;;  %v1930_v16 = vrot.slane %v1928_v3, 4  ;;  %v1920_v29 = vor.u32 %v1919_v14, %v1916_v13  ;;  %v1923_v30 = vshll.u32 %v2887_v19, 16  ;;  %v4030_v14 = vld [vmem:[%s4157_s4] ss:$0 sm:$0xff] }
  0x89   : > { %3332 = vmatprep.subr.bf16.mxu0 %v3538_v18  ;;  %3356 = vmatprep.subr.bf16.mxu1 %v3544_v20  ;;  %v1942_v23 = vshrl.u32 %v2890_v15, 16  ;;  %v1945_v24 = vshll.u32 %v2890_v15, 16 }
  0x8a   : > { %3326 = vmatprep.mubr.bf16.mxu0 %v3549_v27  ;;  %v3551_v27 = vld [vmem:[%s4154_s1 + $0x230] sm:$0xff]   ;;  %v1934_v31 = vor.u32 %v1933_v17, %v1930_v16  ;;  %v1925_v45 = vrot.slane %v1923_v30, 5  ;;  %v4035_v16 = vld [vmem:[%s4155_s2] ss:$0 sm:$0xff] }
  0x8b   : > { %v1944_v40 = vrot.slane %v1942_v23, 4 }
  0x8c   : > { %3333 = vmatpush3.bf16.msra.mxu0 %v3538_v18  ;;  %3357 = vmatpush3.bf16.msra.mxu1 %v3544_v20  ;;  %v2892_v18 = vld [vmem:[%s3649_s24 + $0x40] sm:$0xf]  ;;  %v2889_v20 = vld [vmem:[%s3649_s24 + $0x34] sm:$0x1]  ;;  %v1935_v46 = vrot.slane %v1934_v31, 4 }
  0x8d   : > { %3334 = vmatprep.subr.bf16.mxu0 %v3541_v37  ;;  %3358 = vmatprep.subr.bf16.mxu1 %v3546_v38  ;;  %v1956_v25 = vshrl.u32 %v2892_v18, 16  ;;  %v1959_v26 = vshll.u32 %v2892_v18, 16  ;;  %v1937_v32 = vshll.u32 %v2889_v20, 16 }
  0x8e   : > { %3231 = vmatmul.mubr.bf16.gmra.mrb[4].mxu1 %v3540_v34  ;;  %v1893_v34 = vrot.slane %v1892_v21, 4 }
  0x8f   : > { %3327 = vmatmul.mubr.bf16.gmra.mrb[4].mxu0 %v3550_v41  ;;  %3370 = vmatprep.mubr.bf16.mxu1 %v3557_v0  ;;  %v1947_v41 = vrot.slane %v1945_v24, 5  ;;  %v1958_v42 = vrot.slane %v1956_v25, 4  ;;  %v1961_v43 = vrot.slane %v1959_v26, 5  ;;  %v1967_v0 = vrot.slane %v1965_v55, 5 }
  0x90   : > { %3335 = vmatpush3.bf16.msra.mxu0 %v3541_v37  ;;  %3359 = vmatpush3.bf16.msra.mxu1 %v3546_v38  ;;  %v1911_v37 = vrot.slane %v1909_v6, 5  ;;  %v3556_v38 = vld [vmem:[%s4156_s3 + $0x38] sm:$0xff]   ;;  %v1898_v49 = vsel %vm3720_vm2, %v1893_v34, %v1897_v35 }
  0x91   : > { %3336 = vmatprep.subr.bf16.mxu0 %v3543_v44  ;;  %3360 = vmatprep.subr.bf16.mxu1 %v3548_v47  ;;  %v1948_v52 = vor.u32 %v1947_v41, %v1944_v40  ;;  %v1962_v54 = vor.u32 %v1961_v43, %v1958_v42 }
  0x92   : > { %3346 = vmatprep.mubr.bf16.mxu0 %v2910_v58  ;;  %v1912_v51 = vsel %vm3720_vm2, %v1907_v36, %v1911_v37 }
  0x93   : > { %v2911_v58 = vcombine.low %v1898_v49, %v1912_v51  ;;  %v1949_v62 = vrot.slane %v1948_v52, 4  ;;  %v1963_v63 = vrot.slane %v1962_v54, 4  ;;  %v2939_v52 = vld [vmem:[%s4001_s18 + $0x18] sm:$0xf]  ;;  %v2941_v54 = vld [vmem:[%s4001_s18 + $0x1c] sm:$0x1] }
  0x94   : > { %3337 = vmatpush3.bf16.msra.mxu0 %v3543_v44  ;;  %3361 = vmatpush3.bf16.msra.mxu1 %v3548_v47  ;;  %v1921_v44 = vrot.slane %v1920_v29, 4  ;;  %v1939_v47 = vrot.slane %v1937_v32, 5 }
  0x95   : > { %3338 = vmatprep.subr.bf16.mxu0 %v3545_v1  ;;  %3362 = vmatprep.subr.bf16.mxu1 %v3552_v2  ;;  %v1968_v3 = vsel %vm3720_vm2, %v1963_v63, %v1967_v0  ;;  %v2931_v63 = vld [vmem:[%s4001_s18 + $0x8] sm:$0xf] }
  0x96   : > { %v1926_v56 = vsel %vm3720_vm2, %v1921_v44, %v1925_v45  ;;  %v1940_v57 = vsel %vm3720_vm2, %v1935_v46, %v1939_v47 }
  0x97   : > { %v2912_v61 = vcombine.low %v1926_v56, %v1940_v57 }
  0x98   : > { %3339 = vmatpush3.bf16.msra.mxu0 %v3545_v1  ;;  %3363 = vmatpush3.bf16.msra.mxu1 %v3552_v2  ;;  %v3559_v1 = vld [vmem:[%s3649_s24 + $0x110] ss:$8 sps:$4 sm:$0xff]   ;;  %v1954_v2 = vsel %vm3720_vm2, %v1949_v62, %v1953_v59 }
  0x99   : > { %3340 = vmatprep.subr.bf16.mxu0 %v3547_v7  ;;  %3364 = vmatprep.subr.bf16.mxu1 %v3554_v8  ;;  %v2913_v4 = vcombine.low %v1954_v2, %v1968_v3 }
  0x9c   : > { %3341 = vmatpush3.bf16.msra.mxu0 %v3547_v7  ;;  %3365 = vmatpush3.bf16.msra.mxu1 %v3554_v8 }
  0x9d   : > { %3342 = vmatprep.subr.bf16.mxu0 %v3551_v27  ;;  %3366 = vmatprep.subr.bf16.mxu1 %v3555_v28 }
  0xa0   : > { %3343 = vmatpush3.bf16.msra.mxu0 %v3551_v27  ;;  %3367 = vmatpush3.bf16.msra.mxu1 %v3555_v28 }
  0xa1   : > { %3344 = vmatprep.subr.bf16.mxu0 %v3553_v33  ;;  %3368 = vmatprep.subr.bf16.mxu1 %v3556_v38 }
  0xa4   : > { %3345 = vmatpush3.bf16.msra.mxu0 %v3553_v33  ;;  %3369 = vmatpush3.bf16.msra.mxu1 %v3556_v38 }
  0xa7   : > { %3347 = vmatmul.mubr.bf16.vlgmr.msra.gmra.mrb[0].mxu0 %v2911_v58  ;;  %3371 = vmatmul.mubr.bf16.vlgmr.msra.gmra.mrb[8].mxu1 %v3558_v60 }
  0xa8   : > { %3350 = vmatprep.mubr.bf16.mxu0 %v2912_v61  ;;  %3374 = vmatprep.mubr.bf16.mxu1 %v3559_v1 }
  0xaf   : > { %3351 = vmatmul.mubr.bf16.gmra.mrb[4].mxu0 %v2913_v4  ;;  %3375 = vmatmul.mubr.bf16.gmra.mrb[12].mxu1 %v3560_v5 }
 0x159   : > { %v3228_v6 = vpop.f32.mrb[0].mxu1 }
 0x15a   : > { %v1007_v7 = vpop.f32.mrb[1].mxu1 }
 0x15b   : > { %v3229_v8 = vpop.f32.mrb[2].mxu1 }
 0x15c   : > { %v1010_v9 = vpop.f32.mrb[3].mxu1 }
 0x161   : > { %v3232_v10 = vpop.f32.mrb[4].mxu1 }
 0x162   : > { %v1023_v11 = vpop.f32.mrb[5].mxu1 }
 0x163   : > { %v4023_v12 = vpop.f32.mrb[6].mxu1 }
 0x164   : > { %v4025_v13 = vpop.f32.mrb[7].mxu1 }
 0x17a   : > { %v3348_v15 = vpop.f32.mrb[0].mxu0  ;;  %v3372_v17 = vpop.f32.mrb[8].mxu1 }
 0x17b   : > { %v3378_v18 = vadd.f32 %v3348_v15, %v3228_v6  ;;  %v2084_v19 = vpop.f32.mrb[1].mxu0  ;;  %v2479_v20 = vadd.f32 %v3372_v17, %v4030_v14  ;;  %v2470_v21 = vpop.f32.mrb[9].mxu1  ;;  %v2933_v6 = vld [vmem:[%s4001_s18 + $0xc] sm:$0x1]  ;;  %v2943_v17 = vld [vmem:[%s4001_s18 + $0x20] sm:$0xf] }
 0x17c   : > { %v3379_v22 = vadd.f32 %v2084_v19, %v1007_v7  ;;  %v3349_v23 = vpop.f32.mrb[2].mxu0  ;;  %v2471_v24 = vadd.f32 %v4030_v14, %v2470_v21  ;;  %v3373_v25 = vpop.f32.mrb[10].mxu1  ;;  %v2945_v21 = vld [vmem:[%s4001_s18 + $0x24] sm:$0x1] }
 0x17d   : > { %v2132_v26 = vadd.f32 %v3378_v18, %v4035_v16  ;;  %v3380_v27 = vadd.f32 %v3349_v23, %v3229_v8  ;;  %v2087_v28 = vpop.f32.mrb[3].mxu0  ;;  %v2482_v29 = vadd.f32 %v3373_v25, %v4030_v14  ;;  %v2473_v30 = vpop.f32.mrb[11].mxu1 }
 0x17e   : > { %v2130_v31 = vadd.f32 %v3379_v22, %v4035_v16  ;;  %v3381_v32 = vadd.f32 %v2087_v28, %v1010_v9  ;;  %v2474_v33 = vadd.f32 %v4030_v14, %v2473_v30  ;;  %v2935_v28 = vld [vmem:[%s4001_s18 + $0x10] sm:$0xf] }
 0x17f   : > { %v2140_v34 = vmax.f32 %v2132_v26, 0.0  ;;  %v2133_v35 = vadd.f32 %v3380_v27, %v4035_v16  ;;  %v3003_v36 = vpack.c.bf16 %v2482_v29, %v2479_v20  ;;  %v2937_v29 = vld [vmem:[%s4001_s18 + $0x14] sm:$0x1] }
 0x180   : > { %v2138_v37 = vmax.f32 %v2130_v31, 0.0  ;;  %v2131_v38 = vadd.f32 %v3381_v32, %v4035_v16  ;;  %v2998_v39 = vpack.c.bf16 %v2474_v33, %v2471_v24 }
 0x181   : > { %v2989_v40 = vpack.c.bf16 %v2140_v34, %v2140_v34  ;;  %v2141_v41 = vmax.f32 %v2133_v35, 0.0  ;;  %3015 = vst [vmem:[%s4046_s28 + $0x8] sm:$0xff] %v3003_v36  }
 0x182   : > { %v2987_v42 = vpack.c.bf16 %v2138_v37, %v2138_v37  ;;  %v2139_v43 = vmax.f32 %v2131_v38, 0.0  ;;  %v3352_v44 = vpop.f32.mrb[4].mxu0  ;;  %2999 = vst [vmem:[%s4046_s28] sm:$0xff] %v2998_v39   ;;  %v4053_v45 = vpop.f32.mrb[12].mxu1 }
 0x183   : > { %v2215_v46 = vshrl.u32 %v2989_v40, 16  ;;  %v2218_v47 = vshll.u32 %v2989_v40, 16  ;;  %v2990_v48 = vpack.c.bf16 %v2141_v41, %v2141_v41  ;;  %v3382_v49 = vadd.f32 %v3352_v44, %v3232_v10  ;;  %v2100_v50 = vpop.f32.mrb[5].mxu0  ;;  %v4055_v51 = vpop.f32.mrb[13].mxu1 }
 0x184   : > { %v2199_v55 = vshrl.u32 %v2987_v42, 16  ;;  %v2202_v56 = vshll.u32 %v2987_v42, 16  ;;  %v2988_v57 = vpack.c.bf16 %v2139_v43, %v2139_v43  ;;  %v3383_v58 = vadd.f32 %v2100_v50, %v1023_v11  ;;  %v3353_v59 = vpop.f32.mrb[6].mxu0  ;;  %v4059_v60 = vpop.f32.mrb[14].mxu1 }
 0x185   : > { %v2217_v61 = vrot.slane %v2215_v46, 7  ;;  %v2223_v0 = vshrl.u32 %v2990_v48, 16  ;;  %v2226_v1 = vshll.u32 %v2990_v48, 16  ;;  %v2136_v2 = vadd.f32 %v3382_v49, %v4035_v16  ;;  %v2103_v3 = vpop.f32.mrb[7].mxu0  ;;  %v2489_v4 = vpop.f32.mrb[15].mxu1 }
 0x186   : > { %v2201_v53 = vrot.slane %v2199_v55, 7  ;;  %v2207_v7 = vshrl.u32 %v2988_v57, 16  ;;  %v2210_v8 = vshll.u32 %v2988_v57, 16  ;;  %v2134_v9 = vadd.f32 %v3383_v58, %v4035_v16  ;;  %v2947_v57 = vld [vmem:[%s4001_s18 + $0x28] sm:$0xf] }
 0x187   : > { %v2220_v10 = vor.u32 %v2218_v47, %v2217_v61  ;;  %v2221_v11 = vrot.slane %v2217_v61, 4  ;;  %v2225_v15 = vrot.slane %v2223_v0, 7  ;;  %v2144_v18 = vmax.f32 %v2136_v2, 0.0  ;;  %v2949_v58 = vld [vmem:[%s4001_s18 + $0x2c] sm:$0x1] }
 0x188   : > { %v2204_v19 = vor.u32 %v2202_v56, %v2201_v53  ;;  %v2205_v20 = vrot.slane %v2201_v53, 4  ;;  %v2209_v22 = vrot.slane %v2207_v7, 7  ;;  %v2142_v23 = vmax.f32 %v2134_v9, 0.0 }
 0x189   : > { %v2298_v24 = vsel %vm4063_vm7, %v2220_v10, %v2939_v52  ;;  %v2301_v25 = vsel %vm4071_vm8, %v2221_v11, %v2941_v54  ;;  %v2228_v26 = vor.u32 %v2226_v1, %v2225_v15  ;;  %v2229_v27 = vrot.slane %v2225_v15, 4  ;;  %v2957_v52 = vld [vmem:[%s4001_s18 + $0x3c] sm:$0x1]  ;;  %v2959_v10 = vld [vmem:[%s4001_s18 + $0x40] sm:$0xf] }
 0x18a   : > { %2940 = vst [vmem:[%s4001_s18 + $0x18] sm:$0xf] %v2298_v24  ;;  %2942 = vst [vmem:[%s4001_s18 + $0x1c] sm:$0x1] %v2301_v25  ;;  %v2283_v30 = vsel %vm4063_vm7, %v2204_v19, %v2931_v63  ;;  %v2289_v31 = vsel %vm4071_vm8, %v2205_v20, %v2933_v6  ;;  %v2212_v32 = vor.u32 %v2210_v8, %v2209_v22  ;;  %v2213_v33 = vrot.slane %v2209_v22, 4 }
 0x18b   : > { %2932 = vst [vmem:[%s4001_s18 + $0x8] sm:$0xf] %v2283_v30  ;;  %2934 = vst [vmem:[%s4001_s18 + $0xc] sm:$0x1] %v2289_v31  ;;  %v2304_v34 = vsel %vm4063_vm7, %v2228_v26, %v2943_v17  ;;  %v2307_v35 = vsel %vm4071_vm8, %v2229_v27, %v2945_v21  ;;  %v2993_v36 = vpack.c.bf16 %v2144_v18, %v2144_v18  ;;  %v2961_v17 = vld [vmem:[%s4001_s18 + $0x44] sm:$0x1] }
 0x18c   : > { %v2991_v37 = vpack.c.bf16 %v2142_v23, %v2142_v23  ;;  %2944 = vst [vmem:[%s4001_s18 + $0x20] sm:$0xf] %v2304_v34  ;;  %2946 = vst [vmem:[%s4001_s18 + $0x24] sm:$0x1] %v2307_v35  ;;  %v2292_v38 = vsel %vm4063_vm7, %v2212_v32, %v2935_v28  ;;  %v2295_v39 = vsel %vm4071_vm8, %v2213_v33, %v2937_v29  ;;  %v2951_v18 = vld [vmem:[%s4001_s18 + $0x30] sm:$0xf] }
 0x18d   : > { %v3384_v40 = vadd.f32 %v3353_v59, %v4023_v12  ;;  %v3385_v41 = vadd.f32 %v2103_v3, %v4025_v13  ;;  %2936 = vst [vmem:[%s4001_s18 + $0x10] sm:$0xf] %v2292_v38  ;;  %2938 = vst [vmem:[%s4001_s18 + $0x14] sm:$0x1] %v2295_v39  ;;  %v2247_v42 = vshrl.u32 %v2993_v36, 16  ;;  %v2250_v43 = vshll.u32 %v2993_v36, 16 }
 0x18e   : > { %v2231_v44 = vshrl.u32 %v2991_v37, 16  ;;  %v2234_v46 = vshll.u32 %v2991_v37, 16  ;;  %v2495_v49 = vadd.f32 %v4053_v45, %v4030_v14  ;;  %v2487_v12 = vadd.f32 %v4030_v14, %v4055_v51  ;;  %v2955_v13 = vld [vmem:[%s4001_s18 + $0x38] sm:$0xf]  ;;  %v2953_v19 = vld [vmem:[%s4001_s18 + $0x34] sm:$0x1] }
 0x18f   : > { %v2137_v47 = vadd.f32 %v3384_v40, %v4035_v16  ;;  %v2135_v48 = vadd.f32 %v3385_v41, %v4035_v16  ;;  %v2249_v50 = vrot.slane %v2247_v42, 7  ;;  %v2498_v55 = vadd.f32 %v4059_v60, %v4030_v14 }
 0x190   : > { %v2233_v54 = vrot.slane %v2231_v44, 7  ;;  %v2490_v56 = vadd.f32 %v4030_v14, %v2489_v4 }
 0x191   : > { %v2145_v16 = vmax.f32 %v2137_v47, 0.0  ;;  %v2143_v59 = vmax.f32 %v2135_v48, 0.0  ;;  %v2252_v45 = vor.u32 %v2250_v43, %v2249_v50  ;;  %v2253_v61 = vrot.slane %v2249_v50, 4 }
 0x192   : > { %v2236_v51 = vor.u32 %v2234_v46, %v2233_v54  ;;  %v2237_v63 = vrot.slane %v2233_v54, 4  ;;  %v3013_v2 = vpack.c.bf16 %v2498_v55, %v2495_v49  ;;  %v3008_v60 = vpack.c.bf16 %v2490_v56, %v2487_v12 }
 0x193   : > { %v2994_v0 = vpack.c.bf16 %v2145_v16, %v2145_v16  ;;  %v2992_v1 = vpack.c.bf16 %v2143_v59, %v2143_v59  ;;  %v2322_v14 = vsel %vm4063_vm7, %v2252_v45, %v2955_v13  ;;  %v2325_v3 = vsel %vm4071_vm8, %v2253_v61, %v2957_v52 }
 0x194   : > { %v2310_v4 = vsel %vm4063_vm7, %v2236_v51, %v2947_v57  ;;  %v2313_v53 = vsel %vm4071_vm8, %v2237_v63, %v2949_v58  ;;  %2956 = vst [vmem:[%s4001_s18 + $0x38] sm:$0xf] %v2322_v14  ;;  %2958 = vst [vmem:[%s4001_s18 + $0x3c] sm:$0x1] %v2325_v3 }
 0x195   : > { %2948 = vst [vmem:[%s4001_s18 + $0x28] sm:$0xf] %v2310_v4  ;;  %2950 = vst [vmem:[%s4001_s18 + $0x2c] sm:$0x1] %v2313_v53  ;;  %v2255_v6 = vshrl.u32 %v2994_v0, 16  ;;  %v2239_v7 = vshrl.u32 %v2992_v1, 16 }
 0x196   : > { %3017 = vst [vmem:[%s4046_s28 + $0x18] sm:$0xff] %v3013_v2   ;;  %3016 = vst [vmem:[%s4046_s28 + $0x10] sm:$0xff] %v3008_v60   ;;  %v2258_v9 = vshll.u32 %v2994_v0, 16  ;;  %v2242_v15 = vshll.u32 %v2992_v1, 16 }
 0x197   : > { %v2257_v8 = vrot.slane %v2255_v6, 7  ;;  %v2241_v11 = vrot.slane %v2239_v7, 7 }
 0x199   : > { %v2260_v20 = vor.u32 %v2258_v9, %v2257_v8  ;;  %v2261_v21 = vrot.slane %v2257_v8, 4  ;;  %v2244_v22 = vor.u32 %v2242_v15, %v2241_v11  ;;  %v2245_v23 = vrot.slane %v2241_v11, 4 }
 0x19b   : > { %v2328_v24 = vsel %vm4063_vm7, %v2260_v20, %v2959_v10  ;;  %v2331_v25 = vsel %vm4071_vm8, %v2261_v21, %v2961_v17  ;;  %v2316_v26 = vsel %vm4063_vm7, %v2244_v22, %v2951_v18  ;;  %v2319_v27 = vsel %vm4071_vm8, %v2245_v23, %v2953_v19 }
 0x19c   : > { %2960 = vst [vmem:[%s4001_s18 + $0x40] sm:$0xf] %v2328_v24  ;;  %2962 = vst [vmem:[%s4001_s18 + $0x44] sm:$0x1] %v2331_v25 }
 0x19d   : > { %2952 = vst [vmem:[%s4001_s18 + $0x30] sm:$0xf] %v2316_v26  ;;  %2954 = vst [vmem:[%s4001_s18 + $0x34] sm:$0x1] %v2319_v27 }
 0x19e PF: > { %s17_s21 = sadd.s32 1, %s3567_s21  }
 0x19f   : > { %p14_p4 = scmp.ge.s32.totalorder %s17_s21, 4  }
 0x1a1   :  { %16 = sbr.rel (!%p14_p4) target bundleno = 1 (0x1), region = 96 }

</bundles_post_ra>
